<compile_context>
chip_gen: v5e
topology: v5e:2x2
jax: 0.10.0
libtpu: 0.0.40
codegen_flags: <defaults>
</compile_context>

<pallas_src>
import functools

import jax
import jax.numpy as jnp
from jax.experimental import pallas as pl
from jax.experimental.pallas import tpu as pltpu


# ---------------------------------------------------------------------------
# Fused Bottleneck kernel: one batch element per grid step, everything in VMEM.
# ---------------------------------------------------------------------------
def _make_fused_kernel(*, H, W, stride, connect, use_sge):
    Hout = (H - 1) // stride + 1   # conv3x3, pad=1
    Wout = (W - 1) // stride + 1

    def kernel(*refs):
        idx = 0
        x_ref = refs[idx]; idx += 1      # (1, H*W, Cin)  f32
        w1_ref = refs[idx]; idx += 1     # (Cin, hid)     bf16
        s1_ref = refs[idx]; idx += 1     # (1, hid)       folded BN1 scale
        b1_ref = refs[idx]; idx += 1     # (1, hid)       folded BN1 bias
        a1_ref = refs[idx]; idx += 1     # (1, hid)       PReLU1
        wdw_ref = refs[idx]; idx += 1    # (3, 3, hid)    f32
        s2_ref = refs[idx]; idx += 1
        b2_ref = refs[idx]; idx += 1
        a2_ref = refs[idx]; idx += 1
        if use_sge:
            cg_ref = refs[idx]; idx += 1   # (hid, G) one-hot channel->group, bf16
            gc_ref = refs[idx]; idx += 1   # (G, hid) one-hot group->channel, bf16
            gw_ref = refs[idx]; idx += 1   # (1, G)
            gb_ref = refs[idx]; idx += 1   # (1, G)
        w3_ref = refs[idx]; idx += 1     # (hid, oup)     bf16
        s3_ref = refs[idx]; idx += 1     # (1, oup)
        b3_ref = refs[idx]; idx += 1     # (1, oup)
        o_ref = refs[idx]                # (1, Hout*Wout, oup)

        hid = w1_ref.shape[1]

        # ---- 1) 1x1 conv (MXU, bf16-in / f32-acc) + BN + PReLU --------------
        x2d = x_ref[0]                                                 # (H*W, Cin) f32
        y = jnp.dot(x2d.astype(jnp.bfloat16), w1_ref[...],
                    preferred_element_type=jnp.float32)                # (H*W, hid)
        y = y * s1_ref[...] + b1_ref[...]
        y = jnp.where(y >= 0.0, y, a1_ref[...] * y)

        # ---- 2) depthwise 3x3, pad=1, stride s + BN + PReLU ------------------
        y3 = y.reshape(H, W, hid)                                      # free reshape
        zrow = jnp.zeros((1, W, hid), jnp.float32)
        yp = jnp.concatenate([zrow, y3, zrow], axis=0)                 # (H+2, W, hid)
        zcol = jnp.zeros((H + 2, 1, hid), jnp.float32)
        ypw = jnp.concatenate([zcol, yp, zcol], axis=1)                # (H+2, W+2, hid)

        # Exactly three W-shifted copies, reused across all kh taps.
        xs = [ypw[:, kw:kw + W, :] for kw in range(3)]                 # each (H+2, W, hid)

        wdw = wdw_ref[...]                                             # (3, 3, hid)
        row_span = 1 + stride * (Hout - 1)
        acc = None
        for kh in range(3):
            for kw in range(3):
                if stride == 1:
                    rows = xs[kw][kh:kh + H]                           # cheap major-axis slice
                else:
                    # only compute output rows: strided slice along major axis
                    rows = xs[kw][kh:kh + row_span:stride]             # (Hout, W, hid)
                term = rows * wdw[kh, kw, :]
                acc = term if acc is None else acc + term              # (Hout, W, hid)
        if stride > 1:
            acc = acc[:, ::stride, :]                                  # (Hout, Wout, hid)
        y = acc * s2_ref[...] + b2_ref[...]
        y = jnp.where(y >= 0.0, y, a2_ref[...] * y)

        n = Hout * Wout
        z = y.reshape(n, hid)                                          # free reshape

        # ---- 3) SpatialGroupEnhance (all reductions / group ops on the MXU) --
        if use_sge:
            inv_n = 1.0 / n
            ones_n = jnp.ones((1, n), jnp.bfloat16)                    # ones-row for MXU sums
            pool = jnp.dot(ones_n, z.astype(jnp.bfloat16),
                           preferred_element_type=jnp.float32) * inv_n  # (1, hid) spatial mean
            t = jnp.dot((z * pool).astype(jnp.bfloat16), cg_ref[...],
                        preferred_element_type=jnp.float32)             # (n, G) group sums
            tmean = jnp.dot(ones_n, t.astype(jnp.bfloat16),
                            preferred_element_type=jnp.float32) * inv_n
            tc = t - tmean
            var = jnp.dot(ones_n, (tc * tc).astype(jnp.bfloat16),
                          preferred_element_type=jnp.float32) * (1.0 / max(n - 1, 1))
            std = jnp.sqrt(var) + 1e-5      # torch.Tensor.std: unbiased (ddof=1)
            tn = tc * pl.reciprocal(std, approx=True)                   # EUP reciprocal
            tn = tn * gw_ref[...] + gb_ref[...]
            gate = jax.nn.sigmoid(tn)                                    # (n, G)
            z = z * jnp.dot(gate.astype(jnp.bfloat16), gc_ref[...],
                            preferred_element_type=jnp.float32)          # broadcast G->C

        # ---- 4) 1x1 conv (MXU, bf16-in / f32-acc) + BN (+ fused residual) ----
        out = jnp.dot(z.astype(jnp.bfloat16), w3_ref[...],
                      preferred_element_type=jnp.float32)
        out = out * s3_ref[...] + b3_ref[...]
        if connect:
            out = out + x2d
        o_ref[0] = out.astype(o_ref.dtype)

    return kernel


def _vmem_estimate_bytes(*, H, W, inp, hid, oup, stride, groups):
    Hout = (H - 1) // stride + 1
    Wout = (W - 1) // stride + 1
    n_in, n_out = H * W, Hout * Wout
    f32 = 4
    est = (2 * n_in * inp * f32                      # x block (double-buffered)
           + 2 * n_out * oup * f32                   # out block (double-buffered)
           + n_in * hid * f32                        # y after conv1
           + 4 * (H + 2) * (W + 2) * hid * f32       # slim padded buf + 3 shifted copies
           + 2 * Hout * W * hid * f32                # depthwise acc + post-BN
           + 2 * n_out * hid * f32                   # z + gated z
           + 2 * (inp * hid + hid * oup)             # bf16 weights
           + 3 * n_out * max(groups, 1) * f32)       # SGE t / tc / gate
    return est


# ---------------------------------------------------------------------------
# NHWC-native wrapper (preferred entry point: no boundary relayouts).
# ---------------------------------------------------------------------------
def bottleneck_forward_nhwc(x_nhwc, p, *, stride, sgegroup):
    sgegroup = 64 if sgegroup is None else sgegroup
    B, H, W, inp = x_nhwc.shape
    hid = p["w1"].shape[1]
    oup = p["w3"].shape[1]
    connect = (stride == 1) and (inp == oup)
    use_sge = sgegroup > 0
    Hout = (H - 1) // stride + 1
    Wout = (W - 1) // stride + 1
    n_in, n_out = H * W, Hout * Wout

    x2d = x_nhwc.reshape(B, n_in, inp).astype(jnp.float32)  # free row-major reshape

    def bc(shape):  # broadcast spec for a small (weight/param) operand
        return pl.BlockSpec(shape, lambda b: (0,) * len(shape))

    # bf16 MXU operands shipped over HBM; BN/PReLU params stay f32.
    w1 = p["w1"].astype(jnp.bfloat16)
    w3 = p["w3"].astype(jnp.bfloat16)

    inputs = [x2d, w1,
              p["bn1_scale"].reshape(1, hid), p["bn1_bias"].reshape(1, hid),
              p["prelu1"].reshape(1, hid),
              p["w_dw"].astype(jnp.float32),
              p["bn2_scale"].reshape(1, hid), p["bn2_bias"].reshape(1, hid),
              p["prelu2"].reshape(1, hid)]
    in_specs = [pl.BlockSpec((1, n_in, inp), lambda b: (b, 0, 0)),
                bc((inp, hid)), bc((1, hid)), bc((1, hid)), bc((1, hid)),
                bc((3, 3, hid)),
                bc((1, hid)), bc((1, hid)), bc((1, hid))]

    if use_sge:
        G = sgegroup
        assert hid % G == 0, "hidden channels must be divisible by sge groups"
        cg = (jnp.arange(hid)[:, None] // (hid // G)
              == jnp.arange(G)[None, :]).astype(jnp.bfloat16)          # (hid, G)
        inputs += [cg, cg.T, p["sge_w"].reshape(1, G), p["sge_b"].reshape(1, G)]
        in_specs += [bc((hid, G)), bc((G, hid)), bc((1, G)), bc((1, G))]

    inputs += [w3, p["bn3_scale"].reshape(1, oup), p["bn3_bias"].reshape(1, oup)]
    in_specs += [bc((hid, oup)), bc((1, oup)), bc((1, oup))]

    kernel = _make_fused_kernel(H=H, W=W, stride=stride, connect=connect,
                                use_sge=use_sge)

    est = _vmem_estimate_bytes(H=H, W=W, inp=inp, hid=hid, oup=oup,
                               stride=stride, groups=sgegroup)
    # Clamp: >= 32 MiB (beats v5e's 16 MiB scoped default), <= 64 MiB (v7x physical).
    vmem_limit = int(min(max(2 * est, 32 * 1024 * 1024), 64 * 1024 * 1024))

    out = pl.pallas_call(
        kernel,
        out_shape=jax.ShapeDtypeStruct((B, n_out, oup), jnp.float32),
        grid=(B,),
        in_specs=in_specs,
        out_specs=pl.BlockSpec((1, n_out, oup), lambda b: (b, 0, 0)),
        compiler_params=pltpu.CompilerParams(
            dimension_semantics=("parallel",),
            vmem_limit_bytes=vmem_limit),
    )(*inputs)
    return out.reshape(B, Hout, Wout, oup)


# ---------------------------------------------------------------------------
# PyTorch-parity entry point: NCHW in / NCHW out.
# ---------------------------------------------------------------------------
def bottleneck_forward(x_nchw, p, *, inp, oup, stride, sgegroup):
    # TODO(synk): these NCHW<->NHWC transposes are XLA relayouts through HBM;
    #             callers that can supply NHWC should call
    #             bottleneck_forward_nhwc directly.
    B, Cin, H, W = x_nchw.shape
    assert Cin == inp and p["w3"].shape[1] == oup
    x_nhwc = jnp.transpose(x_nchw, (0, 2, 3, 1))
    y = bottleneck_forward_nhwc(x_nhwc, p, stride=stride, sgegroup=sgegroup)
    return jnp.transpose(y, (0, 3, 1, 2))


# ---------------------------------------------------------------------------
# Deterministic parameter construction (shapes match the PyTorch __init__).
# ---------------------------------------------------------------------------
def make_params(key, *, inp, oup, expansion, sgegroup):
    hid = int(inp * expansion)
    ks = jax.random.split(key, 20)

    def bn_fold(kg, kb, km, kv, c):
        gamma = jax.random.uniform(kg, (c,), minval=0.5, maxval=1.5)
        beta = jax.random.normal(kb, (c,)) * 0.1
        rmean = jax.random.normal(km, (c,)) * 0.1
        rvar = jax.random.uniform(kv, (c,), minval=0.5, maxval=1.5)
        scale = gamma / jnp.sqrt(rvar + 1e-5)
        bias = beta - rmean * scale
        return scale.astype(jnp.float32), bias.astype(jnp.float32)

    bn1_s, bn1_b = bn_fold(ks[3], ks[4], ks[5], ks[6], hid)
    bn2_s, bn2_b = bn_fold(ks[7], ks[8], ks[9], ks[10], hid)
    bn3_s, bn3_b = bn_fold(ks[11], ks[12], ks[13], ks[14], oup)

    return {
        # conv weights stored in matmul / HWC-friendly form
        "w1": (jax.random.normal(ks[0], (inp, hid)) * 0.1).astype(jnp.float32),
        "w_dw": (jax.random.normal(ks[1], (3, 3, hid)) * 0.1).astype(jnp.float32),
        "w3": (jax.random.normal(ks[2], (hid, oup)) * 0.1).astype(jnp.float32),
        "bn1_scale": bn1_s, "bn1_bias": bn1_b,
        "bn2_scale": bn2_s, "bn2_bias": bn2_b,
        "bn3_scale": bn3_s, "bn3_bias": bn3_b,
        # PReLU default init = 0.25 per channel
        "prelu1": jnp.full((hid,), 0.25, jnp.float32),
        "prelu2": jnp.full((hid,), 0.25, jnp.float32),
        # SGE params exactly as in __init__: weight=zeros, bias=ones
        "sge_w": jnp.zeros((max(sgegroup, 1),), jnp.float32),
        "sge_b": jnp.ones((max(sgegroup, 1),), jnp.float32),
    }


if __name__ == "__main__":
    # Small config consistent with the module: inp=oup=8, stride=1, expansion=2
    # -> hidden_dim=16, sgegroup=4 (divides hidden_dim), spatial 16x16, batch 2.
    B, INP, OUP, H, W = 2, 8, 8, 16, 16
    STRIDE, EXPANSION, SGEGROUP = 1, 2, 4

    key = jax.random.PRNGKey(0)
    k_x, k_p = jax.random.split(key)
    x = jax.random.normal(k_x, (B, INP, H, W), dtype=jnp.float32)
    params = make_params(k_p, inp=INP, oup=OUP, expansion=EXPANSION,
                         sgegroup=SGEGROUP)

    fwd = jax.jit(functools.partial(bottleneck_forward, inp=INP, oup=OUP,
                                    stride=STRIDE, sgegroup=SGEGROUP))
    out = fwd(x, params)
    jax.block_until_ready(out)
    assert out.shape == (B, OUP, H // STRIDE, W // STRIDE)
    assert bool(jnp.all(jnp.isfinite(out)))
    print("KERNEL_OK")
</pallas_src>

<mosaic_0001>
module attributes {stable_mosaic.version = 11 : i64} {
  func.func @kernel(%arg0: i32, %arg1: memref<1x256x8xf32, #tpu.memory_space<vmem>>, %arg2: memref<8x16xbf16, #tpu.memory_space<vmem>>, %arg3: memref<1x16xf32, #tpu.memory_space<vmem>>, %arg4: memref<1x16xf32, #tpu.memory_space<vmem>>, %arg5: memref<1x16xf32, #tpu.memory_space<vmem>>, %arg6: memref<3x3x16xf32, #tpu.memory_space<vmem>>, %arg7: memref<1x16xf32, #tpu.memory_space<vmem>>, %arg8: memref<1x16xf32, #tpu.memory_space<vmem>>, %arg9: memref<1x16xf32, #tpu.memory_space<vmem>>, %arg10: memref<16x4xbf16, #tpu.memory_space<vmem>>, %arg11: memref<4x16xbf16, #tpu.memory_space<vmem>>, %arg12: memref<1x4xf32, #tpu.memory_space<vmem>>, %arg13: memref<1x4xf32, #tpu.memory_space<vmem>>, %arg14: memref<16x8xbf16, #tpu.memory_space<vmem>>, %arg15: memref<1x8xf32, #tpu.memory_space<vmem>>, %arg16: memref<1x8xf32, #tpu.memory_space<vmem>>, %arg17: memref<1x256x8xf32, #tpu.memory_space<vmem>>) attributes {dimension_semantics = [#tpu.dimension_semantics<parallel>], iteration_bounds = array<i64: 2>, scalar_prefetch = 0 : i64, scratch_operands = 0 : i64, tpu.core_type = #tpu.core_type<tc>, window_params = [{transform_indices = @transform_0, window_bounds = array<i64: 1, 256, 8>}, {pipeline_mode = #tpu.pipeline_mode<synchronous>, transform_indices = @transform_1, window_bounds = array<i64: 8, 16>}, {pipeline_mode = #tpu.pipeline_mode<synchronous>, transform_indices = @transform_2, window_bounds = array<i64: 1, 16>}, {pipeline_mode = #tpu.pipeline_mode<synchronous>, transform_indices = @transform_3, window_bounds = array<i64: 1, 16>}, {pipeline_mode = #tpu.pipeline_mode<synchronous>, transform_indices = @transform_4, window_bounds = array<i64: 1, 16>}, {pipeline_mode = #tpu.pipeline_mode<synchronous>, transform_indices = @transform_5, window_bounds = array<i64: 3, 3, 16>}, {pipeline_mode = #tpu.pipeline_mode<synchronous>, transform_indices = @transform_6, window_bounds = array<i64: 1, 16>}, {pipeline_mode = #tpu.pipeline_mode<synchronous>, transform_indices = @transform_7, window_bounds = array<i64: 1, 16>}, {pipeline_mode = #tpu.pipeline_mode<synchronous>, transform_indices = @transform_8, window_bounds = array<i64: 1, 16>}, {pipeline_mode = #tpu.pipeline_mode<synchronous>, transform_indices = @transform_9, window_bounds = array<i64: 16, 4>}, {pipeline_mode = #tpu.pipeline_mode<synchronous>, transform_indices = @transform_10, window_bounds = array<i64: 4, 16>}, {pipeline_mode = #tpu.pipeline_mode<synchronous>, transform_indices = @transform_11, window_bounds = array<i64: 1, 4>}, {pipeline_mode = #tpu.pipeline_mode<synchronous>, transform_indices = @transform_12, window_bounds = array<i64: 1, 4>}, {pipeline_mode = #tpu.pipeline_mode<synchronous>, transform_indices = @transform_13, window_bounds = array<i64: 16, 8>}, {pipeline_mode = #tpu.pipeline_mode<synchronous>, transform_indices = @transform_14, window_bounds = array<i64: 1, 8>}, {pipeline_mode = #tpu.pipeline_mode<synchronous>, transform_indices = @transform_15, window_bounds = array<i64: 1, 8>}, {transform_indices = @transform_16, window_bounds = array<i64: 1, 256, 8>}]} {
    %c0 = arith.constant 0 : index
    %c0_0 = arith.constant 0 : index
    %c0_1 = arith.constant 0 : index
    %0 = vector.load %arg1[%c0, %c0_0, %c0_1] : memref<1x256x8xf32, #tpu.memory_space<vmem>>, vector<1x256x8xf32>
    %1 = vector.shape_cast %0 : vector<1x256x8xf32> to vector<256x8xf32>
    %2 = arith.truncf %1 : vector<256x8xf32> to vector<256x8xbf16>
    %c0_2 = arith.constant 0 : index
    %c0_3 = arith.constant 0 : index
    %3 = vector.load %arg2[%c0_2, %c0_3] : memref<8x16xbf16, #tpu.memory_space<vmem>>, vector<8x16xbf16>
    %cst = arith.constant dense<0.000000e+00> : vector<256x16xf32>
    %4 = tpu.matmul %2, %3, %cst {dimension_numbers = #tpu.dot_dimension_numbers<[1], [0], [0], [1], [0, 0, 1, 1], [], []>} : vector<256x8xbf16>, vector<8x16xbf16>, vector<256x16xf32> -> vector<256x16xf32>
    %c0_4 = arith.constant 0 : index
    %c0_5 = arith.constant 0 : index
    %5 = vector.load %arg3[%c0_4, %c0_5] : memref<1x16xf32, #tpu.memory_space<vmem>>, vector<1x16xf32>
    %6 = vector.broadcast %5 : vector<1x16xf32> to vector<256x16xf32>
    %7 = arith.mulf %4, %6 : vector<256x16xf32>
    %c0_6 = arith.constant 0 : index
    %c0_7 = arith.constant 0 : index
    %8 = vector.load %arg4[%c0_6, %c0_7] : memref<1x16xf32, #tpu.memory_space<vmem>>, vector<1x16xf32>
    %9 = vector.broadcast %8 : vector<1x16xf32> to vector<256x16xf32>
    %10 = arith.addf %7, %9 : vector<256x16xf32>
    %cst_8 = arith.constant 0.000000e+00 : f32
    %11 = vector.broadcast %cst_8 : f32 to vector<256x16xf32>
    %12 = arith.cmpf oge, %10, %11 : vector<256x16xf32>
    %c0_9 = arith.constant 0 : index
    %c0_10 = arith.constant 0 : index
    %13 = vector.load %arg5[%c0_9, %c0_10] : memref<1x16xf32, #tpu.memory_space<vmem>>, vector<1x16xf32>
    %14 = vector.broadcast %13 : vector<1x16xf32> to vector<256x16xf32>
    %15 = arith.mulf %14, %10 : vector<256x16xf32>
    %16 = arith.select %12, %10, %15 : vector<256x16xi1>, vector<256x16xf32>
    %17 = vector.shape_cast %16 : vector<256x16xf32> to vector<16x16x16xf32>
    %cst_11 = arith.constant 0.000000e+00 : f32
    %18 = vector.broadcast %cst_11 : f32 to vector<1x16x16xf32>
    %19 = tpu.concatenate %18, %17, %18 in 0 : vector<1x16x16xf32>, vector<16x16x16xf32>, vector<1x16x16xf32> -> vector<18x16x16xf32>
    %cst_12 = arith.constant 0.000000e+00 : f32
    %20 = vector.broadcast %cst_12 : f32 to vector<18x1x16xf32>
    %21 = tpu.concatenate %20, %19, %20 in 1 : vector<18x1x16xf32>, vector<18x16x16xf32>, vector<18x1x16xf32> -> vector<18x18x16xf32>
    %22 = vector.extract_strided_slice %21 {offsets = [0, 0, 0], sizes = [18, 16, 16], strides = [1, 1, 1]} : vector<18x18x16xf32> to vector<18x16x16xf32>
    %23 = vector.extract_strided_slice %21 {offsets = [0, 1, 0], sizes = [18, 16, 16], strides = [1, 1, 1]} : vector<18x18x16xf32> to vector<18x16x16xf32>
    %24 = vector.extract_strided_slice %21 {offsets = [0, 2, 0], sizes = [18, 16, 16], strides = [1, 1, 1]} : vector<18x18x16xf32> to vector<18x16x16xf32>
    %c0_13 = arith.constant 0 : index
    %c0_14 = arith.constant 0 : index
    %c0_15 = arith.constant 0 : index
    %25 = vector.load %arg6[%c0_13, %c0_14, %c0_15] : memref<3x3x16xf32, #tpu.memory_space<vmem>>, vector<3x3x16xf32>
    %26 = vector.extract_strided_slice %22 {offsets = [0, 0, 0], sizes = [16, 16, 16], strides = [1, 1, 1]} : vector<18x16x16xf32> to vector<16x16x16xf32>
    %27 = vector.extract_strided_slice %25 {offsets = [0, 0, 0], sizes = [1, 1, 16], strides = [1, 1, 1]} : vector<3x3x16xf32> to vector<1x1x16xf32>
    %28 = vector.shape_cast %27 : vector<1x1x16xf32> to vector<16xf32>
    %29 = vector.shape_cast %28 : vector<16xf32> to vector<1x1x16xf32>
    %30 = vector.broadcast %29 : vector<1x1x16xf32> to vector<16x16x16xf32>
    %31 = arith.mulf %26, %30 : vector<16x16x16xf32>
    %32 = vector.extract_strided_slice %23 {offsets = [0, 0, 0], sizes = [16, 16, 16], strides = [1, 1, 1]} : vector<18x16x16xf32> to vector<16x16x16xf32>
    %33 = vector.extract_strided_slice %25 {offsets = [0, 1, 0], sizes = [1, 1, 16], strides = [1, 1, 1]} : vector<3x3x16xf32> to vector<1x1x16xf32>
    %34 = vector.shape_cast %33 : vector<1x1x16xf32> to vector<16xf32>
    %35 = vector.shape_cast %34 : vector<16xf32> to vector<1x1x16xf32>
    %36 = vector.broadcast %35 : vector<1x1x16xf32> to vector<16x16x16xf32>
    %37 = arith.mulf %32, %36 : vector<16x16x16xf32>
    %38 = arith.addf %31, %37 : vector<16x16x16xf32>
    %39 = vector.extract_strided_slice %24 {offsets = [0, 0, 0], sizes = [16, 16, 16], strides = [1, 1, 1]} : vector<18x16x16xf32> to vector<16x16x16xf32>
    %40 = vector.extract_strided_slice %25 {offsets = [0, 2, 0], sizes = [1, 1, 16], strides = [1, 1, 1]} : vector<3x3x16xf32> to vector<1x1x16xf32>
    %41 = vector.shape_cast %40 : vector<1x1x16xf32> to vector<16xf32>
    %42 = vector.shape_cast %41 : vector<16xf32> to vector<1x1x16xf32>
    %43 = vector.broadcast %42 : vector<1x1x16xf32> to vector<16x16x16xf32>
    %44 = arith.mulf %39, %43 : vector<16x16x16xf32>
    %45 = arith.addf %38, %44 : vector<16x16x16xf32>
    %46 = vector.extract_strided_slice %22 {offsets = [1, 0, 0], sizes = [16, 16, 16], strides = [1, 1, 1]} : vector<18x16x16xf32> to vector<16x16x16xf32>
    %47 = vector.extract_strided_slice %25 {offsets = [1, 0, 0], sizes = [1, 1, 16], strides = [1, 1, 1]} : vector<3x3x16xf32> to vector<1x1x16xf32>
    %48 = vector.shape_cast %47 : vector<1x1x16xf32> to vector<16xf32>
    %49 = vector.shape_cast %48 : vector<16xf32> to vector<1x1x16xf32>
    %50 = vector.broadcast %49 : vector<1x1x16xf32> to vector<16x16x16xf32>
    %51 = arith.mulf %46, %50 : vector<16x16x16xf32>
    %52 = arith.addf %45, %51 : vector<16x16x16xf32>
    %53 = vector.extract_strided_slice %23 {offsets = [1, 0, 0], sizes = [16, 16, 16], strides = [1, 1, 1]} : vector<18x16x16xf32> to vector<16x16x16xf32>
    %54 = vector.extract_strided_slice %25 {offsets = [1, 1, 0], sizes = [1, 1, 16], strides = [1, 1, 1]} : vector<3x3x16xf32> to vector<1x1x16xf32>
    %55 = vector.shape_cast %54 : vector<1x1x16xf32> to vector<16xf32>
    %56 = vector.shape_cast %55 : vector<16xf32> to vector<1x1x16xf32>
    %57 = vector.broadcast %56 : vector<1x1x16xf32> to vector<16x16x16xf32>
    %58 = arith.mulf %53, %57 : vector<16x16x16xf32>
    %59 = arith.addf %52, %58 : vector<16x16x16xf32>
    %60 = vector.extract_strided_slice %24 {offsets = [1, 0, 0], sizes = [16, 16, 16], strides = [1, 1, 1]} : vector<18x16x16xf32> to vector<16x16x16xf32>
    %61 = vector.extract_strided_slice %25 {offsets = [1, 2, 0], sizes = [1, 1, 16], strides = [1, 1, 1]} : vector<3x3x16xf32> to vector<1x1x16xf32>
    %62 = vector.shape_cast %61 : vector<1x1x16xf32> to vector<16xf32>
    %63 = vector.shape_cast %62 : vector<16xf32> to vector<1x1x16xf32>
    %64 = vector.broadcast %63 : vector<1x1x16xf32> to vector<16x16x16xf32>
    %65 = arith.mulf %60, %64 : vector<16x16x16xf32>
    %66 = arith.addf %59, %65 : vector<16x16x16xf32>
    %67 = vector.extract_strided_slice %22 {offsets = [2, 0, 0], sizes = [16, 16, 16], strides = [1, 1, 1]} : vector<18x16x16xf32> to vector<16x16x16xf32>
    %68 = vector.extract_strided_slice %25 {offsets = [2, 0, 0], sizes = [1, 1, 16], strides = [1, 1, 1]} : vector<3x3x16xf32> to vector<1x1x16xf32>
    %69 = vector.shape_cast %68 : vector<1x1x16xf32> to vector<16xf32>
    %70 = vector.shape_cast %69 : vector<16xf32> to vector<1x1x16xf32>
    %71 = vector.broadcast %70 : vector<1x1x16xf32> to vector<16x16x16xf32>
    %72 = arith.mulf %67, %71 : vector<16x16x16xf32>
    %73 = arith.addf %66, %72 : vector<16x16x16xf32>
    %74 = vector.extract_strided_slice %23 {offsets = [2, 0, 0], sizes = [16, 16, 16], strides = [1, 1, 1]} : vector<18x16x16xf32> to vector<16x16x16xf32>
    %75 = vector.extract_strided_slice %25 {offsets = [2, 1, 0], sizes = [1, 1, 16], strides = [1, 1, 1]} : vector<3x3x16xf32> to vector<1x1x16xf32>
    %76 = vector.shape_cast %75 : vector<1x1x16xf32> to vector<16xf32>
    %77 = vector.shape_cast %76 : vector<16xf32> to vector<1x1x16xf32>
    %78 = vector.broadcast %77 : vector<1x1x16xf32> to vector<16x16x16xf32>
    %79 = arith.mulf %74, %78 : vector<16x16x16xf32>
    %80 = arith.addf %73, %79 : vector<16x16x16xf32>
    %81 = vector.extract_strided_slice %24 {offsets = [2, 0, 0], sizes = [16, 16, 16], strides = [1, 1, 1]} : vector<18x16x16xf32> to vector<16x16x16xf32>
    %82 = vector.extract_strided_slice %25 {offsets = [2, 2, 0], sizes = [1, 1, 16], strides = [1, 1, 1]} : vector<3x3x16xf32> to vector<1x1x16xf32>
    %83 = vector.shape_cast %82 : vector<1x1x16xf32> to vector<16xf32>
    %84 = vector.shape_cast %83 : vector<16xf32> to vector<1x1x16xf32>
    %85 = vector.broadcast %84 : vector<1x1x16xf32> to vector<16x16x16xf32>
    %86 = arith.mulf %81, %85 : vector<16x16x16xf32>
    %87 = arith.addf %80, %86 : vector<16x16x16xf32>
    %c0_16 = arith.constant 0 : index
    %c0_17 = arith.constant 0 : index
    %88 = vector.load %arg7[%c0_16, %c0_17] : memref<1x16xf32, #tpu.memory_space<vmem>>, vector<1x16xf32>
    %89 = vector.shape_cast %88 : vector<1x16xf32> to vector<1x1x16xf32>
    %90 = vector.broadcast %89 : vector<1x1x16xf32> to vector<16x16x16xf32>
    %91 = arith.mulf %87, %90 : vector<16x16x16xf32>
    %c0_18 = arith.constant 0 : index
    %c0_19 = arith.constant 0 : index
    %92 = vector.load %arg8[%c0_18, %c0_19] : memref<1x16xf32, #tpu.memory_space<vmem>>, vector<1x16xf32>
    %93 = vector.shape_cast %92 : vector<1x16xf32> to vector<1x1x16xf32>
    %94 = vector.broadcast %93 : vector<1x1x16xf32> to vector<16x16x16xf32>
    %95 = arith.addf %91, %94 : vector<16x16x16xf32>
    %cst_20 = arith.constant 0.000000e+00 : f32
    %96 = vector.broadcast %cst_20 : f32 to vector<16x16x16xf32>
    %97 = arith.cmpf oge, %95, %96 : vector<16x16x16xf32>
    %c0_21 = arith.constant 0 : index
    %c0_22 = arith.constant 0 : index
    %98 = vector.load %arg9[%c0_21, %c0_22] : memref<1x16xf32, #tpu.memory_space<vmem>>, vector<1x16xf32>
    %99 = vector.shape_cast %98 : vector<1x16xf32> to vector<1x1x16xf32>
    %100 = vector.broadcast %99 : vector<1x1x16xf32> to vector<16x16x16xf32>
    %101 = arith.mulf %100, %95 : vector<16x16x16xf32>
    %102 = arith.select %97, %95, %101 : vector<16x16x16xi1>, vector<16x16x16xf32>
    %103 = vector.shape_cast %102 : vector<16x16x16xf32> to vector<256x16xf32>
    %cst_23 = arith.constant 1.000000e+00 : bf16
    %104 = vector.broadcast %cst_23 : bf16 to vector<1x256xbf16>
    %105 = arith.truncf %103 : vector<256x16xf32> to vector<256x16xbf16>
    %cst_24 = arith.constant dense<0.000000e+00> : vector<1x16xf32>
    %106 = tpu.matmul %104, %105, %cst_24 {dimension_numbers = #tpu.dot_dimension_numbers<[1], [0], [0], [1], [0, 0, 1, 1], [], []>} : vector<1x256xbf16>, vector<256x16xbf16>, vector<1x16xf32> -> vector<1x16xf32>
    %cst_25 = arith.constant 3.906250e-03 : f32
    %107 = vector.broadcast %cst_25 : f32 to vector<1x16xf32>
    %108 = arith.mulf %106, %107 : vector<1x16xf32>
    %109 = vector.broadcast %108 : vector<1x16xf32> to vector<256x16xf32>
    %110 = arith.mulf %103, %109 : vector<256x16xf32>
    %111 = arith.truncf %110 : vector<256x16xf32> to vector<256x16xbf16>
    %c0_26 = arith.constant 0 : index
    %c0_27 = arith.constant 0 : index
    %112 = vector.load %arg10[%c0_26, %c0_27] : memref<16x4xbf16, #tpu.memory_space<vmem>>, vector<16x4xbf16>
    %cst_28 = arith.constant dense<0.000000e+00> : vector<256x4xf32>
    %113 = tpu.matmul %111, %112, %cst_28 {dimension_numbers = #tpu.dot_dimension_numbers<[1], [0], [0], [1], [0, 0, 1, 1], [], []>} : vector<256x16xbf16>, vector<16x4xbf16>, vector<256x4xf32> -> vector<256x4xf32>
    %114 = arith.truncf %113 : vector<256x4xf32> to vector<256x4xbf16>
    %cst_29 = arith.constant dense<0.000000e+00> : vector<1x4xf32>
    %115 = tpu.matmul %104, %114, %cst_29 {dimension_numbers = #tpu.dot_dimension_numbers<[1], [0], [0], [1], [0, 0, 1, 1], [], []>} : vector<1x256xbf16>, vector<256x4xbf16>, vector<1x4xf32> -> vector<1x4xf32>
    %cst_30 = arith.constant 3.906250e-03 : f32
    %116 = vector.broadcast %cst_30 : f32 to vector<1x4xf32>
    %117 = arith.mulf %115, %116 : vector<1x4xf32>
    %118 = vector.broadcast %117 : vector<1x4xf32> to vector<256x4xf32>
    %119 = arith.subf %113, %118 : vector<256x4xf32>
    %120 = arith.mulf %119, %119 : vector<256x4xf32>
    %121 = arith.truncf %120 : vector<256x4xf32> to vector<256x4xbf16>
    %cst_31 = arith.constant dense<0.000000e+00> : vector<1x4xf32>
    %122 = tpu.matmul %104, %121, %cst_31 {dimension_numbers = #tpu.dot_dimension_numbers<[1], [0], [0], [1], [0, 0, 1, 1], [], []>} : vector<1x256xbf16>, vector<256x4xbf16>, vector<1x4xf32> -> vector<1x4xf32>
    %cst_32 = arith.constant 0.00392156886 : f32
    %123 = vector.broadcast %cst_32 : f32 to vector<1x4xf32>
    %124 = arith.mulf %122, %123 : vector<1x4xf32>
    %125 = math.sqrt %124 : vector<1x4xf32>
    %cst_33 = arith.constant 9.99999974E-6 : f32
    %126 = vector.broadcast %cst_33 : f32 to vector<1x4xf32>
    %127 = arith.addf %125, %126 : vector<1x4xf32>
    %128 = tpu.reciprocal %127 {approx = true} : vector<1x4xf32> -> vector<1x4xf32>
    %129 = vector.broadcast %128 : vector<1x4xf32> to vector<256x4xf32>
    %130 = arith.mulf %119, %129 : vector<256x4xf32>
    %c0_34 = arith.constant 0 : index
    %c0_35 = arith.constant 0 : index
    %131 = vector.load %arg12[%c0_34, %c0_35] : memref<1x4xf32, #tpu.memory_space<vmem>>, vector<1x4xf32>
    %132 = vector.broadcast %131 : vector<1x4xf32> to vector<256x4xf32>
    %133 = arith.mulf %130, %132 : vector<256x4xf32>
    %c0_36 = arith.constant 0 : index
    %c0_37 = arith.constant 0 : index
    %134 = vector.load %arg13[%c0_36, %c0_37] : memref<1x4xf32, #tpu.memory_space<vmem>>, vector<1x4xf32>
    %135 = vector.broadcast %134 : vector<1x4xf32> to vector<256x4xf32>
    %136 = arith.addf %133, %135 : vector<256x4xf32>
    %137 = arith.negf %136 : vector<256x4xf32>
    %138 = math.exp %137 : vector<256x4xf32>
    %cst_38 = arith.constant 1.000000e+00 : f32
    %139 = vector.broadcast %cst_38 : f32 to vector<256x4xf32>
    %140 = arith.addf %139, %138 : vector<256x4xf32>
    %141 = arith.divf %139, %140 : vector<256x4xf32>
    %142 = arith.truncf %141 : vector<256x4xf32> to vector<256x4xbf16>
    %c0_39 = arith.constant 0 : index
    %c0_40 = arith.constant 0 : index
    %143 = vector.load %arg11[%c0_39, %c0_40] : memref<4x16xbf16, #tpu.memory_space<vmem>>, vector<4x16xbf16>
    %cst_41 = arith.constant dense<0.000000e+00> : vector<256x16xf32>
    %144 = tpu.matmul %142, %143, %cst_41 {dimension_numbers = #tpu.dot_dimension_numbers<[1], [0], [0], [1], [0, 0, 1, 1], [], []>} : vector<256x4xbf16>, vector<4x16xbf16>, vector<256x16xf32> -> vector<256x16xf32>
    %145 = arith.mulf %103, %144 : vector<256x16xf32>
    %146 = arith.truncf %145 : vector<256x16xf32> to vector<256x16xbf16>
    %c0_42 = arith.constant 0 : index
    %c0_43 = arith.constant 0 : index
    %147 = vector.load %arg14[%c0_42, %c0_43] : memref<16x8xbf16, #tpu.memory_space<vmem>>, vector<16x8xbf16>
    %cst_44 = arith.constant dense<0.000000e+00> : vector<256x8xf32>
    %148 = tpu.matmul %146, %147, %cst_44 {dimension_numbers = #tpu.dot_dimension_numbers<[1], [0], [0], [1], [0, 0, 1, 1], [], []>} : vector<256x16xbf16>, vector<16x8xbf16>, vector<256x8xf32> -> vector<256x8xf32>
    %c0_45 = arith.constant 0 : index
    %c0_46 = arith.constant 0 : index
    %149 = vector.load %arg15[%c0_45, %c0_46] : memref<1x8xf32, #tpu.memory_space<vmem>>, vector<1x8xf32>
    %150 = vector.broadcast %149 : vector<1x8xf32> to vector<256x8xf32>
    %151 = arith.mulf %148, %150 : vector<256x8xf32>
    %c0_47 = arith.constant 0 : index
    %c0_48 = arith.constant 0 : index
    %152 = vector.load %arg16[%c0_47, %c0_48] : memref<1x8xf32, #tpu.memory_space<vmem>>, vector<1x8xf32>
    %153 = vector.broadcast %152 : vector<1x8xf32> to vector<256x8xf32>
    %154 = arith.addf %151, %153 : vector<256x8xf32>
    %155 = arith.addf %154, %1 : vector<256x8xf32>
    %c0_49 = arith.constant 0 : index
    %c0_50 = arith.constant 0 : index
    %c0_51 = arith.constant 0 : index
    %156 = vector.load %arg17[%c0_49, %c0_50, %c0_51] : memref<1x256x8xf32, #tpu.memory_space<vmem>>, vector<1x256x8xf32>
    %157 = vector.shape_cast %156 : vector<1x256x8xf32> to vector<256x8xf32>
    %158 = vector.shape_cast %155 : vector<256x8xf32> to vector<1x256x8xf32>
    tpu.vector_store %arg17[%c0_49, %c0_50, %c0_51], %158 {strides = array<i32>} : memref<1x256x8xf32, #tpu.memory_space<vmem>>, vector<1x256x8xf32>,
    return
  }
  func.func @transform_0(%arg0: i32) -> (i32, i32, i32) {
    %c0_i32 = arith.constant 0 : i32
    %c0_i32_0 = arith.constant 0 : i32
    %c0_i32_1 = arith.constant 0 : i32
    return %arg0, %c0_i32, %c0_i32_0 : i32, i32, i32
  }
  func.func @transform_1(%arg0: i32) -> (i32, i32) {
    %c0_i32 = arith.constant 0 : i32
    %c0_i32_0 = arith.constant 0 : i32
    %c0_i32_1 = arith.constant 0 : i32
    return %c0_i32, %c0_i32_0 : i32, i32
  }
  func.func @transform_2(%arg0: i32) -> (i32, i32) {
    %c0_i32 = arith.constant 0 : i32
    %c0_i32_0 = arith.constant 0 : i32
    %c0_i32_1 = arith.constant 0 : i32
    return %c0_i32, %c0_i32_0 : i32, i32
  }
  func.func @transform_3(%arg0: i32) -> (i32, i32) {
    %c0_i32 = arith.constant 0 : i32
    %c0_i32_0 = arith.constant 0 : i32
    %c0_i32_1 = arith.constant 0 : i32
    return %c0_i32, %c0_i32_0 : i32, i32
  }
  func.func @transform_4(%arg0: i32) -> (i32, i32) {
    %c0_i32 = arith.constant 0 : i32
    %c0_i32_0 = arith.constant 0 : i32
    %c0_i32_1 = arith.constant 0 : i32
    return %c0_i32, %c0_i32_0 : i32, i32
  }
  func.func @transform_5(%arg0: i32) -> (i32, i32, i32) {
    %c0_i32 = arith.constant 0 : i32
    %c0_i32_0 = arith.constant 0 : i32
    %c0_i32_1 = arith.constant 0 : i32
    %c0_i32_2 = arith.constant 0 : i32
    return %c0_i32, %c0_i32_0, %c0_i32_1 : i32, i32, i32
  }
  func.func @transform_6(%arg0: i32) -> (i32, i32) {
    %c0_i32 = arith.constant 0 : i32
    %c0_i32_0 = arith.constant 0 : i32
    %c0_i32_1 = arith.constant 0 : i32
    return %c0_i32, %c0_i32_0 : i32, i32
  }
  func.func @transform_7(%arg0: i32) -> (i32, i32) {
    %c0_i32 = arith.constant 0 : i32
    %c0_i32_0 = arith.constant 0 : i32
    %c0_i32_1 = arith.constant 0 : i32
    return %c0_i32, %c0_i32_0 : i32, i32
  }
  func.func @transform_8(%arg0: i32) -> (i32, i32) {
    %c0_i32 = arith.constant 0 : i32
    %c0_i32_0 = arith.constant 0 : i32
    %c0_i32_1 = arith.constant 0 : i32
    return %c0_i32, %c0_i32_0 : i32, i32
  }
  func.func @transform_9(%arg0: i32) -> (i32, i32) {
    %c0_i32 = arith.constant 0 : i32
    %c0_i32_0 = arith.constant 0 : i32
    %c0_i32_1 = arith.constant 0 : i32
    return %c0_i32, %c0_i32_0 : i32, i32
  }
  func.func @transform_10(%arg0: i32) -> (i32, i32) {
    %c0_i32 = arith.constant 0 : i32
    %c0_i32_0 = arith.constant 0 : i32
    %c0_i32_1 = arith.constant 0 : i32
    return %c0_i32, %c0_i32_0 : i32, i32
  }
  func.func @transform_11(%arg0: i32) -> (i32, i32) {
    %c0_i32 = arith.constant 0 : i32
    %c0_i32_0 = arith.constant 0 : i32
    %c0_i32_1 = arith.constant 0 : i32
    return %c0_i32, %c0_i32_0 : i32, i32
  }
  func.func @transform_12(%arg0: i32) -> (i32, i32) {
    %c0_i32 = arith.constant 0 : i32
    %c0_i32_0 = arith.constant 0 : i32
    %c0_i32_1 = arith.constant 0 : i32
    return %c0_i32, %c0_i32_0 : i32, i32
  }
  func.func @transform_13(%arg0: i32) -> (i32, i32) {
    %c0_i32 = arith.constant 0 : i32
    %c0_i32_0 = arith.constant 0 : i32
    %c0_i32_1 = arith.constant 0 : i32
    return %c0_i32, %c0_i32_0 : i32, i32
  }
  func.func @transform_14(%arg0: i32) -> (i32, i32) {
    %c0_i32 = arith.constant 0 : i32
    %c0_i32_0 = arith.constant 0 : i32
    %c0_i32_1 = arith.constant 0 : i32
    return %c0_i32, %c0_i32_0 : i32, i32
  }
  func.func @transform_15(%arg0: i32) -> (i32, i32) {
    %c0_i32 = arith.constant 0 : i32
    %c0_i32_0 = arith.constant 0 : i32
    %c0_i32_1 = arith.constant 0 : i32
    return %c0_i32, %c0_i32_0 : i32, i32
  }
  func.func @transform_16(%arg0: i32) -> (i32, i32, i32) {
    %c0_i32 = arith.constant 0 : i32
    %c0_i32_0 = arith.constant 0 : i32
    %c0_i32_1 = arith.constant 0 : i32
    return %arg0, %c0_i32, %c0_i32_0 : i32, i32, i32
  }
}

</mosaic_0001>

<bundles_post_ra>
// kernel: bottleneck_forward.1
= control target key start
LH: loop header
LB: loop body
LE: loop exit
PB: predicated region body
PF: predicated region fallthrough
CT: control target
= control target key end

     0   :  { %s4909_s21 = smov 0   ;;  %s8620_s0 = inlined_call_operand.vmem [shape: f32[2,256,8], index: 0, kind: input, shape index: {}]   ;;  %s8621_s1 = inlined_call_operand.vmem [shape: bf16[8,16], index: 1, kind: input, shape index: {}]   ;;  %s8622_s2 = inlined_call_operand.vmem [shape: f32[1,16], index: 2, kind: input, shape index: {}]   ;;  %s8623_s3 = inlined_call_operand.vmem [shape: f32[1,16], index: 3, kind: input, shape index: {}]   ;;  %s8624_s4 = inlined_call_operand.vmem [shape: f32[1,16], index: 4, kind: input, shape index: {}]   ;;  %s8625_s5 = inlined_call_operand.vmem [shape: f32[3,3,16], index: 5, kind: input, shape index: {}]   ;;  %s8626_s6 = inlined_call_operand.vmem [shape: f32[1,16], index: 6, kind: input, shape index: {}]   ;;  %s8627_s7 = inlined_call_operand.vmem [shape: f32[1,16], index: 7, kind: input, shape index: {}]   ;;  %s8628_s8 = inlined_call_operand.vmem [shape: f32[1,16], index: 8, kind: input, shape index: {}]   ;;  %s8629_s9 = inlined_call_operand.vmem [shape: bf16[16,4], index: 9, kind: input, shape index: {}]   ;;  %s8630_s10 = inlined_call_operand.vmem [shape: bf16[4,16], index: 10, kind: input, shape index: {}]   ;;  %s8631_s11 = inlined_call_operand.vmem [shape: f32[1,4], index: 11, kind: input, shape index: {}]   ;;  %s8632_s12 = inlined_call_operand.vmem [shape: f32[1,4], index: 12, kind: input, shape index: {}]   ;;  %s8633_s13 = inlined_call_operand.vmem [shape: bf16[16,8], index: 13, kind: input, shape index: {}]   ;;  %s8634_s14 = inlined_call_operand.vmem [shape: f32[1,8], index: 14, kind: input, shape index: {}]   ;;  %s8635_s15 = inlined_call_operand.vmem [shape: f32[1,8], index: 15, kind: input, shape index: {}]   ;;  %s8636_s16 = inlined_call_operand.vmem [shape: f32[2,256,8], index: 16, kind: output, shape index: {}]  }
   0x1   :  { %8814 = sst [smem:[#allocation98_spill]] %s8620_s0 }
   0x2 LB: > { %s4500_s22 = sadd.s32 4294967295, %s4820_s21   ;;  %p4504_p0 = scmp.ge.s32.totalorder %s4820_s21, 1  ;;  %s4820_s21 = sphi %s4909_s21, %s26_s21  }
   0x3   : > { %p462_p1 = scmp.lt.s32.totalorder %s4820_s21, 3 }
   0x5   : > { %p463_p2 = pnand %p4504_p0, %p462_p1 }
   0x7   : > { %466 = sbr.rel (%p463_p2) target bundleno = 2054 (0x806), region = 84 }
   0xc   : > { %v572_v0 = vld [vmem:[%s8621_s1] sm:$0xf]  ;;  %vm622_vm0 = vcmask 1043456   ;;  %p512_p3 = scmp.lt.s32.totalorder %s4500_s22, 1  ;;  %s8815_s28 = sld [smem:[#allocation98_spill]]  ;;  %vm8811_vm1 = vcmask 64512  }
   0xd   : > { %v624_v1 = vsel %vm622_vm0, %v572_v0, 0  ;;  %v4959_v28 = vld [vmem:[%s8622_s2] ss:$0 sm:$0xff]  ;;  %vm920_vm3 = vcmask 1040384   ;;  %v4991_v48 = vld [vmem:[%s8625_s5 + $0x4] sm:$0x7] }
   0xe   : > { %633 = vmatpush.bf16.msra.mxu0 %v624_v1  ;;  %s9308_s22 = smov (!%p512_p3, %s4500_s22), 1  ;;  %v4964_v29 = vld [vmem:[%s8623_s3] ss:$0 sm:$0xff]  ;;  %v5001_v56 = vperm.slane %v4991_v48, 1  ;;  %vm1188_vm5 = vcmask 1046528   ;;  %vm1430_vm6 = vcmask 1045504  }
   0xf   : > { %s4615_s25 = sshll.u32 %s9308_s22, 8  ;;  %v4970_v33 = vld [vmem:[%s8624_s4] ss:$0 sm:$0xff] }
  0x10   : > { %v1055_v40 = vld [vmem:[%s8625_s5] sm:$0x7]  ;;  %s8433_s26 = scalar_lea.vmem %s8636_s16, %s4615_s25 }
  0x11   : > { %v4986_v46 = vperm.slane %v1055_v40, 1  ;;  %v4995_v53 = vperm.slane %v1055_v40, 2  ;;  %v4998_v55 = vperm.slane %v1055_v40, 0 }
  0x12   : > { %s4928_s29 = scalar_lea.vmem %s8815_s28, %s4615_s25 }
  0x13   : > { %v524_v2 = vld [vmem:[%s4928_s29] sm:$0xff]  ;;  %v525_v3 = vld [vmem:[%s4928_s29 + $0x8] sm:$0xff]  ;;  %v526_v5 = vld [vmem:[%s4928_s29 + $0x10] sm:$0xff] }
  0x14   : > { %v556_v4 = vpack.c.bf16 %v525_v3, %v524_v2  ;;  %v527_v6 = vld [vmem:[%s4928_s29 + $0x18] sm:$0xff]  ;;  %v528_v8 = vld [vmem:[%s4928_s29 + $0x20] sm:$0xff]  ;;  %v529_v9 = vld [vmem:[%s4928_s29 + $0x28] sm:$0xff] }
  0x15   : > { %v557_v7 = vpack.c.bf16 %v527_v6, %v526_v5  ;;  %v558_v10 = vpack.c.bf16 %v529_v9, %v528_v8  ;;  %v530_v11 = vld [vmem:[%s4928_s29 + $0x30] sm:$0xff]  ;;  %v531_v12 = vld [vmem:[%s4928_s29 + $0x38] sm:$0xff]  ;;  %v532_v14 = vld [vmem:[%s4928_s29 + $0x40] sm:$0xff] }
  0x16   : > { %4509 = vmatmul.msk.bf16.vlgmr.msra.gmra.mxu0 %vm8811_vm1, %v556_v4  ;;  %v559_v13 = vpack.c.bf16 %v531_v12, %v530_v11  ;;  %v533_v15 = vld [vmem:[%s4928_s29 + $0x48] sm:$0xff]  ;;  %v534_v17 = vld [vmem:[%s4928_s29 + $0x50] sm:$0xff]  ;;  %v535_v18 = vld [vmem:[%s4928_s29 + $0x58] sm:$0xff] }
  0x17   : > { %v560_v16 = vpack.c.bf16 %v533_v15, %v532_v14  ;;  %v561_v19 = vpack.c.bf16 %v535_v18, %v534_v17  ;;  %v536_v20 = vld [vmem:[%s4928_s29 + $0x60] sm:$0xff]  ;;  %v537_v21 = vld [vmem:[%s4928_s29 + $0x68] sm:$0xff]  ;;  %v538_v23 = vld [vmem:[%s4928_s29 + $0x70] sm:$0xff] }
  0x18   : > { %v562_v22 = vpack.c.bf16 %v537_v21, %v536_v20  ;;  %v539_v24 = vld [vmem:[%s4928_s29 + $0x78] sm:$0xff]  ;;  %v540_v26 = vld [vmem:[%s4928_s29 + $0x80] sm:$0xff]  ;;  %v541_v27 = vld [vmem:[%s4928_s29 + $0x88] sm:$0xff] }
  0x19   : > { %v563_v25 = vpack.c.bf16 %v539_v24, %v538_v23  ;;  %v564_v30 = vpack.c.bf16 %v541_v27, %v540_v26  ;;  %v542_v42 = vld [vmem:[%s4928_s29 + $0x90] sm:$0xff]  ;;  %v543_v43 = vld [vmem:[%s4928_s29 + $0x98] sm:$0xff]  ;;  %v544_v20 = vld [vmem:[%s4928_s29 + $0xa0] sm:$0xff] }
  0x1a   : > { %v565_v47 = vpack.c.bf16 %v543_v43, %v542_v42  ;;  %v545_v21 = vld [vmem:[%s4928_s29 + $0xa8] sm:$0xff] }
  0x1b   : > { %v566_v24 = vpack.c.bf16 %v545_v21, %v544_v20 }
  0x26   : > { %4510 = vmatmul.msk.bf16.gmra.mxu0 %vm8811_vm1, %v557_v7 }
  0x36   : > { %4511 = vmatmul.msk.bf16.gmra.mxu0 %vm8811_vm1, %v558_v10 }
  0x46   : > { %4512 = vmatmul.msk.bf16.gmra.mxu0 %vm8811_vm1, %v559_v13 }
  0x56   : > { %4513 = vmatmul.msk.bf16.gmra.mxu0 %vm8811_vm1, %v560_v16 }
  0x66   : > { %4514 = vmatmul.msk.bf16.gmra.mxu0 %vm8811_vm1, %v561_v19 }
  0x76   : > { %4515 = vmatmul.msk.bf16.gmra.mxu0 %vm8811_vm1, %v562_v22 }
  0x86   : > { %4516 = vmatmul.msk.bf16.gmra.mxu0 %vm8811_vm1, %v563_v25 }
  0x93   : > { %v635_v31 = vpop.f32.mrf.mxu0 }
  0x94   : > { %v719_v32 = vmul.f32 %v4959_v28, %v635_v31 }
  0x96   : > { %v755_v34 = vadd.f32 %v4964_v29, %v719_v32  ;;  %4517 = vmatmul.msk.bf16.gmra.mxu0 %vm8811_vm1, %v564_v30 }
  0x98   : > { %vm787_vm2 = vcmp.ge.f32.partialorder %v755_v34, 0.0  ;;  %v823_v35 = vmul.f32 %v4970_v33, %v755_v34 }
  0x9a   : > { %v855_v36 = vsel %vm787_vm2, %v755_v34, %v823_v35 }
  0x9b   : > { %v637_v37 = vpop.f32.mrf.mxu0  ;;  %v923_v39 = vrot.slane %v855_v36, 7 }
  0x9c   : > { %v720_v38 = vmul.f32 %v4959_v28, %v637_v37 }
  0x9d   : > { %v4983_v44 = vsel %vm920_vm3, 0.0, %v923_v39 }
  0x9e   : > { %v756_v41 = vadd.f32 %v4964_v29, %v720_v38  ;;  %v1095_v51 = vmul.f32 %v4986_v46, %v4983_v44 }
  0xa0   : > { %vm788_vm4 = vcmp.ge.f32.partialorder %v756_v41, 0.0  ;;  %v824_v45 = vmul.f32 %v4970_v33, %v756_v41  ;;  %v1194_v62 = vrot.slane %v1095_v51, 1 }
  0xa2   : > { %v856_v49 = vsel %vm788_vm4, %v756_v41, %v824_v45 }
  0xa3   : > { %v640_v50 = vpop.f32.mrf.mxu0  ;;  %v924_v52 = vrot.slane %v856_v49, 7 }
  0xa4   : > { %v721_v54 = vmul.f32 %v4959_v28, %v640_v50 }
  0xa5   : > { %v5004_v57 = vsel %vm920_vm3, %v923_v39, %v924_v52  ;;  %v5007_v58 = vsel %vm920_vm3, %v924_v52, 0.0 }
  0xa6   : > { %4518 = vmatmul.msk.bf16.gmra.mxu0 %vm8811_vm1, %v565_v47  ;;  %v1096_v59 = vmul.f32 %v4986_v46, %v5004_v57  ;;  %v1097_v60 = vmul.f32 %v4986_v46, %v5007_v58  ;;  %v5016_v61 = vmul.f32 %v4995_v53, %v5004_v57  ;;  %v1339_v63 = vmul.f32 %v4995_v53, %v5007_v58 }
  0xa7   : > { %v5022_v0 = vmul.f32 %v5001_v56, %v5004_v57  ;;  %v1643_v1 = vmul.f32 %v5001_v56, %v5007_v58  ;;  %v757_v5 = vadd.f32 %v4964_v29, %v721_v54  ;;  %v1062_v6 = vmul.f32 %v4998_v55, %v5004_v57 }
  0xa8   : > { %8816 = vst [vmem:[#allocation2_spill] sm:$0xff] %v5016_v61  ;;  %v1195_v2 = vrot.slane %v1096_v59, 1  ;;  %v1197_v3 = vrot.slane %v1097_v60, 1  ;;  %v8639_v4 = vrot.slane %v5016_v61, 2  ;;  %v1439_v7 = vrot.slane %v1339_v63, 2  ;;  %v546_v60 = vld [vmem:[%s4928_s29 + $0xb0] sm:$0xff] }
  0xa9   : > { %8817 = vst [vmem:[#allocation3_spill] sm:$0xff] %v5022_v0  ;;  %v8638_v8 = vrot.slane %v5022_v0, 1  ;;  %v1740_v9 = vrot.slane %v1643_v1, 1  ;;  %v825_v16 = vmul.f32 %v4970_v33, %v757_v5  ;;  %vm789_vm7 = vcmp.ge.f32.partialorder %v757_v5, 0.0 }
  0xaa   : > { %v5032_v10 = vsel %vm1188_vm5, %v1194_v62, %v1195_v2  ;;  %v1198_v11 = vsel %vm1188_vm5, %v1195_v2, %v1197_v3  ;;  %v1440_v14 = vsel %vm1430_vm6, %v8639_v4, %v1439_v7  ;;  %v547_v62 = vld [vmem:[%s4928_s29 + $0xb8] sm:$0xff]  ;;  %v5219_v4 = vperm.slane %v4991_v48, 2 }
  0xab   : > { %8818 = vst [vmem:[#allocation4_spill] sm:$0xff] %v5032_v10  ;;  %v642_v12 = vpop.f32.mrf.mxu0  ;;  %v1304_v13 = vadd.f32 %v1198_v11, %v1062_v6  ;;  %v5041_v15 = vsel %vm1188_vm5, %v8638_v8, %v1740_v9  ;;  %v5050_v22 = vsel %vm789_vm7, %v757_v5, %v825_v16  ;;  %v567_v3 = vpack.c.bf16 %v547_v62, %v546_v60 }
  0xac   : > { %8819 = vst [vmem:[#allocation5_spill] sm:$0xff] %v5041_v15  ;;  %v722_v17 = vmul.f32 %v4959_v28, %v642_v12  ;;  %v926_v27 = vrot.slane %v5050_v22, 7 }
  0xad   : > { %v5045_v18 = vadd.f32 %v1440_v14, %v1304_v13 }
  0xae   : > { %v758_v19 = vadd.f32 %v4964_v29, %v722_v17  ;;  %v4822_v17 = vmov 0.0  }
  0xaf   : > { %8820 = vst [vmem:[#allocation6_spill] sm:$0xff] %v5045_v18 }
  0xb0   : > { %vm790_vm8 = vcmp.ge.f32.partialorder %v758_v19, 0.0  ;;  %v826_v23 = vmul.f32 %v4970_v33, %v758_v19 }
  0xb2   : > { %v858_v25 = vsel %vm790_vm8, %v758_v19, %v826_v23  ;;  %v5120_v19 = vrot.slane %v4822_v17, 7 }
  0xb3   : > { %v645_v26 = vpop.f32.mrf.mxu0  ;;  %v927_v30 = vrot.slane %v858_v25, 7 }
  0xb4   : > { %v723_v31 = vmul.f32 %v4959_v28, %v645_v26  ;;  %8831 = vst [vmem:[#allocation17_spill] sm:$0xff] %v5120_v19 }
  0xb5   : > { %v5058_v32 = vsel %vm920_vm3, %v926_v27, %v927_v30  ;;  %v5061_v34 = vsel %vm920_vm3, %v927_v30, 0.0 }
  0xb6   : > { %8821 = vst [vmem:[#allocation7_spill] sm:$0xff] %v5058_v32  ;;  %4519 = vmatmul.msk.bf16.gmra.mxu0 %vm8811_vm1, %v566_v24  ;;  %v5066_v35 = vmul.f32 %v4986_v46, %v5058_v32  ;;  %v1100_v36 = vmul.f32 %v4986_v46, %v5061_v34  ;;  %v5072_v37 = vmul.f32 %v4995_v53, %v5058_v32 }
  0xb7   : > { %8822 = vst [vmem:[#allocation8_spill] sm:$0xff] %v5061_v34  ;;  %v1342_v38 = vmul.f32 %v4995_v53, %v5061_v34  ;;  %v759_v39 = vadd.f32 %v4964_v29, %v723_v31  ;;  %v1064_v43 = vmul.f32 %v4998_v55, %v5058_v32 }
  0xb8   : > { %8823 = vst [vmem:[#allocation9_spill] sm:$0xff] %v5066_v35  ;;  %v8642_v40 = vrot.slane %v5066_v35, 1  ;;  %v1202_v41 = vrot.slane %v1100_v36, 1  ;;  %v8641_v42 = vrot.slane %v5072_v37, 2  ;;  %v5134_v36 = vsel %vm920_vm3, 0.0, %v5120_v19 }
  0xb9   : > { %8824 = vst [vmem:[#allocation10_spill] sm:$0xff] %v5072_v37  ;;  %v1444_v45 = vrot.slane %v1342_v38, 2  ;;  %v827_v52 = vmul.f32 %v4970_v33, %v759_v39  ;;  %vm791_vm9 = vcmp.ge.f32.partialorder %v759_v39, 0.0 }
  0xba   : > { %v1203_v47 = vsel %vm1188_vm5, %v8642_v40, %v1202_v41  ;;  %8832 = vst [vmem:[#allocation18_spill] sm:$0xff] %v5134_v36 }
  0xbb   : > { %v647_v49 = vpop.f32.mrf.mxu0  ;;  %v5084_v50 = vadd.f32 %v1203_v47, %v1064_v43  ;;  %v5089_v51 = vsel %vm1430_vm6, %v8641_v42, %v1444_v45  ;;  %v5096_v63 = vsel %vm791_vm9, %v759_v39, %v827_v52  ;;  %v1092_v47 = vmul.f32 %v4986_v46, %v5134_v36  ;;  %v551_v42 = vld [vmem:[%s4928_s29 + $0xd8] sm:$0xff] }
  0xbc   : > { %8826 = vst [vmem:[#allocation12_spill] sm:$0xff] %v5089_v51  ;;  %v724_v54 = vmul.f32 %v4959_v28, %v647_v49  ;;  %v8648_v5 = vrot.slane %v5096_v63, 7  ;;  %v5149_v49 = vmul.f32 %v4986_v46, %v5120_v19 }
  0xbd   : > { %8825 = vst [vmem:[#allocation11_spill] sm:$0xff] %v5084_v50 }
  0xbe   : > { %v760_v59 = vadd.f32 %v4964_v29, %v724_v54  ;;  %8835 = vst [vmem:[#allocation21_spill] sm:$0xff] %v5149_v49  ;;  %v548_v54 = vld [vmem:[%s4928_s29 + $0xc0] sm:$0xff] }
  0xc0   : > { %vm792_vm10 = vcmp.ge.f32.partialorder %v760_v59, 0.0  ;;  %v828_v1 = vmul.f32 %v4970_v33, %v760_v59 }
  0xc2   : > { %v860_v2 = vsel %vm792_vm10, %v760_v59, %v828_v1  ;;  %v549_v59 = vld [vmem:[%s4928_s29 + $0xc8] sm:$0xff]  ;;  %v1189_v1 = vrot.slane %v1092_v47, 1 }
  0xc3   : > { %v930_v6 = vrot.slane %v860_v2, 7  ;;  %v650_v7 = vpop.f32.mrf.mxu0  ;;  %v8637_v2 = vrot.slane %v5149_v49, 1 }
  0xc4   : > { %v725_v9 = vmul.f32 %v4959_v28, %v650_v7  ;;  %v1334_v7 = vmul.f32 %v4995_v53, %v5134_v36 }
  0xc5   : > { %v5104_v11 = vsel %vm920_vm3, %v8648_v5, %v930_v6  ;;  %v5107_v12 = vsel %vm920_vm3, %v930_v6, 0.0  ;;  %v568_v6 = vpack.c.bf16 %v549_v59, %v548_v54 }
  0xc6   : > { %8827 = vst [vmem:[#allocation13_spill] sm:$0xff] %v5104_v11  ;;  %v5111_v13 = vmul.f32 %v4986_v46, %v5104_v11  ;;  %v1103_v14 = vmul.f32 %v4986_v46, %v5107_v12  ;;  %v5117_v16 = vmul.f32 %v4995_v53, %v5104_v11  ;;  %4520 = vmatmul.msk.bf16.gmra.mxu0 %vm8811_vm1, %v567_v3 }
  0xc7   : > { %8828 = vst [vmem:[#allocation14_spill] sm:$0xff] %v5107_v12  ;;  %v1345_v20 = vmul.f32 %v4995_v53, %v5107_v12  ;;  %v761_v25 = vadd.f32 %v4964_v29, %v725_v9  ;;  %v1066_v26 = vmul.f32 %v4998_v55, %v5104_v11  ;;  %v5162_v9 = vmul.f32 %v4995_v53, %v5120_v19  ;;  %v5406_v11 = vld [vmem:[%s4928_s29 + $0xf0] sm:$0xff] }
  0xc8   : > { %8829 = vst [vmem:[#allocation15_spill] sm:$0xff] %v5111_v13  ;;  %v8644_v21 = vrot.slane %v5111_v13, 1  ;;  %v1207_v23 = vrot.slane %v1103_v14, 1  ;;  %v8643_v24 = vrot.slane %v5117_v16, 2 }
  0xc9   : > { %8830 = vst [vmem:[#allocation16_spill] sm:$0xff] %v5117_v16  ;;  %v1449_v30 = vrot.slane %v1345_v20, 2  ;;  %v829_v43 = vmul.f32 %v4970_v33, %v761_v25  ;;  %vm793_vm11 = vcmp.ge.f32.partialorder %v761_v25, 0.0  ;;  %v8640_v47 = vrot.slane %v5162_v9, 2 }
  0xca   : > { %v1208_v31 = vsel %vm1188_vm5, %v8644_v21, %v1207_v23  ;;  %8836 = vst [vmem:[#allocation22_spill] sm:$0xff] %v5162_v9  ;;  %v1059_v23 = vmul.f32 %v4998_v55, %v5134_v36  ;;  %v5255_v21 = vmul.f32 %v5219_v4, %v5004_v57  ;;  %v5272_v36 = vmul.f32 %v5001_v56, %v5061_v34 }
  0xcb   : > { %v5136_v38 = vadd.f32 %v1208_v31, %v1066_v26  ;;  %v5141_v39 = vsel %vm1430_vm6, %v8643_v24, %v1449_v30  ;;  %v652_v41 = vpop.f32.mrf.mxu0  ;;  %v5154_v60 = vsel %vm793_vm11, %v761_v25, %v829_v43  ;;  %v1191_v30 = vsel %vm1188_vm5, %v1189_v1, %v8637_v2 }
  0xcc   : > { %8834 = vst [vmem:[#allocation20_spill] sm:$0xff] %v5141_v39  ;;  %v726_v45 = vmul.f32 %v4959_v28, %v652_v41  ;;  %v8647_v14 = vrot.slane %v5154_v60, 7  ;;  %v1301_v2 = vadd.f32 %v1191_v30, %v1059_v23  ;;  %v5251_v24 = vmul.f32 %v5219_v4, %v4983_v44 }
  0xcd   : > { %8833 = vst [vmem:[#allocation19_spill] sm:$0xff] %v5136_v38  ;;  %v8849_v9 = vrot.slane %v5096_v63, 7 }
  0xce   : > { %v762_v52 = vadd.f32 %v4964_v29, %v726_v45  ;;  %v1431_v45 = vrot.slane %v1334_v7, 2  ;;  %8843 = vst [vmem:[#allocation29_spill] sm:$0xff] %v5251_v24 }
  0xcf   : > { %8844 = vst [vmem:[#allocation30_spill] sm:$0xff] %v5255_v21 }
  0xd0   : > { %vm794_vm12 = vcmp.ge.f32.partialorder %v762_v52, 0.0  ;;  %v830_v62 = vmul.f32 %v4970_v33, %v762_v52  ;;  %8848 = vst [vmem:[#allocation34_spill] sm:$0xff] %v5272_v36 }
  0xd2   : > { %v862_v3 = vsel %vm794_vm12, %v762_v52, %v830_v62 }
  0xd3   : > { %v933_v17 = vrot.slane %v862_v3, 7  ;;  %v655_v20 = vpop.f32.mrf.mxu0 }
  0xd4   : > { %v727_v54 = vmul.f32 %v4959_v28, %v655_v20  ;;  %v1433_v20 = vsel %vm1430_vm6, %v1431_v45, %v8640_v47  ;;  %v5223_v45 = vmul.f32 %v4995_v53, %v4983_v44 }
  0xd5   : > { %v5170_v25 = vsel %vm920_vm3, %v8647_v14, %v933_v17  ;;  %v5173_v26 = vsel %vm920_vm3, %v933_v17, 0.0  ;;  %v1543_v47 = vadd.f32 %v1433_v20, %v1301_v2  ;;  %v5242_v2 = vsel %vm920_vm3, 0.0, %v926_v27 }
  0xd6   : > { %8837 = vst [vmem:[#allocation23_spill] sm:$0xff] %v5170_v25  ;;  %v5180_v31 = vmul.f32 %v4986_v46, %v5170_v25  ;;  %v1106_v41 = vmul.f32 %v4986_v46, %v5173_v26  ;;  %v5186_v43 = vmul.f32 %v4995_v53, %v5170_v25  ;;  %4521 = vmatmul.msk.bf16.gmra.mxu0 %vm8811_vm1, %v568_v6  ;;  %v5198_v6 = vperm.slane %v4991_v48, 0  ;;  %v550_v48 = vld [vmem:[%s4928_s29 + $0xd0] sm:$0xff] }
  0xd7   : > { %8838 = vst [vmem:[#allocation24_spill] sm:$0xff] %v5173_v26  ;;  %v1348_v52 = vmul.f32 %v4995_v53, %v5173_v26  ;;  %v1068_v3 = vmul.f32 %v4998_v55, %v5170_v25  ;;  %v763_v30 = vadd.f32 %v4964_v29, %v727_v54  ;;  %v5232_v54 = vmul.f32 %v5001_v56, %v4983_v44 }
  0xd8   : > { %v8646_v59 = vrot.slane %v5180_v31, 1  ;;  %v1212_v62 = vrot.slane %v1106_v41, 1  ;;  %v8645_v1 = vrot.slane %v5186_v43, 2  ;;  %v1057_v41 = vld [vmem:[%s8625_s5 + $0x8] sm:$0x7]  ;;  %8839 = vst [vmem:[#allocation25_spill] sm:$0xff] %v5223_v45  ;;  %v569_v14 = vpack.c.bf16 %v551_v42, %v550_v48 }
  0xd9   : > { %v1454_v17 = vrot.slane %v1348_v52, 2  ;;  %8840 = vst [vmem:[#allocation26_spill] sm:$0xff] %v5232_v54  ;;  %v5237_v40 = vperm.slane %v1057_v41, 0  ;;  %vm795_vm13 = vcmp.ge.f32.partialorder %v763_v30, 0.0  ;;  %v5257_v22 = vperm.slane %v1057_v41, 2 }
  0xda   : > { %v1213_v7 = vsel %vm1188_vm5, %v8646_v59, %v1212_v62  ;;  %8841 = vst [vmem:[#allocation27_spill] sm:$0xff] %v5242_v2  ;;  %v5356_v24 = vmul.f32 %v5219_v4, %v5173_v26 }
  0xdb   : > { %v5209_v8 = vadd.f32 %v1213_v7, %v1068_v3  ;;  %v5214_v23 = vsel %vm1430_vm6, %v8645_v1, %v1454_v17  ;;  %v657_v52 = vpop.f32.mrf.mxu0  ;;  %v5225_v3 = vperm.slane %v1057_v41, 1  ;;  %v1576_v17 = vmul.f32 %v5198_v6, %v4983_v44 }
  0xdc   : > { %v728_v62 = vmul.f32 %v4959_v28, %v657_v52  ;;  %v831_v52 = vmul.f32 %v4970_v33, %v763_v30  ;;  %v5262_v1 = vmul.f32 %v5219_v4, %v5007_v58  ;;  %v5278_v58 = vsel %vm920_vm3, 0.0, %v8849_v9  ;;  %8864 = vst [vmem:[#allocation48_spill] sm:$0xff] %v5356_v24 }
  0xdd   : > { %v5264_v5 = vadd.f32 %v1576_v17, %v1543_v47  ;;  %8850 = vst [vmem:[#allocation35_spill] sm:$0xff] %v5278_v58  ;;  %v5284_v17 = vmul.f32 %v5198_v6, %v5004_v57  ;;  %v5294_v9 = vmul.f32 %v4995_v53, %v5242_v2  ;;  %v5310_v63 = vmul.f32 %v4986_v46, %v5278_v58 }
  0xde   : > { %v764_v7 = vadd.f32 %v4964_v29, %v728_v62  ;;  %v5247_v62 = vmul.f32 %v4998_v55, %v4983_v44  ;;  %8845 = vst [vmem:[#allocation31_spill] sm:$0xff] %v5262_v1  ;;  %v5268_v44 = vmul.f32 %v4986_v46, %v5242_v2  ;;  %v863_v41 = vsel %vm795_vm13, %v763_v30, %v831_v52 }
  0xdf   : > { %8846 = vst [vmem:[#allocation32_spill] sm:$0xff] %v5264_v5  ;;  %v5289_v30 = vmul.f32 %v5219_v4, %v5061_v34  ;;  %v935_v52 = vrot.slane %v863_v41, 7  ;;  %v5326_v27 = vmul.f32 %v4995_v53, %v5278_v58  ;;  %v553_v5 = vld [vmem:[%s4928_s29 + $0xe8] sm:$0xff] }
  0xe0   : > { %vm796_vm14 = vcmp.ge.f32.partialorder %v764_v7, 0.0  ;;  %v832_v20 = vmul.f32 %v4970_v33, %v764_v7  ;;  %8842 = vst [vmem:[#allocation28_spill] sm:$0xff] %v5247_v62 }
  0xe1   : > { %8847 = vst [vmem:[#allocation33_spill] sm:$0xff] %v5268_v44 }
  0xe2   : > { %v864_v59 = vsel %vm796_vm14, %v764_v7, %v832_v20  ;;  %8851 = vst [vmem:[#allocation36_spill] sm:$0xff] %v5284_v17  ;;  %v5306_v7 = vmul.f32 %v5225_v3, %v5061_v34  ;;  %v5330_v20 = vmul.f32 %v5219_v4, %v5107_v12 }
  0xe3   : > { %v660_v15 = vpop.f32.mrf.mxu0  ;;  %v936_v42 = vrot.slane %v864_v59, 7  ;;  %8852 = vst [vmem:[#allocation37_spill] sm:$0xff] %v5289_v30 }
  0xe4   : > { %v729_v47 = vmul.f32 %v4959_v28, %v660_v15  ;;  %8853 = vst [vmem:[#allocation38_spill] sm:$0xff] %v5294_v9  ;;  %v8854_v15 = vrot.slane %v5154_v60, 7  ;;  %v5314_v60 = vmul.f32 %v5001_v56, %v5107_v12 }
  0xe5   : > { %8856 = vst [vmem:[#allocation40_spill] sm:$0xff] %v5306_v7  ;;  %v5317_v41 = vsel %vm920_vm3, %v935_v52, %v936_v42  ;;  %v5347_v7 = vmul.f32 %v5225_v3, %v5107_v12  ;;  %v5370_v12 = vmul.f32 %v5225_v3, %v5173_v26 }
  0xe6   : > { %v5299_v59 = vsel %vm920_vm3, 0.0, %v8854_v15  ;;  %4522 = vmatmul.msk.bf16.gmra.mxu0 %vm8811_vm1, %v569_v14  ;;  %8857 = vst [vmem:[#allocation41_spill] sm:$0xff] %v5310_v63  ;;  %v5320_v14 = vsel %vm920_vm3, %v936_v42, 0.0  ;;  %v765_v15 = vadd.f32 %v4964_v29, %v729_v47  ;;  %v5338_v42 = vmul.f32 %v5001_v56, %v5173_v26 }
  0xe7   : > { %8855 = vst [vmem:[#allocation39_spill] sm:$0xff] %v5299_v59  ;;  %v5334_v57 = vmul.f32 %v4986_v46, %v5299_v59  ;;  %v5341_v47 = vsel %vm920_vm3, 0.0, %v935_v52  ;;  %v1108_v17 = vmul.f32 %v4986_v46, %v5317_v41  ;;  %v1109_v1 = vmul.f32 %v4986_v46, %v5320_v14 }
  0xe8   : > { %8858 = vst [vmem:[#allocation42_spill] sm:$0xff] %v5314_v60  ;;  %vm797_vm15 = vcmp.ge.f32.partialorder %v765_v15, 0.0  ;;  %v833_v48 = vmul.f32 %v4970_v33, %v765_v15  ;;  %v5363_v0 = vmul.f32 %v4995_v53, %v5299_v59  ;;  %v1107_v19 = vmul.f32 %v4986_v46, %v5341_v47 }
  0xe9   : > { %8859 = vst [vmem:[#allocation43_spill] sm:$0xff] %v5320_v14  ;;  %v1217_v54 = vrot.slane %v1109_v1, 1  ;;  %v1350_v30 = vmul.f32 %v4995_v53, %v5317_v41  ;;  %v1351_v36 = vmul.f32 %v4995_v53, %v5320_v14  ;;  %v5382_v52 = vmul.f32 %v5001_v56, %v5320_v14 }
  0xea   : > { %8860 = vst [vmem:[#allocation44_spill] sm:$0xff] %v5326_v27  ;;  %v865_v34 = vsel %vm797_vm15, %v765_v15, %v833_v48  ;;  %v552_v15 = vld [vmem:[%s4928_s29 + $0xe0] sm:$0xff]  ;;  %v1349_v1 = vmul.f32 %v4995_v53, %v5341_v47  ;;  %v1070_v18 = vmul.f32 %v4998_v55, %v5317_v41 }
  0xeb   : > { %8861 = vst [vmem:[#allocation45_spill] sm:$0xff] %v5330_v20  ;;  %v662_v49 = vpop.f32.mrf.mxu0  ;;  %v938_v48 = vrot.slane %v865_v34, 7  ;;  %v570_v32 = vpack.c.bf16 %v553_v5, %v552_v15  ;;  %v1457_v62 = vrot.slane %v1350_v30, 2  ;;  %v1459_v26 = vrot.slane %v1351_v36, 2 }
  0xec   : > { %8862 = vst [vmem:[#allocation46_spill] sm:$0xff] %v5338_v42  ;;  %v730_v21 = vmul.f32 %v4959_v28, %v662_v49  ;;  %v5402_v5 = vmul.f32 %v5225_v3, %v5320_v14 }
  0xed   : > { %8863 = vst [vmem:[#allocation47_spill] sm:$0xff] %v5347_v7  ;;  %v1215_v7 = vrot.slane %v1108_v17, 1  ;;  %v5389_v17 = vmul.f32 %v5219_v4, %v5320_v14  ;;  %v5394_v45 = vsel %vm920_vm3, 0.0, %v938_v48 }
  0xee   : > { %8865 = vst [vmem:[#allocation49_spill] sm:$0xff] %v5370_v12  ;;  %v766_v49 = vadd.f32 %v4964_v29, %v730_v21  ;;  %v1214_v21 = vrot.slane %v1107_v19, 1  ;;  %v1069_v19 = vmul.f32 %v4998_v55, %v5341_v47  ;;  %v1071_v50 = vmul.f32 %v4998_v55, %v5394_v45 }
  0xef   : > { %8866 = vst [vmem:[#allocation50_spill] sm:$0xff] %v5389_v17  ;;  %v1218_v10 = vsel %vm1188_vm5, %v1215_v7, %v1217_v54 }
  0xf0   : > { %vm798_vm0 = vcmp.ge.f32.partialorder %v766_v49, 0.0  ;;  %v834_v34 = vmul.f32 %v4970_v33, %v766_v49  ;;  %8867 = vst [vmem:[#allocation51_spill] sm:$0xff] %v5394_v45  ;;  %v1312_v60 = vadd.f32 %v1218_v10, %v1070_v18 }
  0xf1   : > { %8868 = vst [vmem:[#allocation52_spill] sm:$0xff] %v5402_v5 }
  0xf2   : > { %v866_v61 = vsel %vm798_vm0, %v766_v49, %v834_v34  ;;  %v5409_v49 = vld [vmem:[%s4928_s29 + $0xf8] sm:$0xff]  ;;  %v1216_v34 = vsel %vm1188_vm5, %v1214_v21, %v1215_v7  ;;  %v1460_v21 = vsel %vm1430_vm6, %v1457_v62, %v1459_v26 }
  0xf3   : > { %v939_v20 = vrot.slane %v866_v61, 7  ;;  %v665_v12 = vpop.f32.mrf.mxu0  ;;  %v1110_v61 = vmul.f32 %v4986_v46, %v5394_v45  ;;  %v1311_v54 = vadd.f32 %v1216_v34, %v1069_v19 }
  0xf4   : > { %v731_v15 = vmul.f32 %v4959_v28, %v665_v12  ;;  %v1352_v12 = vmul.f32 %v4995_v53, %v5394_v45 }
  0xf5   : > { %v5416_v36 = vsel %vm920_vm3, %v938_v48, %v939_v20  ;;  %v5419_v30 = vsel %vm920_vm3, %v939_v20, 0.0  ;;  %v1456_v20 = vrot.slane %v1349_v1, 2  ;;  %v1219_v9 = vrot.slane %v1110_v61, 1 }
  0xf6   : > { %8869 = vst [vmem:[#allocation53_spill] sm:$0xff] %v5416_v36  ;;  %v1111_v37 = vmul.f32 %v4986_v46, %v5416_v36  ;;  %v1112_v7 = vmul.f32 %v4986_v46, %v5419_v30  ;;  %4523 = vmatmul.msk.bf16.gmra.mxu0 %vm8811_vm1, %v570_v32  ;;  %v767_v18 = vadd.f32 %v4964_v29, %v731_v15  ;;  %v1461_v1 = vrot.slane %v1352_v12, 2 }
  0xf7   : > { %8870 = vst [vmem:[#allocation54_spill] sm:$0xff] %v5419_v30  ;;  %v1353_v44 = vmul.f32 %v4995_v53, %v5416_v36  ;;  %v1354_v32 = vmul.f32 %v4995_v53, %v5419_v30  ;;  %v1458_v26 = vsel %vm1430_vm6, %v1456_v20, %v1457_v62  ;;  %v1586_v61 = vmul.f32 %v5198_v6, %v5394_v45 }
  0xf8   : > { %v1220_v51 = vrot.slane %v1111_v37, 1  ;;  %v1222_v10 = vrot.slane %v1112_v7, 1  ;;  %vm799_vm2 = vcmp.ge.f32.partialorder %v767_v18, 0.0  ;;  %v835_v19 = vmul.f32 %v4970_v33, %v767_v18 }
  0xf9   : > { %v1554_v37 = vadd.f32 %v1460_v21, %v1312_v60  ;;  %v1553_v48 = vadd.f32 %v1458_v26, %v1311_v54  ;;  %v1072_v35 = vmul.f32 %v4998_v55, %v5416_v36  ;;  %v1658_v62 = vmul.f32 %v5001_v56, %v5419_v30 }
  0xfa   : > { %v1223_v34 = vsel %vm1188_vm5, %v1220_v51, %v1222_v10  ;;  %v1221_v7 = vsel %vm1188_vm5, %v1219_v9, %v1220_v51  ;;  %v867_v20 = vsel %vm799_vm2, %v767_v18, %v835_v19  ;;  %v1462_v12 = vrot.slane %v1353_v44, 2 }
  0xfb   : > { %v667_v15 = vpop.f32.mrf.mxu0  ;;  %v1464_v60 = vrot.slane %v1354_v32, 2  ;;  %v5451_v21 = vmul.f32 %v5219_v4, %v5419_v30  ;;  %v941_v51 = vrot.slane %v867_v20, 7  ;;  %v1314_v9 = vadd.f32 %v1223_v34, %v1072_v35 }
  0xfc   : > { %v732_v2 = vmul.f32 %v4959_v28, %v667_v15  ;;  %v1313_v10 = vadd.f32 %v1221_v7, %v1071_v50  ;;  %v1656_v26 = vmul.f32 %v5001_v56, %v5394_v45  ;;  %v5458_v14 = vmul.f32 %v5225_v3, %v5419_v30 }
  0xfd   : > { %v1587_v44 = vmul.f32 %v5198_v6, %v5416_v36  ;;  %v1657_v18 = vmul.f32 %v5001_v56, %v5416_v36  ;;  %v5466_v32 = vmul.f32 %v5219_v4, %v5394_v45  ;;  %v1765_v35 = vrot.slane %v1658_v62, 1 }
  0xfe   : > { %v768_v54 = vadd.f32 %v4964_v29, %v732_v2  ;;  %8871 = vst [vmem:[#allocation55_spill] sm:$0xff] %v5458_v14  ;;  %v5469_v50 = vsel %vm920_vm3, 0.0, %v941_v51  ;;  %v1465_v19 = vsel %vm1430_vm6, %v1462_v12, %v1464_v60  ;;  %v1463_v15 = vsel %vm1430_vm6, %v1461_v1, %v1462_v12 }
  0xff   : > { %v1618_v7 = vadd.f32 %v1586_v61, %v1553_v48  ;;  %v1555_v5 = vadd.f32 %v1463_v15, %v1313_v10  ;;  %v5475_v24 = vadd.f32 %v1465_v19, %v1314_v9  ;;  %v1762_v42 = vrot.slane %v1656_v26, 1 }
 0x100   : > { %vm800_vm4 = vcmp.ge.f32.partialorder %v768_v54, 0.0  ;;  %v836_v2 = vmul.f32 %v4970_v33, %v768_v54  ;;  %v1113_v62 = vmul.f32 %v4986_v46, %v5469_v50  ;;  %v1619_v39 = vadd.f32 %v1587_v44, %v1554_v37 }
 0x101   : > { %v1763_v38 = vrot.slane %v1657_v18, 1  ;;  %v1355_v60 = vmul.f32 %v4995_v53, %v5469_v50  ;;  %v5484_v48 = vmul.f32 %v5219_v4, %v5416_v36  ;;  %v1588_v37 = vmul.f32 %v5198_v6, %v5469_v50 }
 0x102   : > { %v868_v20 = vsel %vm800_vm4, %v768_v54, %v836_v2  ;;  %v5511_v10 = vmul.f32 %v5219_v4, %v5469_v50  ;;  %v1224_v26 = vrot.slane %v1113_v62, 1  ;;  %v1073_v18 = vmul.f32 %v4998_v55, %v5469_v50 }
 0x103   : > { %v942_v16 = vrot.slane %v868_v20, 7  ;;  %v670_v25 = vpop.f32.mrf.mxu0  ;;  %v1764_v2 = vsel %vm1188_vm5, %v1762_v42, %v1763_v38  ;;  %v5521_v34 = vadd.f32 %v1588_v37, %v1555_v5 }
 0x104   : > { %v733_v27 = vmul.f32 %v4959_v28, %v670_v25  ;;  %v5497_v25 = vmul.f32 %v4998_v55, %v5299_v59 }
 0x105   : > { %v5488_v61 = vsel %vm920_vm3, %v941_v51, %v942_v16  ;;  %v5491_v12 = vsel %vm920_vm3, %v942_v16, 0.0  ;;  %v8872_v51 = vpack.c.bf16 %v5409_v49, %v5406_v11  ;;  %v1659_v16 = vmul.f32 %v5001_v56, %v5469_v50 }
 0x106   : > { %v1114_v9 = vmul.f32 %v4986_v46, %v5488_v61  ;;  %v1115_v54 = vmul.f32 %v4986_v46, %v5491_v12  ;;  %v769_v44 = vadd.f32 %v4964_v29, %v733_v27  ;;  %v1466_v11 = vrot.slane %v1355_v60, 2 }
 0x107   : > { %4524 = vmatmul.msk.bf16.gmra.mxu0 %vm8811_vm1, %v8872_v51  ;;  %v1766_v49 = vsel %vm1188_vm5, %v1763_v38, %v1765_v35  ;;  %v1356_v51 = vmul.f32 %v4995_v53, %v5488_v61  ;;  %v1357_v27 = vmul.f32 %v4995_v53, %v5491_v12  ;;  %v1767_v1 = vrot.slane %v1659_v16, 1 }
 0x108   : > { %v1225_v19 = vrot.slane %v1114_v9, 1  ;;  %v1227_v15 = vrot.slane %v1115_v54, 1  ;;  %vm801_vm7 = vcmp.ge.f32.partialorder %v769_v44, 0.0  ;;  %v837_v20 = vmul.f32 %v4970_v33, %v769_v44 }
 0x109   : > { %v1661_v38 = vmul.f32 %v5001_v56, %v5491_v12  ;;  %v5530_v54 = vadd.f32 %v1764_v2, %v1618_v7  ;;  %v1467_v37 = vrot.slane %v1356_v51, 2  ;;  %v1660_v63 = vmul.f32 %v5001_v56, %v5488_v61 }
 0x10a   : > { %v1226_v62 = vsel %vm1188_vm5, %v1224_v26, %v1225_v19  ;;  %v1228_v60 = vsel %vm1188_vm5, %v1225_v19, %v1227_v15  ;;  %v869_v35 = vsel %vm801_vm7, %v769_v44, %v837_v20  ;;  %v5537_v16 = vmul.f32 %v5219_v4, %v5491_v12 }
 0x10b   : > { %v672_v9 = vpop.f32.mrf.mxu0  ;;  %v944_v59 = vrot.slane %v869_v35, 7  ;;  %v1074_v26 = vmul.f32 %v4998_v55, %v5488_v61  ;;  %v1315_v19 = vadd.f32 %v1226_v62, %v1073_v18  ;;  %v5541_v15 = vadd.f32 %v1766_v49, %v1619_v39 }
 0x10c   : > { %v734_v5 = vmul.f32 %v4959_v28, %v672_v9  ;;  %v1469_v44 = vrot.slane %v1357_v27, 2  ;;  %v1589_v20 = vmul.f32 %v5198_v6, %v5488_v61  ;;  %v1770_v51 = vrot.slane %v1661_v38, 1 }
 0x10d   : > { %v5544_v7 = vsel %vm920_vm3, 0.0, %v944_v59  ;;  %v5551_v35 = vmul.f32 %v5225_v3, %v5491_v12  ;;  %v1316_v9 = vadd.f32 %v1228_v60, %v1074_v26  ;;  %v1468_v18 = vsel %vm1430_vm6, %v1466_v11, %v1467_v37 }
 0x10e   : > { %8873 = vst [vmem:[#allocation56_spill] sm:$0xff] %v5544_v7  ;;  %v770_v2 = vadd.f32 %v4964_v29, %v734_v5  ;;  %v1768_v49 = vrot.slane %v1660_v63, 1  ;;  %v5559_v62 = vmul.f32 %v4986_v46, %v5544_v7  ;;  %v1557_v38 = vadd.f32 %v1468_v18, %v1315_v19 }
 0x10f   : > { %v1590_v5 = vmul.f32 %v5198_v6, %v5544_v7  ;;  %v1470_v60 = vsel %vm1430_vm6, %v1467_v37, %v1469_v44  ;;  %v1621_v26 = vadd.f32 %v1589_v20, %v5475_v24  ;;  %v5567_v42 = vmul.f32 %v5219_v4, %v5488_v61 }
 0x110   : > { %vm802_vm8 = vcmp.ge.f32.partialorder %v770_v2, 0.0  ;;  %v838_v39 = vmul.f32 %v4970_v33, %v770_v2  ;;  %8874 = vst [vmem:[#allocation57_spill] sm:$0xff] %v5559_v62  ;;  %v1662_v27 = vmul.f32 %v5001_v56, %v5544_v7  ;;  %v5573_v19 = vmul.f32 %v5219_v4, %v5544_v7 }
 0x111   : > { %v8875_v18 = vrot.slane %v5484_v48, 2  ;;  %v5582_v24 = vmul.f32 %v4995_v53, %v5544_v7  ;;  %v1558_v44 = vadd.f32 %v1470_v60, %v1316_v9  ;;  %v1769_v20 = vsel %vm1188_vm5, %v1767_v1, %v1768_v49 }
 0x112   : > { %v870_v13 = vsel %vm802_vm8, %v770_v2, %v838_v39  ;;  %v8876_v2 = vrot.slane %v5466_v32, 2  ;;  %v1622_v32 = vadd.f32 %v1590_v5, %v1557_v38  ;;  %v1771_v1 = vsel %vm1188_vm5, %v1768_v49, %v1770_v51 }
 0x113   : > { %v945_v63 = vrot.slane %v870_v13, 7  ;;  %v675_v11 = vpop.f32.mrf.mxu0  ;;  %8877 = vst [vmem:[#allocation58_spill] sm:$0xff] %v5582_v24  ;;  %v1772_v38 = vrot.slane %v1662_v27, 1  ;;  %v2013_v5 = vrot.slane %v5573_v19, 2  ;;  %v1861_v49 = vadd.f32 %v1769_v20, %v5521_v34 }
 0x114   : > { %v2005_v37 = vsel %vm1430_vm6, %v8876_v2, %v8875_v18  ;;  %v735_v13 = vmul.f32 %v4959_v28, %v675_v11  ;;  %v1862_v14 = vadd.f32 %v1771_v1, %v1621_v26 }
 0x115   : > { %v5588_v58 = vsel %vm920_vm3, %v944_v59, %v945_v63  ;;  %v5591_v30 = vsel %vm920_vm3, %v945_v63, 0.0 }
 0x116   : > { %v5595_v18 = vmul.f32 %v4986_v46, %v5588_v58  ;;  %v1118_v2 = vmul.f32 %v4986_v46, %v5591_v30  ;;  %v5601_v9 = vmul.f32 %v4995_v53, %v5588_v58  ;;  %v1360_v59 = vmul.f32 %v4995_v53, %v5591_v30 }
 0x117   : > { %v1664_v60 = vmul.f32 %v5001_v56, %v5591_v30  ;;  %v771_v24 = vadd.f32 %v4964_v29, %v735_v13  ;;  %v1076_v62 = vmul.f32 %v4998_v55, %v5588_v58  ;;  %v1663_v34 = vmul.f32 %v5001_v56, %v5588_v58 }
 0x118   : > { %8878 = vst [vmem:[#allocation59_spill] sm:$0xff] %v5595_v18  ;;  %v8694_v63 = vrot.slane %v5595_v18, 1  ;;  %v1232_v11 = vrot.slane %v1118_v2, 1  ;;  %v1474_v51 = vrot.slane %v1360_v59, 2  ;;  %v1591_v2 = vmul.f32 %v5198_v6, %v5588_v58 }
 0x119   : > { %8879 = vst [vmem:[#allocation60_spill] sm:$0xff] %v5601_v9  ;;  %vm803_vm9 = vcmp.ge.f32.partialorder %v771_v24, 0.0  ;;  %v839_v19 = vmul.f32 %v4970_v33, %v771_v24  ;;  %v8881_v13 = vrot.slane %v5601_v9, 2  ;;  %v1904_v26 = vmul.f32 %v5219_v4, %v5588_v58 }
 0x11a   : > { %v1233_v27 = vsel %vm1188_vm5, %v8694_v63, %v1232_v11  ;;  %v1775_v20 = vrot.slane %v1664_v60, 1  ;;  %v2009_v63 = vrot.slane %v5567_v42, 2  ;;  %v2135_v9 = vmul.f32 %v5237_v40, %v5544_v7 }
 0x11b   : > { %v5621_v39 = vadd.f32 %v1233_v27, %v1076_v62  ;;  %v5626_v17 = vsel %vm1430_vm6, %v8881_v13, %v1474_v51  ;;  %v677_v59 = vpop.f32.mrf.mxu0  ;;  %v871_v1 = vsel %vm803_vm9, %v771_v24, %v839_v19  ;;  %v1773_v27 = vrot.slane %v1663_v34, 1 }
 0x11c   : > { %8882 = vst [vmem:[#allocation62_spill] sm:$0xff] %v5626_v17  ;;  %v736_v11 = vmul.f32 %v4959_v28, %v677_v59  ;;  %v947_v62 = vrot.slane %v871_v1, 7  ;;  %v5638_v51 = vmul.f32 %v5225_v3, %v5544_v7  ;;  %v1905_v13 = vmul.f32 %v5219_v4, %v5591_v30 }
 0x11d   : > { %8880 = vst [vmem:[#allocation61_spill] sm:$0xff] %v5621_v39  ;;  %v5644_v60 = vmul.f32 %v5225_v3, %v5591_v30  ;;  %v5649_v42 = vmul.f32 %v5257_v22, %v5544_v7  ;;  %v1623_v19 = vadd.f32 %v1591_v2, %v1558_v44  ;;  %v1774_v59 = vsel %vm1188_vm5, %v1772_v38, %v1773_v27 }
 0x11e   : > { %v772_v24 = vadd.f32 %v4964_v29, %v736_v11  ;;  %v2014_v34 = vrot.slane %v1904_v26, 2  ;;  %v8883_v1 = vrot.slane %v5451_v21, 2  ;;  %v8884_v17 = vrot.slane %v5484_v48, 2 }
 0x11f   : > { %v5660_v18 = vsel %vm920_vm3, 0.0, %v947_v62  ;;  %v1776_v7 = vsel %vm1188_vm5, %v1773_v27, %v1775_v20  ;;  %v1863_v36 = vadd.f32 %v1774_v59, %v1622_v32  ;;  %v8886_v44 = vrot.slane %v5511_v10, 2 }
 0x120   : > { %v5657_v39 = vsel %vm1430_vm6, %v8884_v17, %v8883_v1  ;;  %8885 = vst [vmem:[#allocation63_spill] sm:$0xff] %v5660_v18  ;;  %vm804_vm10 = vcmp.ge.f32.partialorder %v772_v24, 0.0  ;;  %v840_v11 = vmul.f32 %v4970_v33, %v772_v24  ;;  %v8887_v21 = vrot.slane %v5537_v16, 2 }
 0x121   : > { %v2010_v38 = vsel %vm1430_vm6, %v8886_v44, %v2009_v63  ;;  %v5671_v17 = vadd.f32 %v2005_v37, %v5530_v54  ;;  %v2016_v2 = vrot.slane %v1905_v13, 2  ;;  %v5676_v20 = vmul.f32 %v4986_v46, %v5660_v18 }
 0x122   : > { %v2012_v48 = vsel %vm1430_vm6, %v2009_v63, %v8887_v21  ;;  %v872_v1 = vsel %vm804_vm10, %v772_v24, %v840_v11  ;;  %v2102_v45 = vadd.f32 %v2010_v38, %v1861_v49  ;;  %v1864_v27 = vadd.f32 %v1776_v7, %v1623_v19 }
 0x123   : > { %8888 = vst [vmem:[#allocation64_spill] sm:$0xff] %v5676_v20  ;;  %v948_v32 = vrot.slane %v872_v1, 7  ;;  %v680_v10 = vpop.f32.mrf.mxu0  ;;  %v2136_v16 = vmul.f32 %v5237_v40, %v5588_v58  ;;  %v2015_v54 = vsel %vm1430_vm6, %v2013_v5, %v2014_v34  ;;  %v2209_v37 = vmul.f32 %v5225_v3, %v5660_v18 }
 0x124   : > { %v737_v63 = vmul.f32 %v4959_v28, %v680_v10  ;;  %v2450_v49 = vmul.f32 %v5257_v22, %v5660_v18  ;;  %v2104_v24 = vadd.f32 %v2015_v54, %v1863_v36  ;;  %v2137_v59 = vmul.f32 %v5237_v40, %v5660_v18 }
 0x125   : > { %v1047_v13 = vsel %vm920_vm3, %v948_v32, 0.0  ;;  %v2103_v7 = vadd.f32 %v2012_v48, %v1862_v14  ;;  %v5690_v19 = vsel %vm920_vm3, %v947_v62, %v948_v32  ;;  %v2017_v11 = vsel %vm1430_vm6, %v2014_v34, %v2016_v2 }
 0x126   : > { %8889 = vst [vmem:[#allocation65_spill] sm:$0xff] %v5690_v19  ;;  %v5693_v44 = vadd.f32 %v2135_v9, %v2102_v45  ;;  %v5697_v5 = vmul.f32 %v5225_v3, %v5588_v58  ;;  %v5702_v36 = vmul.f32 %v4995_v53, %v5660_v18  ;;  %v2211_v21 = vmul.f32 %v5225_v3, %v1047_v13 }
 0x127   : > { %v2105_v14 = vadd.f32 %v2017_v11, %v1864_v27  ;;  %v773_v62 = vadd.f32 %v4964_v29, %v737_v63  ;;  %v2319_v48 = vrot.slane %v2209_v37, 1  ;;  %v2560_v1 = vrot.slane %v2450_v49, 2 }
 0x128   : > { %8890 = vst [vmem:[#allocation66_spill] sm:$0xff] %v5702_v36  ;;  %v5706_v34 = vadd.f32 %v2136_v16, %v2103_v7  ;;  %v5710_v45 = vmul.f32 %v4986_v46, %v5690_v19  ;;  %v2138_v9 = vmul.f32 %v5237_v40, %v5690_v19  ;;  %v2169_v2 = vadd.f32 %v2137_v59, %v2104_v24 }
 0x129   : > { %v2314_v32 = vrot.slane %v5638_v51, 1  ;;  %v1121_v10 = vmul.f32 %v4986_v46, %v1047_v13  ;;  %vm805_vm11 = vcmp.ge.f32.partialorder %v773_v62, 0.0  ;;  %v841_v27 = vmul.f32 %v4970_v33, %v773_v62 }
 0x12a   : > { %8891 = vst [vmem:[#allocation67_spill] sm:$0xff] %v5710_v45  ;;  %v2210_v29 = vmul.f32 %v5225_v3, %v5690_v19  ;;  %v5721_v16 = vmul.f32 %v4995_v53, %v5690_v19  ;;  %v5724_v63 = vmul.f32 %v4995_v53, %v1047_v13  ;;  %v2170_v37 = vadd.f32 %v2138_v9, %v2105_v14 }
 0x12b   : > { %v682_v54 = vpop.f32.mrf.mxu0  ;;  %v2322_v49 = vrot.slane %v2211_v21, 1  ;;  %v5727_v51 = vmul.f32 %v5001_v56, %v1047_v13  ;;  %v2451_v33 = vmul.f32 %v5257_v22, %v5690_v19  ;;  %v5734_v11 = vmul.f32 %v5219_v4, %v1047_v13  ;;  %v5740_v21 = vld [vmem:[%s8623_s3] ss:$0 sm:$0xff] }
 0x12c   : > { %8892 = vst [vmem:[#allocation68_spill] sm:$0xff] %v5721_v16  ;;  %v738_v24 = vmul.f32 %v4959_v28, %v682_v54  ;;  %v2320_v59 = vrot.slane %v2210_v29, 1  ;;  %v873_v38 = vsel %vm805_vm11, %v773_v62, %v841_v27  ;;  %v2452_v26 = vmul.f32 %v5257_v22, %v1047_v13  ;;  %v5748_v13 = vld [vmem:[%s8624_s4] ss:$0 sm:$0xff] }
 0x12d   : > { %8893 = vst [vmem:[#allocation69_spill] sm:$0xff] %v5727_v51  ;;  %v2561_v29 = vrot.slane %v2451_v33, 2  ;;  %v1237_v54 = vrot.slane %v1121_v10, 1  ;;  %v950_v18 = vrot.slane %v873_v38, 7  ;;  %v2315_v27 = vrot.slane %v5697_v5, 1 }
 0x12e   : > { %8894 = vst [vmem:[#allocation70_spill] sm:$0xff] %v5734_v11  ;;  %v774_v14 = vadd.f32 %v5740_v21, %v738_v24  ;;  %v2321_v28 = vsel %vm1188_vm5, %v2319_v48, %v2320_v59  ;;  %v2323_v9 = vsel %vm1188_vm5, %v2320_v59, %v2322_v49  ;;  %v2563_v20 = vrot.slane %v2452_v26, 2 }
 0x12f   : > { %v2410_v7 = vadd.f32 %v2321_v28, %v2169_v2  ;;  %v2411_v36 = vadd.f32 %v2323_v9, %v2170_v37  ;;  %v1078_v48 = vmul.f32 %v4998_v55, %v5690_v19  ;;  %v1479_v2 = vrot.slane %v5724_v63, 2  ;;  %v5775_v63 = vld [vmem:[%s8626_s6] ss:$0 sm:$0xff] }
 0x130   : > { %vm806_vm12 = vcmp.ge.f32.partialorder %v774_v14, 0.0  ;;  %v842_v62 = vmul.f32 %v5748_v13, %v774_v14  ;;  %v2562_v26 = vsel %vm1430_vm6, %v2560_v1, %v2561_v29  ;;  %v2564_v37 = vsel %vm1430_vm6, %v2561_v29, %v2563_v20  ;;  %v5769_v1 = vld [vmem:[%s8622_s2] ss:$0 sm:$0xff] }
 0x131   : > { %v2651_v24 = vadd.f32 %v2562_v26, %v2410_v7  ;;  %v8895_v59 = vrot.slane %v5710_v45, 1  ;;  %v2652_v19 = vadd.f32 %v2564_v37, %v2411_v36  ;;  %v5764_v49 = vsel %vm920_vm3, 0.0, %v950_v18 }
 0x132   : > { %v874_v10 = vsel %vm806_vm12, %v774_v14, %v842_v62  ;;  %8896 = vst [vmem:[#allocation71_spill] sm:$0xff] %v5764_v49  ;;  %v2316_v7 = vsel %vm1188_vm5, %v2314_v32, %v2315_v27  ;;  %v8897_v14 = vrot.slane %v5644_v60, 1  ;;  %v2448_v62 = vmul.f32 %v5257_v22, %v5588_v58 }
 0x133   : > { %v1238_v33 = vsel %vm1188_vm5, %v8895_v59, %v1237_v54  ;;  %v951_v28 = vrot.slane %v874_v10, 7  ;;  %v685_v9 = vpop.f32.mrf.mxu0  ;;  %v2449_v26 = vmul.f32 %v5257_v22, %v5591_v30  ;;  %v2687_v32 = vmul.f32 %v5775_v63, %v2651_v24  ;;  %v5816_v24 = vld [vmem:[%s8627_s7] ss:$0 sm:$0xff] }
 0x134   : > { %v739_v20 = vmul.f32 %v5769_v1, %v685_v9  ;;  %v2318_v36 = vsel %vm1188_vm5, %v2315_v27, %v8897_v14  ;;  %v5804_v27 = vmul.f32 %v4986_v46, %v5764_v49  ;;  %v2688_v30 = vmul.f32 %v5775_v63, %v2652_v19 }
 0x135   : > { %v5782_v29 = vsel %vm920_vm3, %v950_v18, %v951_v28  ;;  %v5785_v54 = vsel %vm920_vm3, %v951_v28, 0.0  ;;  %v2408_v37 = vadd.f32 %v2316_v7, %v5693_v44  ;;  %v2556_v11 = vrot.slane %v2448_v62, 2 }
 0x136   : > { %8898 = vst [vmem:[#allocation72_spill] sm:$0xff] %v5782_v29  ;;  %v5793_v10 = vmul.f32 %v4986_v46, %v5782_v29  ;;  %v1124_v60 = vmul.f32 %v4986_v46, %v5785_v54  ;;  %v5799_v18 = vmul.f32 %v4995_v53, %v5782_v29  ;;  %v1366_v58 = vmul.f32 %v4995_v53, %v5785_v54 }
 0x137   : > { %8899 = vst [vmem:[#allocation73_spill] sm:$0xff] %v5785_v54  ;;  %v775_v14 = vadd.f32 %v5740_v21, %v739_v20  ;;  %v1080_v5 = vmul.f32 %v4998_v55, %v5782_v29  ;;  %v2558_v19 = vrot.slane %v2449_v26, 2  ;;  %v2723_v7 = vadd.f32 %v5816_v24, %v2687_v32  ;;  %v5827_v20 = vld [vmem:[%s8628_s8] ss:$0 sm:$0xff] }
 0x138   : > { %8900 = vst [vmem:[#allocation74_spill] sm:$0xff] %v5793_v10  ;;  %v8709_v59 = vrot.slane %v5793_v10, 1  ;;  %v1242_v28 = vrot.slane %v1124_v60, 1  ;;  %v1484_v38 = vrot.slane %v1366_v58, 2  ;;  %v2409_v60 = vadd.f32 %v2318_v36, %v5706_v34 }
 0x139   : > { %8901 = vst [vmem:[#allocation75_spill] sm:$0xff] %v5799_v18  ;;  %v2555_v9 = vrot.slane %v5649_v42, 2  ;;  %v8904_v62 = vrot.slane %v5799_v18, 2  ;;  %vm807_vm13 = vcmp.ge.f32.partialorder %v775_v14, 0.0  ;;  %v2724_v58 = vadd.f32 %v5816_v24, %v2688_v30 }
 0x13a   : > { %8902 = vst [vmem:[#allocation76_spill] sm:$0xff] %v5804_v27  ;;  %v1243_v44 = vsel %vm1188_vm5, %v8709_v59, %v1242_v28  ;;  %v843_v28 = vmul.f32 %v5748_v13, %v775_v14  ;;  %vm2755_vm14 = vcmp.ge.f32.partialorder %v2723_v7, 0.0  ;;  %v2791_v59 = vmul.f32 %v5827_v20, %v2723_v7 }
 0x13b   : > { %v5831_v51 = vadd.f32 %v1243_v44, %v1080_v5  ;;  %v5836_v26 = vsel %vm1430_vm6, %v8904_v62, %v1484_v38  ;;  %v687_v32 = vpop.f32.mrf.mxu0  ;;  %vm2756_vm15 = vcmp.ge.f32.partialorder %v2724_v58, 0.0  ;;  %v2792_v42 = vmul.f32 %v5827_v20, %v2724_v58 }
 0x13c   : > { %8905 = vst [vmem:[#allocation78_spill] sm:$0xff] %v5836_v26  ;;  %v740_v34 = vmul.f32 %v5769_v1, %v687_v32  ;;  %v2557_v5 = vsel %vm1430_vm6, %v2555_v9, %v2556_v11  ;;  %v2559_v36 = vsel %vm1430_vm6, %v2556_v11, %v2558_v19  ;;  %v5845_v38 = vsel %vm2755_vm14, %v2723_v7, %v2791_v59 }
 0x13d   : > { %8903 = vst [vmem:[#allocation77_spill] sm:$0xff] %v5831_v51  ;;  %v2649_v30 = vadd.f32 %v2557_v5, %v2408_v37  ;;  %v2650_v62 = vadd.f32 %v2559_v36, %v2409_v60  ;;  %v5848_v29 = vadd.f32 %v1238_v33, %v1078_v48  ;;  %v8908_v45 = vrot.slane %v5721_v16, 2 }
 0x13e   : > { %8906 = vst [vmem:[#allocation79_spill] sm:$0xff] %v5845_v38  ;;  %v776_v44 = vadd.f32 %v5740_v21, %v740_v34  ;;  %v5857_v32 = vmul.f32 %v4995_v53, %v5764_v49  ;;  %v5859_v9 = vsel %vm2756_vm15, %v2724_v58, %v2792_v42  ;;  %v5862_v11 = vsel %vm807_vm13, %v775_v14, %v843_v28 }
 0x13f   : > { %8907 = vst [vmem:[#allocation80_spill] sm:$0xff] %v5848_v29  ;;  %v5853_v18 = vsel %vm1430_vm6, %v8908_v45, %v1479_v2  ;;  %v2848_v37 = vpack.c.bf16 %v5859_v9, %v5845_v38  ;;  %v2133_v48 = vmul.f32 %v5237_v40, %v5469_v50  ;;  %v2685_v45 = vmul.f32 %v5775_v63, %v2649_v30 }
 0x140   : > { %8909 = vst [vmem:[#allocation81_spill] sm:$0xff] %v5853_v18  ;;  %vm808_vm0 = vcmp.ge.f32.partialorder %v776_v44, 0.0  ;;  %v844_v33 = vmul.f32 %v5748_v13, %v776_v44  ;;  %v2686_v2 = vmul.f32 %v5775_v63, %v2650_v62  ;;  %v2134_v59 = vmul.f32 %v5237_v40, %v5488_v61 }
 0x141   : > { %8910 = vst [vmem:[#allocation82_spill] sm:$0xff] %v5857_v32  ;;  %2857 = vmatpush.bf16.msra.mxu1 %v2848_v37  ;;  %v2101_v14 = vadd.f32 %v5657_v39, %v5541_v15  ;;  %v2203_v7 = vmul.f32 %v5225_v3, %v5469_v50  ;;  %v2204_v60 = vmul.f32 %v5225_v3, %v5488_v61  ;;  %v953_v5 = vrot.slane %v5862_v11, 7  ;;  %v8989_v32 = vld [vmem:[#allocation4_spill] sm:$0xff] }
 0x142   : > { %8911 = vst [vmem:[#allocation83_spill] sm:$0xff] %v5859_v9  ;;  %v5882_v58 = vmul.f32 %v5001_v56, %v5785_v54  ;;  %v876_v28 = vsel %vm808_vm0, %v776_v44, %v844_v33  ;;  %v2721_v34 = vadd.f32 %v5816_v24, %v2685_v45  ;;  %v2722_v42 = vadd.f32 %v5816_v24, %v2686_v2 }
 0x143   : > { %v954_v36 = vrot.slane %v876_v28, 7  ;;  %v2310_v30 = vrot.slane %v2204_v60, 1  ;;  %v2312_v15 = vrot.slane %v5551_v35, 1  ;;  %v2165_v62 = vadd.f32 %v2133_v48, %v5671_v17 }
 0x144   : > { %8912 = vst [vmem:[#allocation84_spill] sm:$0xff] %v5882_v58  ;;  %v2789_v39 = vmul.f32 %v5827_v20, %v2721_v34  ;;  %v2166_v37 = vadd.f32 %v2134_v59, %v2101_v14  ;;  %v2309_v19 = vrot.slane %v2203_v7, 1  ;;  %vm2753_vm2 = vcmp.ge.f32.partialorder %v2721_v34, 0.0 }
 0x145   : > { %v5891_v9 = vsel %vm920_vm3, %v953_v5, %v954_v36  ;;  %v5894_v44 = vsel %vm920_vm3, %v954_v36, 0.0  ;;  %v2444_v11 = vmul.f32 %v5257_v22, %v5469_v50  ;;  %v2790_v48 = vmul.f32 %v5827_v20, %v2722_v42 }
 0x146   : > { %8913 = vst [vmem:[#allocation85_spill] sm:$0xff] %v5891_v9  ;;  %v5900_v33 = vmul.f32 %v4986_v46, %v5891_v9  ;;  %v1127_v35 = vmul.f32 %v4986_v46, %v5894_v44  ;;  %v5906_v17 = vmul.f32 %v4995_v53, %v5891_v9  ;;  %v1369_v45 = vmul.f32 %v4995_v53, %v5894_v44 }
 0x147   : > { %8914 = vst [vmem:[#allocation86_spill] sm:$0xff] %v5894_v44  ;;  %vm2754_vm4 = vcmp.ge.f32.partialorder %v2722_v42, 0.0  ;;  %v2311_v2 = vsel %vm1188_vm5, %v2309_v19, %v2310_v30  ;;  %v2313_v50 = vsel %vm1188_vm5, %v2310_v30, %v2312_v15  ;;  %v5915_v60 = vsel %vm2753_vm2, %v2721_v34, %v2789_v39  ;;  %v690_v30 = vpop.f32.mrf.mxu0 }
 0x148   : > { %8915 = vst [vmem:[#allocation87_spill] sm:$0xff] %v5900_v33  ;;  %v8720_v59 = vrot.slane %v5900_v33, 1  ;;  %v1247_v14 = vrot.slane %v1127_v35, 1  ;;  %v5919_v28 = vmul.f32 %v5219_v4, %v5785_v54  ;;  %v5923_v36 = vmul.f32 %v5225_v3, %v5785_v54 }
 0x149   : > { %8916 = vst [vmem:[#allocation88_spill] sm:$0xff] %v5906_v17  ;;  %v1082_v19 = vmul.f32 %v4998_v55, %v5891_v9  ;;  %v1489_v38 = vrot.slane %v1369_v45, 2  ;;  %v5930_v35 = vsel %vm2754_vm4, %v2722_v42, %v2790_v48  ;;  %v2406_v34 = vadd.f32 %v2311_v2, %v2165_v62  ;;  %v8987_v9 = vld [vmem:[#allocation24_spill] sm:$0xff] }
 0x14a   : > { %8917 = vst [vmem:[#allocation89_spill] sm:$0xff] %v5915_v60  ;;  %v1248_v15 = vsel %vm1188_vm5, %v8720_v59, %v1247_v14  ;;  %v2407_v39 = vadd.f32 %v2313_v50, %v2166_v37  ;;  %v8922_v16 = vrot.slane %v5906_v17, 2  ;;  %v2847_v18 = vpack.c.bf16 %v5930_v35, %v5915_v60  ;;  %v8938_v59 = vld [vmem:[#allocation35_spill] sm:$0xff]  ;;  %v9043_v17 = vld [vmem:[#allocation18_spill] sm:$0xff] }
 0x14b   : > { %8918 = vst [vmem:[#allocation90_spill] sm:$0xff] %v5919_v28  ;;  %v5932_v7 = vadd.f32 %v1248_v15, %v1082_v19  ;;  %v2445_v45 = vmul.f32 %v5257_v22, %v5488_v61  ;;  %v2446_v14 = vmul.f32 %v5257_v22, %v5491_v12  ;;  %v2550_v42 = vrot.slane %v2444_v11, 2 }
 0x14c   : > { %8919 = vst [vmem:[#allocation91_spill] sm:$0xff] %v5923_v36  ;;  %v5937_v54 = vsel %vm1430_vm6, %v8922_v16, %v1489_v38  ;;  %v741_v62 = vmul.f32 %v5769_v1, %v690_v30  ;;  %v8924_v37 = vrot.slane %v5180_v31, 1  ;;  %v8925_v48 = vrot.slane %v5334_v57, 1  ;;  %2858 = vmatpush.bf16.msra.mxu1 %v2847_v18  ;;  %v8965_v36 = vld [vmem:[#allocation12_spill] sm:$0xff] }
 0x14d   : > { %8920 = vst [vmem:[#allocation92_spill] sm:$0xff] %v5930_v35  ;;  %v2551_v16 = vrot.slane %v2445_v45, 2  ;;  %v1451_v50 = vrot.slane %v5363_v0, 2  ;;  %v1552_v61 = vadd.f32 %v5214_v23, %v5209_v8  ;;  %v2553_v19 = vrot.slane %v2446_v14, 2  ;;  %v8939_v35 = vld [vmem:[#allocation15_spill] sm:$0xff] }
 0x14e   : > { %8921 = vst [vmem:[#allocation93_spill] sm:$0xff] %v5932_v7  ;;  %v1211_v2 = vsel %vm1188_vm5, %v8925_v48, %v8924_v37  ;;  %v777_v12 = vadd.f32 %v5740_v21, %v741_v62  ;;  %v1584_v11 = vmul.f32 %v5198_v6, %v5341_v47  ;;  %v1585_v31 = vmul.f32 %v5198_v6, %v5317_v41 }
 0x14f   : > { %8923 = vst [vmem:[#allocation94_spill] sm:$0xff] %v5937_v54  ;;  %v1309_v38 = vadd.f32 %v1211_v2, %v5497_v25  ;;  %v2552_v57 = vsel %vm1430_vm6, %v2550_v42, %v2551_v16  ;;  %v8926_v18 = vrot.slane %v5186_v43, 2  ;;  %v1653_v0 = vmul.f32 %v5001_v56, %v5341_v47 }
 0x150   : > { %v1654_v8 = vmul.f32 %v5001_v56, %v5317_v41  ;;  %v5970_v30 = vsel %vm920_vm3, 0.0, %v953_v5  ;;  %v2554_v15 = vsel %vm1430_vm6, %v2551_v16, %v2553_v19  ;;  %v2647_v45 = vadd.f32 %v2552_v57, %v2406_v34  ;;  %v8936_v34 = vld [vmem:[#allocation55_spill] sm:$0xff] }
 0x151   : > { %v1453_v25 = vsel %vm1430_vm6, %v1451_v50, %v8926_v18  ;;  %8927 = vst [vmem:[#allocation95_spill] sm:$0xff] %v5970_v30  ;;  %v2648_v14 = vadd.f32 %v2554_v15, %v2407_v39  ;;  %vm809_vm7 = vcmp.ge.f32.partialorder %v777_v12, 0.0  ;;  %v1617_v43 = vadd.f32 %v1585_v31, %v1552_v61 }
 0x152   : > { %v1551_v42 = vadd.f32 %v1453_v25, %v1309_v38  ;;  %v2683_v62 = vmul.f32 %v5775_v63, %v2647_v45  ;;  %v845_v37 = vmul.f32 %v5748_v13, %v777_v12  ;;  %v1757_v48 = vrot.slane %v1653_v0, 1 }
 0x153   : > { %v1758_v2 = vrot.slane %v1654_v8, 1  ;;  %v2684_v50 = vmul.f32 %v5775_v63, %v2648_v14  ;;  %v1894_v5 = vmul.f32 %v5219_v4, %v5341_v47  ;;  %v1895_v16 = vmul.f32 %v5219_v4, %v5317_v41 }
 0x154   : > { %v1616_v18 = vadd.f32 %v1584_v11, %v1551_v42  ;;  %v2719_v39 = vadd.f32 %v5816_v24, %v2683_v62  ;;  %v8928_v61 = vrot.slane %v5382_v52, 1  ;;  %v5990_v0 = vmul.f32 %v4986_v46, %v5970_v30  ;;  %v8931_v62 = vld [vmem:[#allocation51_spill] sm:$0xff] }
 0x155   : > { %v1759_v38 = vsel %vm1188_vm5, %v1757_v48, %v1758_v2  ;;  %v2720_v11 = vadd.f32 %v5816_v24, %v2684_v50  ;;  %v5994_v15 = vsel %vm809_vm7, %v777_v12, %v845_v37  ;;  %v1998_v45 = vrot.slane %v1894_v5, 2  ;;  %v8932_v48 = vld [vmem:[#allocation53_spill] sm:$0xff]  ;;  %v8934_v37 = vld [vmem:[#allocation50_spill] sm:$0xff] }
 0x156   : > { %v1761_v19 = vsel %vm1188_vm5, %v1758_v2, %v8928_v61  ;;  %v1857_v57 = vadd.f32 %v1759_v38, %v1616_v18  ;;  %8929 = vst [vmem:[#allocation96_spill] sm:$0xff] %v5990_v0  ;;  %vm2751_vm8 = vcmp.ge.f32.partialorder %v2719_v39, 0.0  ;;  %v2787_v8 = vmul.f32 %v5827_v20, %v2719_v39 }
 0x157   : > { %v1858_v25 = vadd.f32 %v1761_v19, %v1617_v43  ;;  %vm2752_vm9 = vcmp.ge.f32.partialorder %v2720_v11, 0.0  ;;  %v2788_v52 = vmul.f32 %v5827_v20, %v2720_v11  ;;  %v1999_v14 = vrot.slane %v1895_v16, 2 }
 0x158   : > { %v5997_v42 = vsel %vm2751_vm8, %v2719_v39, %v2787_v8  ;;  %v2131_v43 = vmul.f32 %v5237_v40, %v8931_v62  ;;  %v2132_v2 = vmul.f32 %v5237_v40, %v8932_v48  ;;  %v2200_v50 = vmul.f32 %v5225_v3, %v8931_v62 }
 0x159   : > { %8930 = vst [vmem:[#allocation97_spill] sm:$0xff] %v5997_v42  ;;  %v6005_v18 = vsel %vm2752_vm9, %v2720_v11, %v2788_v52  ;;  %v2000_v12 = vsel %vm1430_vm6, %v1998_v45, %v1999_v14  ;;  %v8935_v38 = vrot.slane %v8934_v37, 2  ;;  %v2201_v16 = vmul.f32 %v5225_v3, %v8932_v48  ;;  %v8937_v37 = vld [vmem:[#allocation54_spill] sm:$0xff] }
 0x15a   : > { %8933 = vst [vmem:[#allocation51_spill] sm:$0xff] %v6005_v18  ;;  %v2846_v39 = vpack.c.bf16 %v6005_v18, %v5997_v42  ;;  %v2098_v61 = vadd.f32 %v2000_v12, %v1857_v57  ;;  %v2304_v8 = vrot.slane %v2200_v50, 1  ;;  %v2307_v23 = vrot.slane %v8936_v34, 1  ;;  %v8944_v18 = vld [vmem:[#allocation19_spill] sm:$0xff] }
 0x15b   : > { %v2002_v5 = vsel %vm1430_vm6, %v1999_v14, %v8935_v38  ;;  %v2305_v31 = vrot.slane %v2201_v16, 1  ;;  %v2441_v11 = vmul.f32 %v5257_v22, %v8931_v62  ;;  %v2442_v52 = vmul.f32 %v5257_v22, %v8932_v48 }
 0x15c   : > { %v2099_v19 = vadd.f32 %v2002_v5, %v1858_v25  ;;  %2859 = vmatpush.bf16.msra.mxu1 %v2846_v39  ;;  %v2163_v45 = vadd.f32 %v2131_v43, %v2098_v61  ;;  %v2443_v38 = vmul.f32 %v5257_v22, %v8937_v37  ;;  %v1065_v57 = vmul.f32 %v4998_v55, %v8938_v59  ;;  %v8941_v39 = vld [vmem:[#allocation41_spill] sm:$0xff]  ;;  %v8943_v37 = vld [vmem:[#allocation44_spill] sm:$0xff] }
 0x15d   : > { %v2306_v25 = vsel %vm1188_vm5, %v2304_v8, %v2305_v31  ;;  %v2308_v50 = vsel %vm1188_vm5, %v2305_v31, %v2307_v23  ;;  %v2545_v34 = vrot.slane %v2441_v11, 2  ;;  %v2546_v12 = vrot.slane %v2442_v52, 2  ;;  %v8945_v8 = vld [vmem:[#allocation20_spill] sm:$0xff]  ;;  %v8946_v11 = vld [vmem:[#allocation39_spill] sm:$0xff] }
 0x15e   : > { %v2164_v14 = vadd.f32 %v2132_v2, %v2099_v19  ;;  %v2404_v5 = vadd.f32 %v2306_v25, %v2163_v45  ;;  %v2548_v16 = vrot.slane %v2443_v38, 2  ;;  %v8940_v48 = vrot.slane %v8939_v35, 1  ;;  %v8947_v45 = vld [vmem:[#allocation23_spill] sm:$0xff]  ;;  %v8948_v38 = vld [vmem:[#allocation16_spill] sm:$0xff] }
 0x15f   : > { %v8942_v43 = vrot.slane %v8941_v39, 1  ;;  %v2547_v61 = vsel %vm1430_vm6, %v2545_v34, %v2546_v12  ;;  %v1446_v60 = vrot.slane %v8943_v37, 2  ;;  %v1550_v42 = vadd.f32 %v8945_v8, %v8944_v18  ;;  %v8950_v8 = vld [vmem:[#allocation46_spill] sm:$0xff] }
 0x160   : > { %v2405_v62 = vadd.f32 %v2308_v50, %v2164_v14  ;;  %v2549_v23 = vsel %vm1430_vm6, %v2546_v12, %v2548_v16  ;;  %v2645_v31 = vadd.f32 %v2547_v61, %v2404_v5  ;;  %v1582_v52 = vmul.f32 %v5198_v6, %v8946_v11 }
 0x161   : > { %v1206_v2 = vsel %vm1188_vm5, %v8942_v43, %v8940_v48  ;;  %v1583_v35 = vmul.f32 %v5198_v6, %v8947_v45  ;;  %v8949_v25 = vrot.slane %v8948_v38, 2  ;;  %v1651_v18 = vmul.f32 %v5001_v56, %v8947_v45 }
 0x162   : > { %v1307_v19 = vadd.f32 %v1206_v2, %v1065_v57  ;;  %v2646_v14 = vadd.f32 %v2549_v23, %v2405_v62  ;;  %v1650_v57 = vmul.f32 %v5001_v56, %v8946_v11  ;;  %v2681_v34 = vmul.f32 %v5775_v63, %v2645_v31 }
 0x163   : > { %v1448_v50 = vsel %vm1430_vm6, %v1446_v60, %v8949_v25  ;;  %v1615_v5 = vadd.f32 %v1583_v35, %v1550_v42  ;;  %v1891_v16 = vmul.f32 %v5219_v4, %v8946_v11  ;;  %v1753_v39 = vrot.slane %v1651_v18, 1 }
 0x164   : > { %v1549_v12 = vadd.f32 %v1448_v50, %v1307_v19  ;;  %v2682_v48 = vmul.f32 %v5775_v63, %v2646_v14  ;;  %v1752_v62 = vrot.slane %v1650_v57, 1  ;;  %v1892_v60 = vmul.f32 %v5219_v4, %v8947_v45  ;;  %v8952_v57 = vld [vmem:[#allocation48_spill] sm:$0xff] }
 0x165   : > { %v2717_v43 = vadd.f32 %v5816_v24, %v2681_v34  ;;  %v1993_v61 = vrot.slane %v1891_v16, 2  ;;  %v2129_v37 = vmul.f32 %v5237_v40, %v5341_v47  ;;  %v8951_v23 = vrot.slane %v8950_v8, 1 }
 0x166   : > { %v1614_v2 = vadd.f32 %v1582_v52, %v1549_v12  ;;  %v2718_v19 = vadd.f32 %v5816_v24, %v2682_v48  ;;  %v1754_v42 = vsel %vm1188_vm5, %v1752_v62, %v1753_v39  ;;  %v1994_v35 = vrot.slane %v1892_v60, 2 }
 0x167   : > { %v1756_v31 = vsel %vm1188_vm5, %v1753_v39, %v8951_v23  ;;  %vm2749_vm10 = vcmp.ge.f32.partialorder %v2717_v43, 0.0  ;;  %v2785_v14 = vmul.f32 %v5827_v20, %v2717_v43  ;;  %v8953_v18 = vrot.slane %v8952_v57, 2  ;;  %v8958_v57 = vld [vmem:[#allocation27_spill] sm:$0xff] }
 0x168   : > { %v1855_v38 = vadd.f32 %v1754_v42, %v1614_v2  ;;  %v1856_v25 = vadd.f32 %v1756_v31, %v1615_v5  ;;  %vm2750_vm11 = vcmp.ge.f32.partialorder %v2718_v19, 0.0  ;;  %v2786_v52 = vmul.f32 %v5827_v20, %v2718_v19  ;;  %v8956_v2 = vld [vmem:[#allocation52_spill] sm:$0xff]  ;;  %v692_v42 = vpop.f32.mrf.mxu0 }
 0x169   : > { %v1995_v50 = vsel %vm1430_vm6, %v1993_v61, %v1994_v35  ;;  %v1997_v34 = vsel %vm1430_vm6, %v1994_v35, %v8953_v18  ;;  %v6067_v12 = vsel %vm2749_vm10, %v2717_v43, %v2785_v14  ;;  %v2130_v62 = vmul.f32 %v5237_v40, %v5317_v41 }
 0x16a   : > { %8954 = vst [vmem:[#allocation53_spill] sm:$0xff] %v6067_v12  ;;  %v2096_v16 = vadd.f32 %v1995_v50, %v1855_v38  ;;  %v2097_v48 = vadd.f32 %v1997_v34, %v1856_v25  ;;  %v6071_v39 = vsel %vm2750_vm11, %v2718_v19, %v2786_v52  ;;  %v2197_v5 = vmul.f32 %v5225_v3, %v5341_v47  ;;  %v8957_v38 = vld [vmem:[#allocation43_spill] sm:$0xff] }
 0x16b   : > { %8955 = vst [vmem:[#allocation50_spill] sm:$0xff] %v6071_v39  ;;  %v2198_v60 = vmul.f32 %v5225_v3, %v5317_v41  ;;  %v2302_v61 = vrot.slane %v8956_v2, 1  ;;  %v2845_v43 = vpack.c.bf16 %v6071_v39, %v6067_v12  ;;  %v2438_v31 = vmul.f32 %v5257_v22, %v5341_v47 }
 0x16c   : > { %v2161_v8 = vadd.f32 %v2129_v37, %v2096_v16  ;;  %v2162_v23 = vadd.f32 %v2130_v62, %v2097_v48  ;;  %v2299_v35 = vrot.slane %v2197_v5, 1  ;;  %v2439_v14 = vmul.f32 %v5257_v22, %v5317_v41  ;;  %v8959_v37 = vld [vmem:[#allocation9_spill] sm:$0xff] }
 0x16d   : > { %v2300_v19 = vrot.slane %v2198_v60, 1  ;;  %v2440_v25 = vmul.f32 %v5257_v22, %v8957_v38  ;;  %2860 = vmatpush.bf16.msra.mxu1 %v2845_v43  ;;  %v2540_v52 = vrot.slane %v2438_v31, 2  ;;  %v742_v50 = vmul.f32 %v5769_v1, %v692_v42  ;;  %v8961_v16 = vld [vmem:[#allocation33_spill] sm:$0xff] }
 0x16e   : > { %v1063_v18 = vmul.f32 %v4998_v55, %v8958_v57  ;;  %v8960_v34 = vrot.slane %v8959_v37, 1  ;;  %v8962_v48 = vrot.slane %v8961_v16, 1  ;;  %v2541_v5 = vrot.slane %v2439_v14, 2  ;;  %v8963_v37 = vld [vmem:[#allocation38_spill] sm:$0xff]  ;;  %v8964_v16 = vld [vmem:[#allocation11_spill] sm:$0xff] }
 0x16f   : > { %v2301_v62 = vsel %vm1188_vm5, %v2299_v35, %v2300_v19  ;;  %v2303_v41 = vsel %vm1188_vm5, %v2300_v19, %v2302_v61  ;;  %v2543_v60 = vrot.slane %v2440_v25, 2  ;;  %v778_v31 = vadd.f32 %v5740_v21, %v742_v50  ;;  %v8966_v19 = vld [vmem:[#allocation10_spill] sm:$0xff]  ;;  %v8968_v25 = vld [vmem:[#allocation13_spill] sm:$0xff] }
 0x170   : > { %v1201_v47 = vsel %vm1188_vm5, %v8962_v48, %v8960_v34  ;;  %v2402_v2 = vadd.f32 %v2301_v62, %v2161_v8  ;;  %v2403_v43 = vadd.f32 %v2303_v41, %v2162_v23  ;;  %v2542_v38 = vsel %vm1430_vm6, %v2540_v52, %v2541_v5 }
 0x171   : > { %v1305_v42 = vadd.f32 %v1201_v47, %v1063_v18  ;;  %v2544_v39 = vsel %vm1430_vm6, %v2541_v5, %v2543_v60  ;;  %v1441_v12 = vrot.slane %v8963_v37, 2  ;;  %v1548_v34 = vadd.f32 %v8965_v36, %v8964_v16 }
 0x172   : > { %v2643_v48 = vadd.f32 %v2542_v38, %v2402_v2  ;;  %v2644_v35 = vadd.f32 %v2544_v39, %v2403_v43  ;;  %vm810_vm12 = vcmp.ge.f32.partialorder %v778_v31, 0.0  ;;  %v846_v61 = vmul.f32 %v5748_v13, %v778_v31 }
 0x173   : > { %v8967_v8 = vrot.slane %v8966_v19, 2  ;;  %v1580_v14 = vmul.f32 %v5198_v6, %v8938_v59  ;;  %v1581_v52 = vmul.f32 %v5198_v6, %v8968_v25  ;;  %v1647_v50 = vmul.f32 %v5001_v56, %v8938_v59 }
 0x174   : > { %v2679_v36 = vmul.f32 %v5775_v63, %v2643_v48  ;;  %v2680_v39 = vmul.f32 %v5775_v63, %v2644_v35  ;;  %v878_v18 = vsel %vm810_vm12, %v778_v31, %v846_v61  ;;  %v8734_v62 = vrot.slane %v5994_v15, 7 }
 0x175   : > { %v1443_v23 = vsel %vm1430_vm6, %v1441_v12, %v8967_v8  ;;  %v957_v41 = vrot.slane %v878_v18, 7  ;;  %v1613_v5 = vadd.f32 %v1581_v52, %v1548_v34  ;;  %v1648_v12 = vmul.f32 %v5001_v56, %v8968_v25 }
 0x176   : > { %v1547_v47 = vadd.f32 %v1443_v23, %v1305_v42  ;;  %v6119_v60 = vmul.f32 %v4995_v53, %v5970_v30  ;;  %v2715_v2 = vadd.f32 %v5816_v24, %v2679_v36  ;;  %v2716_v43 = vadd.f32 %v5816_v24, %v2680_v39 }
 0x177   : > { %v6126_v31 = vsel %vm920_vm3, %v8734_v62, %v957_v41  ;;  %v6129_v42 = vsel %vm920_vm3, %v957_v41, 0.0  ;;  %v1747_v37 = vrot.slane %v1647_v50, 1  ;;  %v1888_v16 = vmul.f32 %v5219_v4, %v8938_v59  ;;  %v8978_v41 = vld [vmem:[#allocation42_spill] sm:$0xff] }
 0x178   : > { %8969 = vst [vmem:[#allocation55_spill] sm:$0xff] %v6119_v60  ;;  %v1612_v38 = vadd.f32 %v1580_v14, %v1547_v47  ;;  %vm2747_vm13 = vcmp.ge.f32.partialorder %v2715_v2, 0.0  ;;  %vm2748_vm14 = vcmp.ge.f32.partialorder %v2716_v43, 0.0  ;;  %v2783_v34 = vmul.f32 %v5827_v20, %v2715_v2 }
 0x179   : > { %8970 = vst [vmem:[#allocation54_spill] sm:$0xff] %v6126_v31  ;;  %v2784_v48 = vmul.f32 %v5827_v20, %v2716_v43  ;;  %v6137_v35 = vmul.f32 %v4986_v46, %v6126_v31  ;;  %v1130_v61 = vmul.f32 %v4986_v46, %v6129_v42  ;;  %v6143_v19 = vmul.f32 %v4995_v53, %v6126_v31 }
 0x17a   : > { %8971 = vst [vmem:[#allocation35_spill] sm:$0xff] %v6129_v42  ;;  %v1748_v8 = vrot.slane %v1648_v12, 1  ;;  %v6145_v23 = vsel %vm2747_vm13, %v2715_v2, %v2783_v34  ;;  %v1372_v52 = vmul.f32 %v4995_v53, %v6129_v42  ;;  %v1889_v50 = vmul.f32 %v5219_v4, %v8968_v25 }
 0x17b   : > { %8972 = vst [vmem:[#allocation15_spill] sm:$0xff] %v6137_v35  ;;  %v6147_v14 = vsel %vm2748_vm14, %v2716_v43, %v2784_v48  ;;  %v8741_v39 = vrot.slane %v6137_v35, 1  ;;  %v1252_v18 = vrot.slane %v1130_v61, 1  ;;  %v6160_v12 = vmul.f32 %v5001_v56, %v5894_v44 }
 0x17c   : > { %8973 = vst [vmem:[#allocation41_spill] sm:$0xff] %v6143_v19  ;;  %v2844_v36 = vpack.c.bf16 %v6147_v14, %v6145_v23  ;;  %v1084_v2 = vmul.f32 %v4998_v55, %v6126_v31  ;;  %v1494_v43 = vrot.slane %v1372_v52, 2  ;;  %v6166_v34 = vmul.f32 %v5219_v4, %v5894_v44 }
 0x17d   : > { %8974 = vst [vmem:[#allocation44_spill] sm:$0xff] %v6145_v23  ;;  %v1253_v48 = vsel %vm1188_vm5, %v8741_v39, %v1252_v18  ;;  %v1749_v61 = vsel %vm1188_vm5, %v1747_v37, %v1748_v8  ;;  %v8979_v62 = vrot.slane %v8978_v41, 1  ;;  %v8982_v23 = vrot.slane %v6143_v19, 2 }
 0x17e   : > { %8975 = vst [vmem:[#allocation19_spill] sm:$0xff] %v6147_v14  ;;  %2861 = vmatpush.bf16.msra.mxu1 %v2844_v36  ;;  %v6177_v14 = vmul.f32 %v5225_v3, %v5894_v44  ;;  %v6179_v52 = vadd.f32 %v1253_v48, %v1084_v2  ;;  %v1988_v28 = vrot.slane %v1888_v16, 2  ;;  %v1853_v58 = vadd.f32 %v1749_v61, %v1612_v38  ;;  %v8984_v2 = vld [vmem:[#allocation49_spill] sm:$0xff] }
 0x17f   : > { %8976 = vst [vmem:[#allocation20_spill] sm:$0xff] %v6160_v12  ;;  %v1751_v47 = vsel %vm1188_vm5, %v1748_v8, %v8979_v62  ;;  %v6184_v36 = vsel %vm1430_vm6, %v8982_v23, %v1494_v43  ;;  %v1989_v39 = vrot.slane %v1889_v50, 2  ;;  %v2127_v37 = vmul.f32 %v5237_v40, %v8946_v11  ;;  %v8985_v16 = vld [vmem:[#allocation45_spill] sm:$0xff] }
 0x180   : > { %8977 = vst [vmem:[#allocation39_spill] sm:$0xff] %v6166_v34  ;;  %v1854_v18 = vadd.f32 %v1751_v47, %v1613_v5  ;;  %v2128_v62 = vmul.f32 %v5237_v40, %v8947_v45  ;;  %v2194_v8 = vmul.f32 %v5225_v3, %v8946_v11  ;;  %v2195_v41 = vmul.f32 %v5225_v3, %v8947_v45 }
 0x181   : > { %8980 = vst [vmem:[#allocation23_spill] sm:$0xff] %v6177_v14  ;;  %v2297_v48 = vrot.slane %v8984_v2, 1  ;;  %v1990_v23 = vsel %vm1430_vm6, %v1988_v28, %v1989_v39  ;;  %v8986_v38 = vrot.slane %v8985_v16, 2  ;;  %v2435_v50 = vmul.f32 %v5257_v22, %v8946_v11  ;;  %v8988_v28 = vld [vmem:[#allocation28_spill] sm:$0xff] }
 0x182   : > { %8981 = vst [vmem:[#allocation16_spill] sm:$0xff] %v6179_v52  ;;  %v2436_v47 = vmul.f32 %v5257_v22, %v8947_v45  ;;  %v2094_v43 = vadd.f32 %v1990_v23, %v1853_v58  ;;  %v2294_v44 = vrot.slane %v2194_v8, 1  ;;  %v2295_v29 = vrot.slane %v2195_v41, 1  ;;  %v8992_v41 = vld [vmem:[#allocation25_spill] sm:$0xff] }
 0x183   : > { %8983 = vst [vmem:[#allocation46_spill] sm:$0xff] %v6184_v36  ;;  %v1992_v5 = vsel %vm1430_vm6, %v1989_v39, %v8986_v38  ;;  %v2437_v26 = vmul.f32 %v5257_v22, %v8987_v9  ;;  %v2535_v2 = vrot.slane %v2435_v50, 2  ;;  %v1303_v16 = vadd.f32 %v8989_v32, %v8988_v28 }
 0x184   : > { %v2095_v61 = vadd.f32 %v1992_v5, %v1854_v18  ;;  %v2536_v51 = vrot.slane %v2436_v47, 2  ;;  %v2159_v27 = vadd.f32 %v2127_v37, %v2094_v43  ;;  %v2296_v38 = vsel %vm1188_vm5, %v2294_v44, %v2295_v29  ;;  %v8990_v18 = vld [vmem:[#allocation2_spill] sm:$0xff] }
 0x185   : > { %v2298_v11 = vsel %vm1188_vm5, %v2295_v29, %v2297_v48  ;;  %v2538_v58 = vrot.slane %v2437_v26, 2  ;;  %v8991_v8 = vrot.slane %v8990_v18, 2  ;;  %v8993_v23 = vrot.slane %v8992_v41, 2 }
 0x186   : > { %v2160_v39 = vadd.f32 %v2128_v62, %v2095_v61  ;;  %v2537_v45 = vsel %vm1430_vm6, %v2535_v2, %v2536_v51  ;;  %v1578_v5 = vmul.f32 %v5198_v6, %v8958_v57  ;;  %v2400_v50 = vadd.f32 %v2296_v38, %v2159_v27  ;;  %v8994_v62 = vld [vmem:[#allocation7_spill] sm:$0xff]  ;;  %v8995_v27 = vld [vmem:[#allocation6_spill] sm:$0xff] }
 0x187   : > { %v1438_v9 = vsel %vm1430_vm6, %v8993_v23, %v8991_v8  ;;  %v1579_v44 = vmul.f32 %v5198_v6, %v8994_v62  ;;  %v2539_v29 = vsel %vm1430_vm6, %v2536_v51, %v2538_v58  ;;  %v1644_v26 = vmul.f32 %v5001_v56, %v8958_v57  ;;  %v8996_v23 = vld [vmem:[#allocation34_spill] sm:$0xff] }
 0x188   : > { %v2401_v32 = vadd.f32 %v2298_v11, %v2160_v39  ;;  %v1545_v37 = vadd.f32 %v1438_v9, %v1303_v16  ;;  %v1645_v48 = vmul.f32 %v5001_v56, %v8994_v62  ;;  %v1885_v47 = vmul.f32 %v5219_v4, %v8958_v57  ;;  %v695_v11 = vpop.f32.mrf.mxu0 }
 0x189   : > { %v2641_v43 = vadd.f32 %v2537_v45, %v2400_v50  ;;  %v1611_v28 = vadd.f32 %v1579_v44, %v8995_v27  ;;  %v1742_v16 = vrot.slane %v1644_v26, 1  ;;  %v1886_v38 = vmul.f32 %v5219_v4, %v8994_v62 }
 0x18a   : > { %v2642_v61 = vadd.f32 %v2539_v29, %v2401_v32  ;;  %v1610_v2 = vadd.f32 %v1578_v5, %v1545_v37  ;;  %v1743_v39 = vrot.slane %v1645_v48, 1  ;;  %v1983_v51 = vrot.slane %v1885_v47, 2  ;;  %v8998_v47 = vld [vmem:[#allocation37_spill] sm:$0xff] }
 0x18b   : > { %v2677_v58 = vmul.f32 %v5775_v63, %v2641_v43  ;;  %v2125_v8 = vmul.f32 %v5237_v40, %v8938_v59  ;;  %v2126_v45 = vmul.f32 %v5237_v40, %v8968_v25  ;;  %v8997_v9 = vrot.slane %v8996_v23, 1 }
 0x18c   : > { %v2678_v18 = vmul.f32 %v5775_v63, %v2642_v61  ;;  %v1744_v41 = vsel %vm1188_vm5, %v1742_v16, %v1743_v39  ;;  %v1984_v50 = vrot.slane %v1886_v38, 2  ;;  %v2191_v32 = vmul.f32 %v5225_v3, %v8938_v59 }
 0x18d   : > { %v1746_v5 = vsel %vm1188_vm5, %v1743_v39, %v8997_v9  ;;  %v2713_v37 = vadd.f32 %v5816_v24, %v2677_v58  ;;  %v1851_v29 = vadd.f32 %v1744_v41, %v1610_v2  ;;  %v8999_v43 = vrot.slane %v8998_v47, 2 }
 0x18e   : > { %v2714_v44 = vadd.f32 %v5816_v24, %v2678_v18  ;;  %v1852_v26 = vadd.f32 %v1746_v5, %v1611_v28  ;;  %v1985_v48 = vsel %vm1430_vm6, %v1983_v51, %v1984_v50  ;;  %v2192_v27 = vmul.f32 %v5225_v3, %v8968_v25  ;;  %v9000_v28 = vld [vmem:[#allocation47_spill] sm:$0xff] }
 0x18f   : > { %v1987_v61 = vsel %vm1430_vm6, %v1984_v50, %v8999_v43  ;;  %v2289_v16 = vrot.slane %v2191_v32, 1  ;;  %vm2745_vm15 = vcmp.ge.f32.partialorder %v2713_v37, 0.0  ;;  %v2781_v39 = vmul.f32 %v5827_v20, %v2713_v37 }
 0x190   : > { %vm2746_vm0 = vcmp.ge.f32.partialorder %v2714_v44, 0.0  ;;  %v2782_v38 = vmul.f32 %v5827_v20, %v2714_v44  ;;  %v2092_v58 = vadd.f32 %v1985_v48, %v1851_v29  ;;  %v2093_v18 = vadd.f32 %v1987_v61, %v1852_v26  ;;  %v9003_v48 = vld [vmem:[#allocation14_spill] sm:$0xff] }
 0x191   : > { %v2290_v2 = vrot.slane %v2192_v27, 1  ;;  %v2292_v41 = vrot.slane %v9000_v28, 1  ;;  %v6252_v51 = vsel %vm2745_vm15, %v2713_v37, %v2781_v39  ;;  %v2432_v9 = vmul.f32 %v5257_v22, %v8938_v59  ;;  %v9005_v28 = vld [vmem:[#allocation3_spill] sm:$0xff] }
 0x192   : > { %9001 = vst [vmem:[#allocation48_spill] sm:$0xff] %v6252_v51  ;;  %v6254_v23 = vsel %vm2746_vm0, %v2714_v44, %v2782_v38  ;;  %v2433_v5 = vmul.f32 %v5257_v22, %v8968_v25  ;;  %v2157_v32 = vadd.f32 %v2125_v8, %v2092_v58  ;;  %v2158_v47 = vadd.f32 %v2126_v45, %v2093_v18  ;;  %v9004_v25 = vld [vmem:[#allocation17_spill] sm:$0xff]  ;;  %v697_v8 = vpop.f32.mrf.mxu0 }
 0x193   : > { %9002 = vst [vmem:[#allocation52_spill] sm:$0xff] %v6254_v23  ;;  %v2843_v50 = vpack.c.bf16 %v6254_v23, %v6252_v51  ;;  %v2291_v29 = vsel %vm1188_vm5, %v2289_v16, %v2290_v2  ;;  %v2293_v26 = vsel %vm1188_vm5, %v2290_v2, %v2292_v41  ;;  %v2434_v37 = vmul.f32 %v5257_v22, %v9003_v48  ;;  %v9010_v48 = vld [vmem:[#allocation30_spill] sm:$0xff]  ;;  %v9014_v51 = vld [vmem:[#allocation21_spill] sm:$0xff] }
 0x194   : > { %v2530_v44 = vrot.slane %v2432_v9, 2  ;;  %v2531_v43 = vrot.slane %v2433_v5, 2  ;;  %v2398_v61 = vadd.f32 %v2291_v29, %v2157_v32  ;;  %v2399_v59 = vadd.f32 %v2293_v26, %v2158_v47  ;;  %v9007_v9 = vld [vmem:[#allocation26_spill] sm:$0xff]  ;;  %v9009_v29 = vld [vmem:[#allocation32_spill] sm:$0xff] }
 0x195   : > { %2862 = vmatpush.bf16.msra.mxu1 %v2843_v50  ;;  %v743_v27 = vmul.f32 %v5769_v1, %v695_v11  ;;  %v6269_v39 = vsel %vm920_vm3, %v9004_v25, 0.0  ;;  %v2533_v16 = vrot.slane %v2434_v37, 2  ;;  %v1060_v38 = vmul.f32 %v4998_v55, %v9004_v25 }
 0x196   : > { %v2532_v45 = vsel %vm1430_vm6, %v2530_v44, %v2531_v43  ;;  %v1094_v58 = vmul.f32 %v4986_v46, %v6269_v39  ;;  %v1336_v11 = vmul.f32 %v4995_v53, %v6269_v39  ;;  %v9006_v41 = vrot.slane %v9005_v28, 1  ;;  %v9012_v44 = vld [vmem:[#allocation29_spill] sm:$0xff] }
 0x197   : > { %v2639_v18 = vadd.f32 %v2532_v45, %v2398_v61  ;;  %v779_v2 = vadd.f32 %v5740_v21, %v743_v27  ;;  %v9008_v5 = vrot.slane %v9007_v9, 1  ;;  %v2534_v32 = vsel %vm1430_vm6, %v2531_v43, %v2533_v16 }
 0x198   : > { %v1192_v47 = vrot.slane %v1094_v58, 1  ;;  %v9011_v37 = vrot.slane %v9010_v48, 2  ;;  %v9013_v61 = vrot.slane %v9012_v44, 2  ;;  %v2640_v28 = vadd.f32 %v2534_v32, %v2399_v59  ;;  %v9016_v58 = vld [vmem:[#allocation31_spill] sm:$0xff]  ;;  %v9021_v32 = vld [vmem:[#allocation22_spill] sm:$0xff] }
 0x199   : > { %v1739_v50 = vsel %vm1188_vm5, %v9008_v5, %v9006_v41  ;;  %v2675_v9 = vmul.f32 %v5775_v63, %v2639_v18  ;;  %v9015_v41 = vrot.slane %v9014_v51, 1  ;;  %v1434_v16 = vrot.slane %v1336_v11, 2 }
 0x19a   : > { %v1849_v26 = vadd.f32 %v1739_v50, %v9009_v29  ;;  %v1980_v27 = vsel %vm1430_vm6, %v9013_v61, %v9011_v37  ;;  %v9017_v5 = vrot.slane %v9016_v58, 2  ;;  %v9018_v50 = vmov %v9011_v37 }
 0x19b   : > { %v1193_v43 = vsel %vm1188_vm5, %v9015_v41, %v1192_v47  ;;  %v9019_v37 = vrot.slane %v5994_v15, 7  ;;  %v2676_v59 = vmul.f32 %v5775_v63, %v2640_v28  ;;  %v2711_v18 = vadd.f32 %v5816_v24, %v2675_v9  ;;  %v700_v28 = vpop.f32.mrf.mxu0 }
 0x19c   : > { %v1982_v29 = vsel %vm1430_vm6, %v9018_v50, %v9017_v5  ;;  %v2090_v44 = vadd.f32 %v1980_v27, %v1849_v26  ;;  %v1302_v51 = vadd.f32 %v1193_v43, %v1060_v38  ;;  %vm811_vm2 = vcmp.ge.f32.partialorder %v779_v2, 0.0 }
 0x19d   : > { %v6305_v61 = vsel %vm920_vm3, 0.0, %v9019_v37  ;;  %v847_v11 = vmul.f32 %v5748_v13, %v779_v2  ;;  %v9022_v47 = vrot.slane %v9021_v32, 2  ;;  %v2123_v26 = vmul.f32 %v5237_v40, %v8958_v57 }
 0x19e   : > { %9020 = vst [vmem:[#allocation43_spill] sm:$0xff] %v6305_v61  ;;  %v2712_v15 = vadd.f32 %v5816_v24, %v2676_v59  ;;  %vm2743_vm4 = vcmp.ge.f32.partialorder %v2711_v18, 0.0  ;;  %v2779_v27 = vmul.f32 %v5827_v20, %v2711_v18  ;;  %v2188_v43 = vmul.f32 %v5225_v3, %v8958_v57  ;;  %v9025_v59 = vld [vmem:[#allocation36_spill] sm:$0xff] }
 0x19f   : > { %v1435_v48 = vsel %vm1430_vm6, %v9022_v47, %v1434_v16  ;;  %v2155_v38 = vadd.f32 %v2123_v26, %v2090_v44  ;;  %v2189_v58 = vmul.f32 %v5225_v3, %v8994_v62  ;;  %v6324_v16 = vmul.f32 %v4986_v46, %v6305_v61  ;;  %v9027_v26 = vld [vmem:[#allocation40_spill] sm:$0xff] }
 0x1a0   : > { %v1544_v41 = vadd.f32 %v1435_v48, %v1302_v51  ;;  %vm2744_vm7 = vcmp.ge.f32.partialorder %v2712_v15, 0.0  ;;  %v2780_v5 = vmul.f32 %v5827_v20, %v2712_v15  ;;  %v6327_v50 = vsel %vm2743_vm4, %v2711_v18, %v2779_v27  ;;  %v9028_v27 = vld [vmem:[#allocation5_spill] sm:$0xff] }
 0x1a1   : > { %9023 = vst [vmem:[#allocation27_spill] sm:$0xff] %v6324_v16  ;;  %v879_v37 = vsel %vm811_vm2, %v779_v2, %v847_v11  ;;  %v2284_v44 = vrot.slane %v2188_v43, 1  ;;  %v2285_v32 = vrot.slane %v2189_v58, 1  ;;  %v2124_v48 = vmul.f32 %v5237_v40, %v8994_v62  ;;  %v9029_v43 = vld [vmem:[#allocation8_spill] sm:$0xff] }
 0x1a2   : > { %9024 = vst [vmem:[#allocation9_spill] sm:$0xff] %v6327_v50  ;;  %v1609_v51 = vadd.f32 %v9025_v59, %v1544_v41  ;;  %v6331_v47 = vsel %vm2744_vm7, %v2712_v15, %v2780_v5  ;;  %v2287_v9 = vrot.slane %v9027_v26, 1  ;;  %v2429_v23 = vmul.f32 %v5257_v22, %v8958_v57 }
 0x1a3   : > { %9026 = vst [vmem:[#allocation33_spill] sm:$0xff] %v6331_v47  ;;  %v2842_v18 = vpack.c.bf16 %v6331_v47, %v6327_v50  ;;  %v2286_v2 = vsel %vm1188_vm5, %v2284_v44, %v2285_v32  ;;  %v2430_v11 = vmul.f32 %v5257_v22, %v8994_v62  ;;  %v2431_v58 = vmul.f32 %v5257_v22, %v9029_v43  ;;  %v702_v44 = vpop.f32.mrf.mxu0 }
 0x1a4   : > { %v1850_v45 = vadd.f32 %v9028_v27, %v1609_v51  ;;  %v2288_v15 = vsel %vm1188_vm5, %v2285_v32, %v2287_v9  ;;  %v2396_v41 = vadd.f32 %v2286_v2, %v2155_v38  ;;  %v2525_v5 = vrot.slane %v2429_v23, 2 }
 0x1a5   : > { %2863 = vmatpush.bf16.msra.mxu1 %v2842_v18  ;;  %v2526_v57 = vrot.slane %v2430_v11, 2  ;;  %v744_v26 = vmul.f32 %v5769_v1, %v697_v8  ;;  %v745_v47 = vmul.f32 %v5769_v1, %v700_v28  ;;  %v6351_v51 = vmul.f32 %v4995_v53, %v6305_v61 }
 0x1a6   : > { %v2091_v59 = vadd.f32 %v1982_v29, %v1850_v45  ;;  %v6355_v62 = vmul.f32 %v5001_v56, %v6129_v42  ;;  %v959_v9 = vrot.slane %v879_v37, 7  ;;  %v2528_v38 = vrot.slane %v2431_v58, 2 }
 0x1a7   : > { %9030 = vst [vmem:[#allocation38_spill] sm:$0xff] %v6351_v51  ;;  %v2527_v23 = vsel %vm1430_vm6, %v2525_v5, %v2526_v57  ;;  %v780_v45 = vadd.f32 %v5740_v21, %v744_v26  ;;  %v781_v8 = vadd.f32 %v5740_v21, %v745_v47  ;;  %v6362_v29 = vmul.f32 %v5219_v4, %v6129_v42 }
 0x1a8   : > { %9031 = vst [vmem:[#allocation11_spill] sm:$0xff] %v6355_v62  ;;  %v2156_v32 = vadd.f32 %v2124_v48, %v2091_v59  ;;  %v2529_v28 = vsel %vm1430_vm6, %v2526_v57, %v2528_v38  ;;  %v2637_v18 = vadd.f32 %v2527_v23, %v2396_v41  ;;  %v746_v27 = vmul.f32 %v5769_v1, %v702_v44 }
 0x1a9   : > { %9032 = vst [vmem:[#allocation12_spill] sm:$0xff] %v6362_v29  ;;  %vm812_vm8 = vcmp.ge.f32.partialorder %v780_v45, 0.0  ;;  %v848_v37 = vmul.f32 %v5748_v13, %v780_v45  ;;  %vm813_vm9 = vcmp.ge.f32.partialorder %v781_v8, 0.0  ;;  %v6369_v11 = vsel %vm920_vm3, 0.0, %v959_v9 }
 0x1aa   : > { %v2397_v2 = vadd.f32 %v2288_v15, %v2156_v32  ;;  %v2673_v47 = vmul.f32 %v5775_v63, %v2637_v18  ;;  %v849_v43 = vmul.f32 %v5748_v13, %v781_v8  ;;  %v782_v1 = vadd.f32 %v5740_v21, %v746_v27  ;;  %v6403_v27 = vld [vmem:[%s8624_s4] ss:$0 sm:$0xff] }
 0x1ab   : > { %v880_v41 = vsel %vm812_vm8, %v780_v45, %v848_v37  ;;  %v6377_v15 = vmul.f32 %v5225_v3, %v6129_v42  ;;  %v6383_v44 = vmul.f32 %v4986_v46, %v6369_v11  ;;  %v6440_v38 = vmul.f32 %v4995_v53, %v6369_v11 }
 0x1ac   : > { %v2638_v5 = vadd.f32 %v2529_v28, %v2397_v2  ;;  %v2709_v59 = vadd.f32 %v5816_v24, %v2673_v47  ;;  %v960_v57 = vrot.slane %v880_v41, 7  ;;  %v881_v26 = vsel %vm813_vm9, %v781_v8, %v849_v43  ;;  %v705_v28 = vpop.f32.mrf.mxu0 }
 0x1ad   : > { %9033 = vst [vmem:[#allocation10_spill] sm:$0xff] %v6377_v15  ;;  %v962_v32 = vrot.slane %v881_v26, 7  ;;  %vm814_vm12 = vcmp.ge.f32.partialorder %v782_v1, 0.0  ;;  %v6534_v10 = vmul.f32 %v5237_v40, %v9004_v25  ;;  %v2234_v31 = vmul.f32 %v5225_v3, %v9004_v25 }
 0x1ae   : > { %v2674_v13 = vmul.f32 %v5775_v63, %v2638_v5  ;;  %vm2741_vm10 = vcmp.ge.f32.partialorder %v2709_v59, 0.0  ;;  %v2777_v21 = vmul.f32 %v5827_v20, %v2709_v59  ;;  %v6388_v23 = vsel %vm920_vm3, %v959_v9, %v960_v57 }
 0x1af   : > { %9034 = vst [vmem:[#allocation13_spill] sm:$0xff] %v6388_v23  ;;  %v6391_v45 = vsel %vm920_vm3, %v960_v57, 0.0  ;;  %v6396_v18 = vmul.f32 %v4986_v46, %v6388_v23  ;;  %v850_v9 = vmul.f32 %v6403_v27, %v782_v1  ;;  %v6410_v37 = vmul.f32 %v4995_v53, %v6388_v23 }
 0x1b0   : > { %9035 = vst [vmem:[#allocation42_spill] sm:$0xff] %v6391_v45  ;;  %v2710_v8 = vadd.f32 %v5816_v24, %v2674_v13  ;;  %v1133_v63 = vmul.f32 %v4986_v46, %v6391_v45  ;;  %v6406_v2 = vsel %vm2741_vm10, %v2709_v59, %v2777_v21  ;;  %v1375_v24 = vmul.f32 %v4995_v53, %v6391_v45 }
 0x1b1   : > { %9036 = vst [vmem:[#allocation49_spill] sm:$0xff] %v6406_v2  ;;  %v6416_v47 = vmul.f32 %v5001_v56, %v6391_v45  ;;  %v8752_v5 = vrot.slane %v6396_v18, 1  ;;  %v8760_v59 = vrot.slane %v6410_v37, 2  ;;  %v6423_v26 = vmul.f32 %v5219_v4, %v6391_v45 }
 0x1b2   : > { %vm2742_vm11 = vcmp.ge.f32.partialorder %v2710_v8, 0.0  ;;  %v2778_v43 = vmul.f32 %v5827_v20, %v2710_v8  ;;  %v1257_v41 = vrot.slane %v1133_v63, 1  ;;  %v1499_v57 = vrot.slane %v1375_v24, 2 }
 0x1b3   : > { %9037 = vst [vmem:[#allocation45_spill] sm:$0xff] %v6416_v47  ;;  %v6432_v20 = vmul.f32 %v5225_v3, %v6391_v45  ;;  %v6435_v63 = vsel %vm920_vm3, 0.0, %v962_v32  ;;  %v2474_v60 = vmul.f32 %v5257_v22, %v9043_v17 }
 0x1b4   : > { %9038 = vst [vmem:[#allocation24_spill] sm:$0xff] %v6423_v26  ;;  %v6425_v13 = vsel %vm2742_vm11, %v2710_v8, %v2778_v43  ;;  %v1258_v21 = vsel %vm1188_vm5, %v8752_v5, %v1257_v41  ;;  %v1086_v43 = vmul.f32 %v4998_v55, %v6388_v23  ;;  %v6450_v48 = vmul.f32 %v4986_v46, %v6435_v63  ;;  %v6462_v41 = vld [vmem:[%s8622_s2] ss:$0 sm:$0xff] }
 0x1b5   : > { %9039 = vst [vmem:[#allocation28_spill] sm:$0xff] %v6425_v13  ;;  %v2841_v8 = vpack.c.bf16 %v6425_v13, %v6406_v2  ;;  %v882_v5 = vsel %vm814_vm12, %v782_v1, %v850_v9  ;;  %v6457_v50 = vsel %vm1430_vm6, %v8760_v59, %v1499_v57  ;;  %v747_v58 = vmul.f32 %v6462_v41, %v705_v28  ;;  %v707_v2 = vpop.f32.mrf.mxu0  ;;  %v6481_v28 = vld [vmem:[%s8623_s3] ss:$0 sm:$0xff] }
 0x1b6   : > { %9040 = vst [vmem:[#allocation4_spill] sm:$0xff] %v6432_v20  ;;  %v6452_v24 = vadd.f32 %v1258_v21, %v1086_v43  ;;  %v963_v13 = vrot.slane %v882_v5, 7  ;;  %v6470_v21 = vmul.f32 %v4995_v53, %v6435_v63  ;;  %v748_v43 = vmul.f32 %v6462_v41, %v707_v2 }
 0x1b7   : > { %2864 = vmatpush.bf16.msra.mxu1 %v2841_v8  ;;  %v783_v8 = vadd.f32 %v6481_v28, %v747_v58 }
 0x1b8   : > { %v6473_v5 = vsel %vm920_vm3, %v962_v32, %v963_v13  ;;  %v6476_v57 = vsel %vm920_vm3, %v963_v13, 0.0  ;;  %v784_v62 = vadd.f32 %v6481_v28, %v748_v43 }
 0x1b9   : > { %9041 = vst [vmem:[#allocation2_spill] sm:$0xff] %v6476_v57  ;;  %v1088_v1 = vmul.f32 %v4998_v55, %v6473_v5  ;;  %v6489_v14 = vmul.f32 %v4986_v46, %v6473_v5  ;;  %v1136_v32 = vmul.f32 %v4986_v46, %v6476_v57  ;;  %v6495_v13 = vmul.f32 %v4995_v53, %v6473_v5 }
 0x1ba   : > { %v1378_v59 = vmul.f32 %v4995_v53, %v6476_v57  ;;  %v6501_v58 = vmul.f32 %v5001_v56, %v6476_v57  ;;  %v6505_v2 = vmul.f32 %v5219_v4, %v6476_v57  ;;  %v6509_v9 = vmul.f32 %v5225_v3, %v6476_v57 }
 0x1bb   : > { %v8773_v15 = vrot.slane %v6489_v14, 1  ;;  %v1262_v42 = vrot.slane %v1136_v32, 1  ;;  %vm815_vm13 = vcmp.ge.f32.partialorder %v783_v8, 0.0  ;;  %v851_v29 = vmul.f32 %v6403_v27, %v783_v8 }
 0x1bc   : > { %9042 = vst [vmem:[#allocation25_spill] sm:$0xff] %v6509_v9  ;;  %v1504_v12 = vrot.slane %v1378_v59, 2  ;;  %v6523_v32 = vmul.f32 %v5237_v40, %v9043_v17  ;;  %v9044_v59 = vrot.slane %v6495_v13, 2  ;;  %vm816_vm14 = vcmp.ge.f32.partialorder %v784_v62, 0.0 }
 0x1bd   : > { %v1263_v20 = vsel %vm1188_vm5, %v8773_v15, %v1262_v42  ;;  %v710_v45 = vpop.f32.mrf.mxu0  ;;  %v2233_v42 = vmul.f32 %v5225_v3, %v9043_v17  ;;  %v883_v43 = vsel %vm815_vm13, %v783_v8, %v851_v29  ;;  %v852_v15 = vmul.f32 %v6403_v27, %v784_v62 }
 0x1be   : > { %v6525_v34 = vadd.f32 %v1263_v20, %v1088_v1  ;;  %v6530_v49 = vsel %vm1430_vm6, %v9044_v59, %v1504_v12  ;;  %v749_v20 = vmul.f32 %v6462_v41, %v710_v45  ;;  %v965_v1 = vrot.slane %v883_v43, 7 }
 0x1bf   : > { %v2235_v12 = vmul.f32 %v5225_v3, %v6269_v39  ;;  %v2359_v59 = vrot.slane %v2233_v42, 1  ;;  %v884_v54 = vsel %vm816_vm14, %v784_v62, %v852_v15  ;;  %v6549_v29 = vmul.f32 %v5257_v22, %v9004_v25 }
 0x1c0   : > { %v785_v7 = vadd.f32 %v6481_v28, %v749_v20  ;;  %v6552_v45 = vsel %vm920_vm3, 0.0, %v965_v1  ;;  %v966_v8 = vrot.slane %v884_v54, 7  ;;  %v2360_v43 = vrot.slane %v2234_v31, 1 }
 0x1c1   : > { %v2362_v9 = vrot.slane %v2235_v12, 1  ;;  %v1137_v0 = vmul.f32 %v4986_v46, %v6552_v45  ;;  %v1089_v15 = vmul.f32 %v4998_v55, %v6552_v45  ;;  %v1379_v54 = vmul.f32 %v4995_v53, %v6552_v45 }
 0x1c2   : > { %vm817_vm15 = vcmp.ge.f32.partialorder %v785_v7, 0.0  ;;  %v853_v62 = vmul.f32 %v6403_v27, %v785_v7  ;;  %v6560_v17 = vsel %vm920_vm3, %v965_v1, %v966_v8  ;;  %v6563_v25 = vsel %vm920_vm3, %v966_v8, 0.0 }
 0x1c3   : > { %9045 = vst [vmem:[#allocation7_spill] sm:$0xff] %v6563_v25  ;;  %v6568_v31 = vsel %vm1188_vm5, %v2359_v59, %v2360_v43  ;;  %v1090_v42 = vmul.f32 %v4998_v55, %v6560_v17  ;;  %v1138_v20 = vmul.f32 %v4986_v46, %v6560_v17  ;;  %v1139_v12 = vmul.f32 %v4986_v46, %v6563_v25 }
 0x1c4   : > { %v1380_v1 = vmul.f32 %v4995_v53, %v6560_v17  ;;  %v1381_v8 = vmul.f32 %v4995_v53, %v6563_v25  ;;  %v6582_v33 = vmul.f32 %v5001_v56, %v6563_v25  ;;  %v6586_v59 = vmul.f32 %v5219_v4, %v6563_v25 }
 0x1c5   : > { %v6590_v30 = vmul.f32 %v5225_v3, %v6563_v25  ;;  %v1265_v57 = vrot.slane %v1138_v20, 1  ;;  %v1267_v46 = vrot.slane %v1139_v12, 1  ;;  %v885_v47 = vsel %vm817_vm15, %v785_v7, %v853_v62  ;;  %v712_v23 = vpop.f32.mrf.mxu0 }
 0x1c6   : > { %v1507_v26 = vrot.slane %v1380_v1, 2  ;;  %v1509_v19 = vrot.slane %v1381_v8, 2  ;;  %v968_v16 = vrot.slane %v885_v47, 7  ;;  %v1264_v35 = vrot.slane %v1137_v0, 1 }
 0x1c7   : > { %9046 = vst [vmem:[#allocation6_spill] sm:$0xff] %v6590_v30  ;;  %v1268_v51 = vsel %vm1188_vm5, %v1265_v57, %v1267_v46  ;;  %v1506_v61 = vrot.slane %v1379_v54, 2  ;;  %v750_v12 = vmul.f32 %v6462_v41, %v712_v23  ;;  %v6600_v7 = vsel %vm1188_vm5, %v2360_v43, %v2362_v9 }
 0x1c8   : > { %v1332_v25 = vadd.f32 %v1268_v51, %v1090_v42  ;;  %v1510_v20 = vsel %vm1430_vm6, %v1507_v26, %v1509_v19  ;;  %v6603_v62 = vsel %vm920_vm3, 0.0, %v968_v16  ;;  %v1266_v1 = vsel %vm1188_vm5, %v1264_v35, %v1265_v57 }
 0x1c9   : > { %v1508_v8 = vsel %vm1430_vm6, %v1506_v61, %v1507_v26  ;;  %v2476_v47 = vmul.f32 %v5257_v22, %v6269_v39  ;;  %v1331_v0 = vadd.f32 %v1266_v1, %v1089_v15  ;;  %v1606_v51 = vmul.f32 %v5198_v6, %v6603_v62 }
 0x1ca   : > { %v1686_v19 = vmul.f32 %v5001_v56, %v6603_v62  ;;  %v1927_v23 = vmul.f32 %v5219_v4, %v6603_v62  ;;  %v6617_v41 = vmul.f32 %v5225_v3, %v6603_v62  ;;  %v786_v35 = vadd.f32 %v6481_v28, %v750_v12 }
 0x1cb   : > { %v1574_v61 = vadd.f32 %v1510_v20, %v1332_v25  ;;  %v2600_v26 = vrot.slane %v2474_v60, 2  ;;  %v1573_v9 = vadd.f32 %v1508_v8, %v1331_v0  ;;  %v2601_v43 = vrot.slane %v6549_v29, 2 }
 0x1cc   : > { %v1812_v39 = vrot.slane %v1686_v19, 1  ;;  %v2053_v57 = vrot.slane %v1927_v23, 2  ;;  %vm818_vm0 = vcmp.ge.f32.partialorder %v786_v35, 0.0  ;;  %v854_v54 = vmul.f32 %v6403_v27, %v786_v35 }
 0x1cd   : > { %v2603_v42 = vrot.slane %v2476_v47, 2  ;;  %v1638_v46 = vadd.f32 %v1606_v51, %v1573_v9  ;;  %v6624_v1 = vsel %vm1430_vm6, %v2600_v26, %v2601_v43  ;;  %v1087_v28 = vmul.f32 %v4998_v55, %v6435_v63 }
 0x1ce   : > { %v9047_v60 = vrot.slane %v6489_v14, 1  ;;  %v9048_v25 = vrot.slane %v6450_v48, 1  ;;  %v886_v29 = vsel %vm818_vm0, %v786_v35, %v854_v54  ;;  %v1501_v27 = vrot.slane %v6470_v21, 2 }
 0x1cf   : > { %v6634_v12 = vsel %vm1430_vm6, %v2601_v43, %v2603_v42  ;;  %v1572_v8 = vadd.f32 %v6530_v49, %v6525_v34  ;;  %v969_v47 = vrot.slane %v886_v29, 7  ;;  %v1604_v51 = vmul.f32 %v5198_v6, %v6552_v45 }
 0x1d0   : > { %v1261_v20 = vsel %vm1188_vm5, %v9048_v25, %v9047_v60  ;;  %v1605_v14 = vmul.f32 %v5198_v6, %v6560_v17  ;;  %v9049_v48 = vrot.slane %v6495_v13, 2  ;;  %v1683_v23 = vmul.f32 %v5001_v56, %v6552_v45 }
 0x1d1   : > { %v1329_v0 = vadd.f32 %v1261_v20, %v1087_v28  ;;  %v1684_v21 = vmul.f32 %v5001_v56, %v6560_v17  ;;  %v1924_v49 = vmul.f32 %v5219_v4, %v6552_v45  ;;  %v970_v34 = vsel %vm920_vm3, %v968_v16, %v969_v47 }
 0x1d2   : > { %v1503_v19 = vsel %vm1430_vm6, %v1501_v27, %v9049_v48  ;;  %v1054_v35 = vsel %vm920_vm3, %v969_v47, 0.0  ;;  %v1637_v9 = vadd.f32 %v1605_v14, %v1572_v8  ;;  %v1607_v43 = vmul.f32 %v5198_v6, %v970_v34 }
 0x1d3   : > { %v1571_v26 = vadd.f32 %v1503_v19, %v1329_v0  ;;  %v1687_v13 = vmul.f32 %v5001_v56, %v970_v34  ;;  %v1688_v54 = vmul.f32 %v5001_v56, %v1054_v35  ;;  %v1928_v42 = vmul.f32 %v5219_v4, %v970_v34 }
 0x1d4   : > { %v1929_v28 = vmul.f32 %v5219_v4, %v1054_v35  ;;  %v2232_v60 = vmul.f32 %v5225_v3, %v1054_v35  ;;  %v2473_v25 = vmul.f32 %v5257_v22, %v1054_v35  ;;  %v1639_v47 = vadd.f32 %v1607_v43, %v1574_v61 }
 0x1d5   : > { %v1636_v20 = vadd.f32 %v1604_v51, %v1571_v26  ;;  %v1813_v16 = vrot.slane %v1687_v13, 1  ;;  %v1815_v29 = vrot.slane %v1688_v54, 1  ;;  %v2054_v27 = vrot.slane %v1928_v42, 2 }
 0x1d6   : > { %v2056_v8 = vrot.slane %v1929_v28, 2  ;;  %v2357_v0 = vrot.slane %v2232_v60, 1  ;;  %v2598_v14 = vrot.slane %v2473_v25, 2  ;;  %v1807_v48 = vrot.slane %v1683_v23, 1 }
 0x1d7   : > { %v1816_v19 = vsel %vm1188_vm5, %v1813_v16, %v1815_v29  ;;  %v1814_v52 = vsel %vm1188_vm5, %v1812_v39, %v1813_v16  ;;  %v2055_v15 = vsel %vm1430_vm6, %v2053_v57, %v2054_v27  ;;  %v1808_v36 = vrot.slane %v1684_v21, 1 }
 0x1d8   : > { %v1879_v53 = vadd.f32 %v1814_v52, %v1638_v46  ;;  %v1880_v30 = vadd.f32 %v1816_v19, %v1639_v47  ;;  %v2057_v35 = vsel %vm1430_vm6, %v2054_v27, %v2056_v8  ;;  %v1925_v51 = vmul.f32 %v5219_v4, %v6560_v17 }
 0x1d9   : > { %v1809_v61 = vsel %vm1188_vm5, %v1807_v48, %v1808_v36  ;;  %v9050_v26 = vrot.slane %v6582_v33, 1  ;;  %v2048_v43 = vrot.slane %v1924_v49, 2  ;;  %v2151_v39 = vmul.f32 %v5237_v40, %v6603_v62 }
 0x1da   : > { %v2120_v13 = vadd.f32 %v2055_v15, %v1879_v53  ;;  %v2121_v57 = vadd.f32 %v2057_v35, %v1880_v30  ;;  %v1877_v21 = vadd.f32 %v1809_v61, %v1636_v20  ;;  %v2049_v46 = vrot.slane %v1925_v51, 2 }
 0x1db   : > { %v1811_v23 = vsel %vm1188_vm5, %v1808_v36, %v9050_v26  ;;  %v2152_v54 = vmul.f32 %v5237_v40, %v970_v34  ;;  %v2231_v42 = vmul.f32 %v5225_v3, %v970_v34  ;;  %v2471_v28 = vmul.f32 %v5257_v22, %v6603_v62 }
 0x1dc   : > { %v1878_v52 = vadd.f32 %v1811_v23, %v1637_v9  ;;  %v2185_v33 = vadd.f32 %v6523_v32, %v2120_v13  ;;  %v2186_v36 = vadd.f32 %v6534_v10, %v2121_v57  ;;  %v2472_v49 = vmul.f32 %v5257_v22, %v970_v34 }
 0x1dd   : > { %v1085_v53 = vmul.f32 %v4998_v55, %v6369_v11  ;;  %v2050_v30 = vsel %vm1430_vm6, %v2048_v43, %v2049_v46  ;;  %v9051_v15 = vrot.slane %v6586_v59, 2  ;;  %v2355_v60 = vrot.slane %v2231_v42, 1 }
 0x1de   : > { %v2595_v25 = vrot.slane %v2471_v28, 2  ;;  %v2426_v20 = vadd.f32 %v6568_v31, %v2185_v33  ;;  %v2427_v62 = vadd.f32 %v6600_v7, %v2186_v36  ;;  %v2118_v32 = vadd.f32 %v2050_v30, %v1877_v21 }
 0x1df   : > { %v2052_v9 = vsel %vm1430_vm6, %v2049_v46, %v9051_v15  ;;  %v9052_v10 = vrot.slane %v6617_v41, 1  ;;  %v2358_v29 = vsel %vm1188_vm5, %v2355_v60, %v2357_v0  ;;  %v2596_v27 = vrot.slane %v2472_v49, 2 }
 0x1e0   : > { %v2119_v16 = vadd.f32 %v2052_v9, %v1878_v52  ;;  %v9053_v47 = vrot.slane %v6396_v18, 1  ;;  %v9054_v59 = vrot.slane %v6383_v44, 1  ;;  %v2667_v48 = vadd.f32 %v6624_v1, %v2426_v20  ;;  %v6705_v18 = vld [vmem:[%s8626_s6] ss:$0 sm:$0xff] }
 0x1e1   : > { %v2356_v34 = vsel %vm1188_vm5, %v9052_v10, %v2355_v60  ;;  %v2668_v31 = vadd.f32 %v6634_v12, %v2427_v62  ;;  %v2183_v7 = vadd.f32 %v2151_v39, %v2118_v32  ;;  %v2597_v35 = vsel %vm1430_vm6, %v2595_v25, %v2596_v27  ;;  %v6721_v39 = vld [vmem:[%s8627_s7] ss:$0 sm:$0xff] }
 0x1e2   : > { %v1256_v8 = vsel %vm1188_vm5, %v9054_v59, %v9053_v47  ;;  %v2184_v19 = vadd.f32 %v2152_v54, %v2119_v16  ;;  %v2599_v41 = vsel %vm1430_vm6, %v2596_v27, %v2598_v14  ;;  %v1496_v0 = vrot.slane %v6440_v38, 2  ;;  %v6732_v54 = vld [vmem:[%s8628_s8] ss:$0 sm:$0xff] }
 0x1e3   : > { %v1327_v51 = vadd.f32 %v1256_v8, %v1085_v53  ;;  %v2703_v44 = vmul.f32 %v6705_v18, %v2667_v48  ;;  %v2704_v1 = vmul.f32 %v6705_v18, %v2668_v31  ;;  %v2424_v61 = vadd.f32 %v2356_v34, %v2183_v7 }
 0x1e4   : > { %v2425_v12 = vadd.f32 %v2358_v29, %v2184_v19  ;;  %v9055_v26 = vrot.slane %v6410_v37, 2  ;;  %v1570_v14 = vadd.f32 %v6457_v50, %v6452_v24  ;;  %v1602_v38 = vmul.f32 %v5198_v6, %v6435_v63 }
 0x1e5   : > { %v1603_v43 = vmul.f32 %v5198_v6, %v6473_v5  ;;  %v2739_v13 = vadd.f32 %v6721_v39, %v2703_v44  ;;  %v2740_v37 = vadd.f32 %v6721_v39, %v2704_v1  ;;  %v2665_v57 = vadd.f32 %v2597_v35, %v2424_v61 }
 0x1e6   : > { %v1498_v23 = vsel %vm1430_vm6, %v1496_v0, %v9055_v26  ;;  %v2666_v21 = vadd.f32 %v2599_v41, %v2425_v12  ;;  %v1680_v50 = vmul.f32 %v5001_v56, %v6435_v63  ;;  %v1681_v24 = vmul.f32 %v5001_v56, %v6473_v5 }
 0x1e7   : > { %v1569_v52 = vadd.f32 %v1498_v23, %v1327_v51  ;;  %v1635_v46 = vadd.f32 %v1603_v43, %v1570_v14  ;;  %vm2771_vm3 = vcmp.ge.f32.partialorder %v2739_v13, 0.0  ;;  %vm2772_vm2 = vcmp.ge.f32.partialorder %v2740_v37, 0.0  ;;  %v9062_v43 = vld [vmem:[#allocation7_spill] sm:$0xff] }
 0x1e8   : > { %v2807_v42 = vmul.f32 %v6732_v54, %v2739_v13  ;;  %v2808_v28 = vmul.f32 %v6732_v54, %v2740_v37  ;;  %v2701_v33 = vmul.f32 %v6705_v18, %v2665_v57  ;;  %v2702_v36 = vmul.f32 %v6705_v18, %v2666_v21  ;;  %v9063_v57 = vld [vmem:[#allocation43_spill] sm:$0xff] }
 0x1e9   : > { %v1634_v49 = vadd.f32 %v1602_v38, %v1569_v52  ;;  %v1802_v53 = vrot.slane %v1680_v50, 1  ;;  %v1803_v9 = vrot.slane %v1681_v24, 1  ;;  %v1921_v60 = vmul.f32 %v5219_v4, %v6435_v63 }
 0x1ea   : > { %v6738_v30 = vsel %vm2771_vm3, %v2739_v13, %v2807_v42  ;;  %v6740_v15 = vsel %vm2772_vm2, %v2740_v37, %v2808_v28  ;;  %v2737_v20 = vadd.f32 %v6721_v39, %v2701_v33  ;;  %v2738_v62 = vadd.f32 %v6721_v39, %v2702_v36  ;;  %v9066_v33 = vld [vmem:[#allocation15_spill] sm:$0xff] }
 0x1eb   : > { %9056 = vst [vmem:[#allocation34_spill] sm:$0xff] %v6738_v30  ;;  %v2856_v25 = vpack.c.bf16 %v6740_v15, %v6738_v30  ;;  %v1922_v32 = vmul.f32 %v5219_v4, %v6473_v5  ;;  %v1804_v16 = vsel %vm1188_vm5, %v1802_v53, %v1803_v9  ;;  %v9058_v10 = vrot.slane %v6501_v58, 1 }
 0x1ec   : > { %9057 = vst [vmem:[#allocation37_spill] sm:$0xff] %v6740_v15  ;;  %v2043_v29 = vrot.slane %v1921_v60, 2  ;;  %v2149_v27 = vmul.f32 %v5237_v40, %v6552_v45  ;;  %vm2769_vm4 = vcmp.ge.f32.partialorder %v2737_v20, 0.0  ;;  %vm2770_vm7 = vcmp.ge.f32.partialorder %v2738_v62, 0.0 }
 0x1ed   : > { %v1806_v34 = vsel %vm1188_vm5, %v1803_v9, %v9058_v10  ;;  %2870 = vmatpush.bf16.msra.mxu2 %v2856_v25  ;;  %v2805_v47 = vmul.f32 %v6732_v54, %v2737_v20  ;;  %v2806_v59 = vmul.f32 %v6732_v54, %v2738_v62  ;;  %v1875_v8 = vadd.f32 %v1804_v16, %v1634_v49  ;;  %v9070_v9 = vld [vmem:[#allocation38_spill] sm:$0xff] }
 0x1ee   : > { %v1876_v48 = vadd.f32 %v1806_v34, %v1635_v46  ;;  %v2044_v31 = vrot.slane %v1922_v32, 2  ;;  %v2150_v7 = vmul.f32 %v5237_v40, %v6560_v17  ;;  %v2227_v35 = vmul.f32 %v5225_v3, %v6552_v45  ;;  %v9071_v32 = vld [vmem:[#allocation16_spill] sm:$0xff]  ;;  %v9072_v16 = vld [vmem:[#allocation46_spill] sm:$0xff] }
 0x1ef   : > { %v6760_v58 = vsel %vm2769_vm4, %v2737_v20, %v2805_v47  ;;  %v6762_v19 = vsel %vm2770_vm7, %v2738_v62, %v2806_v59  ;;  %v2228_v41 = vmul.f32 %v5225_v3, %v6560_v17  ;;  %v9061_v44 = vrot.slane %v6505_v2, 2 }
 0x1f0   : > { %9059 = vst [vmem:[#allocation47_spill] sm:$0xff] %v6760_v58  ;;  %v2855_v51 = vpack.c.bf16 %v6762_v19, %v6760_v58  ;;  %v2045_v0 = vsel %vm1430_vm6, %v2043_v29, %v2044_v31  ;;  %v2468_v61 = vmul.f32 %v5257_v22, %v6552_v45  ;;  %v2349_v23 = vrot.slane %v2227_v35, 1  ;;  %v9064_v45 = vld [vmem:[#allocation6_spill] sm:$0xff]  ;;  %v9075_v35 = vld [vmem:[#allocation13_spill] sm:$0xff] }
 0x1f1   : > { %9060 = vst [vmem:[#allocation14_spill] sm:$0xff] %v6762_v19  ;;  %v2047_v1 = vsel %vm1430_vm6, %v2044_v31, %v9061_v44  ;;  %v2116_v12 = vadd.f32 %v2045_v0, %v1875_v8  ;;  %v2350_v14 = vrot.slane %v2228_v41, 1  ;;  %v2469_v38 = vmul.f32 %v5257_v22, %v6560_v17  ;;  %v9068_v17 = vld [vmem:[#allocation27_spill] sm:$0xff] }
 0x1f2   : > { %v2117_v26 = vadd.f32 %v2047_v1, %v1876_v48  ;;  %2871 = vmatpush.bf16.msra.mxu2 %v2855_v51  ;;  %v2470_v13 = vmul.f32 %v5257_v22, %v9062_v43  ;;  %v2590_v37 = vrot.slane %v2468_v61, 2  ;;  %v1083_v2 = vmul.f32 %v4998_v55, %v9063_v57 }
 0x1f3   : > { %v2181_v21 = vadd.f32 %v2149_v27, %v2116_v12  ;;  %v2351_v46 = vsel %vm1188_vm5, %v2349_v23, %v2350_v14  ;;  %v9065_v50 = vrot.slane %v9064_v45, 1  ;;  %v2591_v42 = vrot.slane %v2469_v38, 2  ;;  %v9073_v27 = vld [vmem:[#allocation41_spill] sm:$0xff] }
 0x1f4   : > { %v2182_v52 = vadd.f32 %v2150_v7, %v2117_v26  ;;  %v2593_v28 = vrot.slane %v2470_v13, 2  ;;  %v9067_v36 = vrot.slane %v9066_v33, 1  ;;  %v9069_v49 = vrot.slane %v9068_v17, 1  ;;  %v9076_v45 = vld [vmem:[#allocation45_spill] sm:$0xff] }
 0x1f5   : > { %v2353_v24 = vsel %vm1188_vm5, %v2350_v14, %v9065_v50  ;;  %v1491_v60 = vrot.slane %v9070_v9, 2  ;;  %v2422_v25 = vadd.f32 %v2351_v46, %v2181_v21  ;;  %v1568_v10 = vadd.f32 %v9072_v16, %v9071_v32 }
 0x1f6   : > { %v1251_v53 = vsel %vm1188_vm5, %v9069_v49, %v9067_v36  ;;  %v2423_v20 = vadd.f32 %v2353_v24, %v2182_v52  ;;  %v2592_v34 = vsel %vm1430_vm6, %v2590_v37, %v2591_v42  ;;  %v2594_v29 = vsel %vm1430_vm6, %v2591_v42, %v2593_v28  ;;  %v9078_v28 = vld [vmem:[#allocation24_spill] sm:$0xff] }
 0x1f7   : > { %v1325_v62 = vadd.f32 %v1251_v53, %v1083_v2  ;;  %v9074_v47 = vrot.slane %v9073_v27, 2  ;;  %v1600_v8 = vmul.f32 %v5198_v6, %v6369_v11  ;;  %v2663_v48 = vadd.f32 %v2592_v34, %v2422_v25 }
 0x1f8   : > { %v2664_v31 = vadd.f32 %v2594_v29, %v2423_v20  ;;  %v1601_v41 = vmul.f32 %v5198_v6, %v9075_v35  ;;  %v1677_v51 = vmul.f32 %v5001_v56, %v6369_v11  ;;  %v1678_v0 = vmul.f32 %v5001_v56, %v9075_v35 }
 0x1f9   : > { %v1493_v59 = vsel %vm1430_vm6, %v1491_v60, %v9074_v47  ;;  %v1918_v44 = vmul.f32 %v5219_v4, %v6369_v11  ;;  %v1919_v1 = vmul.f32 %v5219_v4, %v9075_v35  ;;  %v2699_v61 = vmul.f32 %v6705_v18, %v2663_v48 }
 0x1fa   : > { %v1567_v7 = vadd.f32 %v1493_v59, %v1325_v62  ;;  %v2700_v12 = vmul.f32 %v6705_v18, %v2664_v31  ;;  %v1633_v23 = vadd.f32 %v1601_v41, %v1568_v10  ;;  %v1797_v14 = vrot.slane %v1677_v51, 1  ;;  %v9082_v59 = vld [vmem:[#allocation2_spill] sm:$0xff]  ;;  %v9083_v51 = vld [vmem:[#allocation95_spill] sm:$0xff] }
 0x1fb   : > { %v1798_v38 = vrot.slane %v1678_v0, 1  ;;  %v2038_v43 = vrot.slane %v1918_v44, 2  ;;  %v2039_v13 = vrot.slane %v1919_v1, 2  ;;  %v2735_v37 = vadd.f32 %v6721_v39, %v2699_v61  ;;  %v9084_v0 = vld [vmem:[#allocation87_spill] sm:$0xff]  ;;  %v9086_v44 = vld [vmem:[#allocation96_spill] sm:$0xff] }
 0x1fc   : > { %v1632_v26 = vadd.f32 %v1600_v8, %v1567_v7  ;;  %v2736_v2 = vadd.f32 %v6721_v39, %v2700_v12  ;;  %v2147_v21 = vmul.f32 %v5237_v40, %v6435_v63  ;;  %v2148_v52 = vmul.f32 %v5237_v40, %v6473_v5 }
 0x1fd   : > { %v1799_v46 = vsel %vm1188_vm5, %v1797_v14, %v1798_v38  ;;  %v9077_v50 = vrot.slane %v9076_v45, 1  ;;  %v2040_v42 = vsel %vm1430_vm6, %v2038_v43, %v2039_v13  ;;  %v9079_v33 = vrot.slane %v9078_v28, 2  ;;  %v9091_v45 = vld [vmem:[#allocation93_spill] sm:$0xff]  ;;  %v9093_v28 = vld [vmem:[#allocation54_spill] sm:$0xff] }
 0x1fe   : > { %vm2767_vm8 = vcmp.ge.f32.partialorder %v2735_v37, 0.0  ;;  %vm2768_vm9 = vcmp.ge.f32.partialorder %v2736_v2, 0.0  ;;  %v2803_v17 = vmul.f32 %v6732_v54, %v2735_v37  ;;  %v2804_v49 = vmul.f32 %v6732_v54, %v2736_v2 }
 0x1ff   : > { %v1801_v24 = vsel %vm1188_vm5, %v1798_v38, %v9077_v50  ;;  %v2042_v36 = vsel %vm1430_vm6, %v2039_v13, %v9079_v33  ;;  %v1873_v53 = vadd.f32 %v1799_v46, %v1632_v26  ;;  %v2224_v60 = vmul.f32 %v5225_v3, %v6435_v63  ;;  %v9088_v26 = vld [vmem:[#allocation25_spill] sm:$0xff]  ;;  %v9092_v50 = vld [vmem:[#allocation94_spill] sm:$0xff] }
 0x200   : > { %v1874_v9 = vadd.f32 %v1801_v24, %v1633_v23  ;;  %v2225_v25 = vmul.f32 %v5225_v3, %v6473_v5  ;;  %v6833_v20 = vsel %vm2767_vm8, %v2735_v37, %v2803_v17  ;;  %v6835_v62 = vsel %vm2768_vm9, %v2736_v2, %v2804_v49  ;;  %v9094_v49 = vld [vmem:[#allocation88_spill] sm:$0xff] }
 0x201   : > { %9080 = vst [vmem:[#allocation17_spill] sm:$0xff] %v6833_v20  ;;  %v2465_v32 = vmul.f32 %v5257_v22, %v6435_v63  ;;  %v2466_v16 = vmul.f32 %v5257_v22, %v6473_v5  ;;  %v2854_v10 = vpack.c.bf16 %v6835_v62, %v6833_v20  ;;  %v2114_v34 = vadd.f32 %v2040_v42, %v1873_v53 }
 0x202   : > { %9081 = vst [vmem:[#allocation3_spill] sm:$0xff] %v6835_v62  ;;  %v2115_v29 = vadd.f32 %v2042_v36, %v1874_v9  ;;  %v2344_v27 = vrot.slane %v2224_v60, 1  ;;  %v2345_v47 = vrot.slane %v2225_v25, 1  ;;  %v2467_v8 = vmul.f32 %v5257_v22, %v9082_v59 }
 0x203   : > { %v2585_v48 = vrot.slane %v2465_v32, 2  ;;  %v2586_v31 = vrot.slane %v2466_v16, 2  ;;  %2872 = vmatpush.bf16.msra.mxu2 %v2854_v10  ;;  %v2179_v7 = vadd.f32 %v2147_v21, %v2114_v34  ;;  %v1081_v63 = vmul.f32 %v4998_v55, %v9083_v51  ;;  %v9090_v21 = vld [vmem:[#allocation55_spill] sm:$0xff] }
 0x204   : > { %v2180_v41 = vadd.f32 %v2148_v52, %v2115_v29  ;;  %v9085_v5 = vrot.slane %v9084_v0, 1  ;;  %v9087_v1 = vrot.slane %v9086_v44, 1  ;;  %v2346_v12 = vsel %vm1188_vm5, %v2344_v27, %v2345_v47  ;;  %v9096_v44 = vld [vmem:[#allocation11_spill] sm:$0xff] }
 0x205   : > { %v9089_v23 = vrot.slane %v9088_v26, 1  ;;  %v2587_v38 = vsel %vm1430_vm6, %v2585_v48, %v2586_v31  ;;  %v2588_v43 = vrot.slane %v2467_v8, 2  ;;  %v2420_v13 = vadd.f32 %v2346_v12, %v2179_v7 }
 0x206   : > { %v1246_v61 = vsel %vm1188_vm5, %v9087_v1, %v9085_v5  ;;  %v1486_v52 = vrot.slane %v9090_v21, 2  ;;  %v1566_v24 = vadd.f32 %v9092_v50, %v9091_v45  ;;  %v1598_v42 = vmul.f32 %v5198_v6, %v9063_v57 }
 0x207   : > { %v2348_v14 = vsel %vm1188_vm5, %v2345_v47, %v9089_v23  ;;  %v1323_v2 = vadd.f32 %v1246_v61, %v1081_v63  ;;  %v2589_v46 = vsel %vm1430_vm6, %v2586_v31, %v2588_v43  ;;  %v1599_v33 = vmul.f32 %v5198_v6, %v9093_v28 }
 0x208   : > { %v2421_v37 = vadd.f32 %v2348_v14, %v2180_v41  ;;  %v2661_v36 = vadd.f32 %v2587_v38, %v2420_v13  ;;  %v9095_v53 = vrot.slane %v9094_v49, 2  ;;  %v1674_v60 = vmul.f32 %v5001_v56, %v9063_v57  ;;  %v9102_v49 = vld [vmem:[#allocation4_spill] sm:$0xff] }
 0x209   : > { %v1631_v32 = vadd.f32 %v1599_v33, %v1566_v24  ;;  %v1675_v16 = vmul.f32 %v5001_v56, %v9093_v28  ;;  %v1915_v10 = vmul.f32 %v5219_v4, %v9063_v57  ;;  %v1916_v47 = vmul.f32 %v5219_v4, %v9093_v28 }
 0x20a   : > { %v2662_v17 = vadd.f32 %v2589_v46, %v2421_v37  ;;  %v1488_v9 = vsel %vm1430_vm6, %v1486_v52, %v9095_v53  ;;  %v2697_v34 = vmul.f32 %v6705_v18, %v2661_v36  ;;  %v1792_v27 = vrot.slane %v1674_v60, 1  ;;  %v9098_v37 = vld [vmem:[#allocation12_spill] sm:$0xff] }
 0x20b   : > { %v1565_v25 = vadd.f32 %v1488_v9, %v1323_v2  ;;  %v1793_v8 = vrot.slane %v1675_v16, 1  ;;  %v2033_v48 = vrot.slane %v1915_v10, 2  ;;  %v2145_v31 = vmul.f32 %v5237_v40, %v6369_v11 }
 0x20c   : > { %v2698_v29 = vmul.f32 %v6705_v18, %v2662_v17  ;;  %v2733_v7 = vadd.f32 %v6721_v39, %v2697_v34  ;;  %v2034_v63 = vrot.slane %v1916_v47, 2  ;;  %v2146_v0 = vmul.f32 %v5237_v40, %v9075_v35 }
 0x20d   : > { %v1630_v59 = vadd.f32 %v1598_v42, %v1565_v25  ;;  %v1794_v5 = vsel %vm1188_vm5, %v1792_v27, %v1793_v8  ;;  %v9097_v1 = vrot.slane %v9096_v44, 1  ;;  %v2221_v12 = vmul.f32 %v5225_v3, %v6369_v11  ;;  %v9104_v25 = vld [vmem:[#allocation42_spill] sm:$0xff] }
 0x20e   : > { %v2734_v41 = vadd.f32 %v6721_v39, %v2698_v29  ;;  %v2222_v26 = vmul.f32 %v5225_v3, %v9075_v35  ;;  %vm2765_vm10 = vcmp.ge.f32.partialorder %v2733_v7, 0.0  ;;  %v2801_v23 = vmul.f32 %v6732_v54, %v2733_v7  ;;  %v9105_v29 = vld [vmem:[#allocation71_spill] sm:$0xff] }
 0x20f   : > { %v1796_v61 = vsel %vm1188_vm5, %v1793_v8, %v9097_v1  ;;  %v1871_v38 = vadd.f32 %v1794_v5, %v1630_v59  ;;  %v2035_v13 = vsel %vm1430_vm6, %v2033_v48, %v2034_v63  ;;  %v9099_v2 = vrot.slane %v9098_v37, 2  ;;  %v9106_v59 = vld [vmem:[#allocation74_spill] sm:$0xff]  ;;  %v9108_v48 = vld [vmem:[#allocation76_spill] sm:$0xff] }
 0x210   : > { %vm2766_vm11 = vcmp.ge.f32.partialorder %v2734_v41, 0.0  ;;  %v2802_v14 = vmul.f32 %v6732_v54, %v2734_v41  ;;  %v1872_v43 = vadd.f32 %v1796_v61, %v1631_v32  ;;  %v6898_v52 = vsel %vm2765_vm10, %v2733_v7, %v2801_v23  ;;  %v9111_v61 = vld [vmem:[#allocation77_spill] sm:$0xff]  ;;  %v9113_v23 = vld [vmem:[#allocation75_spill] sm:$0xff] }
 0x211   : > { %v2037_v21 = vsel %vm1430_vm6, %v2034_v63, %v9099_v2  ;;  %9100 = vst [vmem:[#allocation26_spill] sm:$0xff] %v6898_v52  ;;  %v2339_v45 = vrot.slane %v2221_v12, 1  ;;  %v2340_v50 = vrot.slane %v2222_v26, 1  ;;  %v2112_v42 = vadd.f32 %v2035_v13, %v1871_v38  ;;  %v9110_v63 = vld [vmem:[#allocation82_spill] sm:$0xff] }
 0x212   : > { %v6900_v46 = vsel %vm2766_vm11, %v2734_v41, %v2802_v14  ;;  %v2113_v33 = vadd.f32 %v2037_v21, %v1872_v43  ;;  %v2462_v36 = vmul.f32 %v5257_v22, %v6369_v11  ;;  %v9103_v53 = vrot.slane %v9102_v49, 1  ;;  %v9115_v21 = vld [vmem:[#allocation85_spill] sm:$0xff] }
 0x213   : > { %9101 = vst [vmem:[#allocation32_spill] sm:$0xff] %v6900_v46  ;;  %v2853_v24 = vpack.c.bf16 %v6900_v46, %v6898_v52  ;;  %v2341_v17 = vsel %vm1188_vm5, %v2339_v45, %v2340_v50  ;;  %v2463_v60 = vmul.f32 %v5257_v22, %v9075_v35  ;;  %v2464_v32 = vmul.f32 %v5257_v22, %v9104_v25 }
 0x214   : > { %v2343_v9 = vsel %vm1188_vm5, %v2340_v50, %v9103_v53  ;;  %v2177_v16 = vadd.f32 %v2145_v31, %v2112_v42  ;;  %v2178_v10 = vadd.f32 %v2146_v0, %v2113_v33  ;;  %v2580_v34 = vrot.slane %v2462_v36, 2  ;;  %v9112_v31 = vld [vmem:[#allocation78_spill] sm:$0xff] }
 0x215   : > { %2873 = vmatpush.bf16.msra.mxu2 %v2853_v24  ;;  %v1079_v27 = vmul.f32 %v4998_v55, %v9105_v29  ;;  %v2581_v11 = vrot.slane %v2463_v60, 2  ;;  %v2583_v47 = vrot.slane %v2464_v32, 2  ;;  %v9107_v8 = vrot.slane %v9106_v59, 1 }
 0x216   : > { %v9109_v7 = vrot.slane %v9108_v48, 1  ;;  %v1481_v35 = vrot.slane %v9110_v63, 2  ;;  %v2418_v5 = vadd.f32 %v2341_v17, %v2177_v16  ;;  %v2419_v44 = vadd.f32 %v2343_v9, %v2178_v10 }
 0x217   : > { %v1564_v0 = vadd.f32 %v9112_v31, %v9111_v61  ;;  %v2582_v12 = vsel %vm1430_vm6, %v2580_v34, %v2581_v11  ;;  %v2584_v26 = vsel %vm1430_vm6, %v2581_v11, %v2583_v47  ;;  %v9114_v14 = vrot.slane %v9113_v23, 2  ;;  %v9116_v47 = vld [vmem:[#allocation20_spill] sm:$0xff] }
 0x218   : > { %v1241_v41 = vsel %vm1188_vm5, %v9109_v7, %v9107_v8  ;;  %v1596_v43 = vmul.f32 %v5198_v6, %v9083_v51  ;;  %v2659_v13 = vadd.f32 %v2582_v12, %v2418_v5  ;;  %v2660_v37 = vadd.f32 %v2584_v26, %v2419_v44  ;;  %v9118_v7 = vld [vmem:[#allocation39_spill] sm:$0xff] }
 0x219   : > { %v1321_v1 = vadd.f32 %v1241_v41, %v1079_v27  ;;  %v1483_v38 = vsel %vm1430_vm6, %v1481_v35, %v9114_v14  ;;  %v1597_v45 = vmul.f32 %v5198_v6, %v9115_v21  ;;  %v1671_v50 = vmul.f32 %v5001_v56, %v9083_v51 }
 0x21a   : > { %v1672_v24 = vmul.f32 %v5001_v56, %v9115_v21  ;;  %v1912_v42 = vmul.f32 %v5219_v4, %v9083_v51  ;;  %v1913_v33 = vmul.f32 %v5219_v4, %v9115_v21  ;;  %v2695_v36 = vmul.f32 %v6705_v18, %v2659_v13 }
 0x21b   : > { %v1563_v2 = vadd.f32 %v1483_v38, %v1321_v1  ;;  %v2696_v17 = vmul.f32 %v6705_v18, %v2660_v37  ;;  %v1629_v53 = vadd.f32 %v1597_v45, %v1564_v0  ;;  %v1787_v9 = vrot.slane %v1671_v50, 1 }
 0x21c   : > { %v1788_v60 = vrot.slane %v1672_v24, 1  ;;  %v2028_v25 = vrot.slane %v1912_v42, 2  ;;  %v2029_v32 = vrot.slane %v1913_v33, 2  ;;  %v2731_v16 = vadd.f32 %v6721_v39, %v2695_v36  ;;  %v9123_v36 = vld [vmem:[#allocation63_spill] sm:$0xff] }
 0x21d   : > { %v1628_v49 = vadd.f32 %v1596_v43, %v1563_v2  ;;  %v2732_v10 = vadd.f32 %v6721_v39, %v2696_v17  ;;  %v2143_v34 = vmul.f32 %v5237_v40, %v9063_v57  ;;  %v2144_v27 = vmul.f32 %v5237_v40, %v9093_v28  ;;  %v9122_v2 = vld [vmem:[#allocation35_spill] sm:$0xff] }
 0x21e   : > { %v1789_v11 = vsel %vm1188_vm5, %v1787_v9, %v1788_v60  ;;  %v9117_v59 = vrot.slane %v9116_v47, 1  ;;  %v2030_v48 = vsel %vm1430_vm6, %v2028_v25, %v2029_v32  ;;  %v9119_v41 = vrot.slane %v9118_v7, 2  ;;  %v9124_v17 = vld [vmem:[#allocation67_spill] sm:$0xff]  ;;  %v9128_v25 = vld [vmem:[#allocation10_spill] sm:$0xff]  ;;  %v9131_v7 = vld [vmem:[#allocation80_spill] sm:$0xff] }
 0x21f   : > { %vm2763_vm12 = vcmp.ge.f32.partialorder %v2731_v16, 0.0  ;;  %vm2764_vm13 = vcmp.ge.f32.partialorder %v2732_v10, 0.0  ;;  %v2799_v35 = vmul.f32 %v6732_v54, %v2731_v16  ;;  %v2800_v5 = vmul.f32 %v6732_v54, %v2732_v10 }
 0x220   : > { %v1791_v8 = vsel %vm1188_vm5, %v1788_v60, %v9117_v59  ;;  %v2032_v63 = vsel %vm1430_vm6, %v2029_v32, %v9119_v41  ;;  %v1869_v44 = vadd.f32 %v1789_v11, %v1628_v49  ;;  %v2218_v61 = vmul.f32 %v5225_v3, %v9063_v57  ;;  %v9126_v49 = vld [vmem:[#allocation64_spill] sm:$0xff]  ;;  %v9130_v59 = vld [vmem:[#allocation66_spill] sm:$0xff]  ;;  %v9132_v41 = vld [vmem:[#allocation81_spill] sm:$0xff] }
 0x221   : > { %v1870_v1 = vadd.f32 %v1791_v8, %v1629_v53  ;;  %v2219_v31 = vmul.f32 %v5225_v3, %v9093_v28  ;;  %v6963_v0 = vsel %vm2763_vm12, %v2731_v16, %v2799_v35  ;;  %v6965_v12 = vsel %vm2764_vm13, %v2732_v10, %v2800_v5  ;;  %v9133_v5 = vld [vmem:[#allocation72_spill] sm:$0xff] }
 0x222   : > { %9120 = vst [vmem:[#allocation30_spill] sm:$0xff] %v6963_v0  ;;  %v2459_v26 = vmul.f32 %v5257_v22, %v9063_v57  ;;  %v2460_v23 = vmul.f32 %v5257_v22, %v9093_v28  ;;  %v2852_v14 = vpack.c.bf16 %v6965_v12, %v6963_v0  ;;  %v2110_v38 = vadd.f32 %v2030_v48, %v1869_v44 }
 0x223   : > { %9121 = vst [vmem:[#allocation29_spill] sm:$0xff] %v6965_v12  ;;  %v2111_v43 = vadd.f32 %v2032_v63, %v1870_v1  ;;  %v2334_v13 = vrot.slane %v2218_v61, 1  ;;  %v2335_v37 = vrot.slane %v2219_v31, 1  ;;  %v2461_v45 = vmul.f32 %v5257_v22, %v9122_v2  ;;  %v9134_v31 = vld [vmem:[#allocation68_spill] sm:$0xff] }
 0x224   : > { %v2575_v50 = vrot.slane %v2459_v26, 2  ;;  %v2576_v24 = vrot.slane %v2460_v23, 2  ;;  %2874 = vmatpush.bf16.msra.mxu2 %v2852_v14  ;;  %v2175_v42 = vadd.f32 %v2143_v34, %v2110_v38  ;;  %v1077_v57 = vmul.f32 %v4998_v55, %v9123_v36 }
 0x225   : > { %v2176_v33 = vadd.f32 %v2144_v27, %v2111_v43  ;;  %v9125_v28 = vrot.slane %v9124_v17, 1  ;;  %v9127_v53 = vrot.slane %v9126_v49, 1  ;;  %v2336_v60 = vsel %vm1188_vm5, %v2334_v13, %v2335_v37 }
 0x226   : > { %v9129_v32 = vrot.slane %v9128_v25, 1  ;;  %v2577_v10 = vsel %vm1430_vm6, %v2575_v50, %v2576_v24  ;;  %v2578_v11 = vrot.slane %v2461_v45, 2  ;;  %v2416_v34 = vadd.f32 %v2336_v60, %v2175_v42  ;;  %v9136_v25 = vld [vmem:[#allocation84_spill] sm:$0xff] }
 0x227   : > { %v1236_v9 = vsel %vm1188_vm5, %v9127_v53, %v9125_v28  ;;  %v1476_v8 = vrot.slane %v9130_v59, 2  ;;  %v1562_v63 = vadd.f32 %v9132_v41, %v9131_v7  ;;  %v1594_v35 = vmul.f32 %v5198_v6, %v9105_v29 }
 0x228   : > { %v2338_v16 = vsel %vm1188_vm5, %v2335_v37, %v9129_v32  ;;  %v1319_v47 = vadd.f32 %v1236_v9, %v1077_v57  ;;  %v2579_v48 = vsel %vm1430_vm6, %v2576_v24, %v2578_v11  ;;  %v1595_v44 = vmul.f32 %v5198_v6, %v9133_v5 }
 0x229   : > { %v2417_v27 = vadd.f32 %v2338_v16, %v2176_v33  ;;  %v2657_v1 = vadd.f32 %v2577_v10, %v2416_v34  ;;  %v9135_v26 = vrot.slane %v9134_v31, 2  ;;  %v1668_v14 = vmul.f32 %v5001_v56, %v9105_v29 }
 0x22a   : > { %v1627_v43 = vadd.f32 %v1595_v44, %v1562_v63  ;;  %v1669_v13 = vmul.f32 %v5001_v56, %v9133_v5  ;;  %v1909_v37 = vmul.f32 %v5219_v4, %v9105_v29  ;;  %v1910_v24 = vmul.f32 %v5219_v4, %v9133_v5 }
 0x22b   : > { %v2658_v61 = vadd.f32 %v2579_v48, %v2417_v27  ;;  %v1478_v23 = vsel %vm1430_vm6, %v1476_v8, %v9135_v26  ;;  %v2693_v2 = vmul.f32 %v6705_v18, %v2657_v1  ;;  %v1782_v50 = vrot.slane %v1668_v14, 1  ;;  %v9138_v48 = vld [vmem:[#allocation90_spill] sm:$0xff] }
 0x22c   : > { %v1561_v38 = vadd.f32 %v1478_v23, %v1319_v47  ;;  %v1783_v33 = vrot.slane %v1669_v13, 1  ;;  %v2023_v57 = vrot.slane %v1909_v37, 2  ;;  %v2141_v17 = vmul.f32 %v5237_v40, %v9083_v51 }
 0x22d   : > { %v2694_v45 = vmul.f32 %v6705_v18, %v2658_v61  ;;  %v2729_v28 = vadd.f32 %v6721_v39, %v2693_v2  ;;  %v2024_v53 = vrot.slane %v1910_v24, 2  ;;  %v2142_v9 = vmul.f32 %v5237_v40, %v9115_v21  ;;  %v9144_v2 = vld [vmem:[#allocation86_spill] sm:$0xff] }
 0x22e   : > { %v1626_v42 = vadd.f32 %v1594_v35, %v1561_v38  ;;  %v1784_v60 = vsel %vm1188_vm5, %v1782_v50, %v1783_v33  ;;  %v9137_v32 = vrot.slane %v9136_v25, 1  ;;  %v2215_v10 = vmul.f32 %v5225_v3, %v9083_v51  ;;  %v9142_v38 = vld [vmem:[#allocation23_spill] sm:$0xff] }
 0x22f   : > { %v2730_v49 = vadd.f32 %v6721_v39, %v2694_v45  ;;  %v2216_v11 = vmul.f32 %v5225_v3, %v9115_v21  ;;  %vm2761_vm14 = vcmp.ge.f32.partialorder %v2729_v28, 0.0  ;;  %v2797_v34 = vmul.f32 %v6732_v54, %v2729_v28 }
 0x230   : > { %v1786_v16 = vsel %vm1188_vm5, %v1783_v33, %v9137_v32  ;;  %v1867_v47 = vadd.f32 %v1784_v60, %v1626_v42  ;;  %v2025_v8 = vsel %vm1430_vm6, %v2023_v57, %v2024_v53  ;;  %v9139_v7 = vrot.slane %v9138_v48, 2  ;;  %v9145_v33 = vld [vmem:[#allocation56_spill] sm:$0xff]  ;;  %v9148_v60 = vld [vmem:[#allocation57_spill] sm:$0xff] }
 0x231   : > { %vm2762_vm15 = vcmp.ge.f32.partialorder %v2730_v49, 0.0  ;;  %v2798_v27 = vmul.f32 %v6732_v54, %v2730_v49  ;;  %v1868_v59 = vadd.f32 %v1786_v16, %v1627_v43  ;;  %v7028_v63 = vsel %vm2761_vm14, %v2729_v28, %v2797_v34  ;;  %v9150_v16 = vld [vmem:[#allocation58_spill] sm:$0xff] }
 0x232   : > { %v2027_v41 = vsel %vm1430_vm6, %v2024_v53, %v9139_v7  ;;  %9140 = vst [vmem:[#allocation21_spill] sm:$0xff] %v7028_v63  ;;  %v2329_v44 = vrot.slane %v2215_v10, 1  ;;  %v2330_v1 = vrot.slane %v2216_v11, 1  ;;  %v2108_v31 = vadd.f32 %v2025_v8, %v1867_v47 }
 0x233   : > { %v7030_v35 = vsel %vm2762_vm15, %v2730_v49, %v2798_v27  ;;  %v2109_v26 = vadd.f32 %v2027_v41, %v1868_v59  ;;  %v2456_v23 = vmul.f32 %v5257_v22, %v9083_v51  ;;  %v9143_v43 = vrot.slane %v9142_v38, 1  ;;  %v9146_v49 = vld [vmem:[#allocation59_spill] sm:$0xff]  ;;  %v9151_v27 = vld [vmem:[#allocation61_spill] sm:$0xff]  ;;  %v9153_v59 = vld [vmem:[#allocation60_spill] sm:$0xff] }
 0x234   : > { %9141 = vst [vmem:[#allocation31_spill] sm:$0xff] %v7030_v35  ;;  %v2851_v61 = vpack.c.bf16 %v7030_v35, %v7028_v63  ;;  %v2331_v14 = vsel %vm1188_vm5, %v2329_v44, %v2330_v1  ;;  %v2457_v37 = vmul.f32 %v5257_v22, %v9115_v21  ;;  %v2458_v45 = vmul.f32 %v5257_v22, %v9144_v2 }
 0x235   : > { %v2333_v13 = vsel %vm1188_vm5, %v2330_v1, %v9143_v43  ;;  %v2173_v50 = vadd.f32 %v2141_v17, %v2108_v31  ;;  %v2174_v24 = vadd.f32 %v2142_v9, %v2109_v26  ;;  %v2570_v42 = vrot.slane %v2456_v23, 2  ;;  %v9152_v17 = vld [vmem:[#allocation62_spill] sm:$0xff] }
 0x236   : > { %2875 = vmatpush.bf16.msra.mxu2 %v2851_v61  ;;  %v1075_v57 = vmul.f32 %v4998_v55, %v9145_v33  ;;  %v2571_v51 = vrot.slane %v2457_v37, 2  ;;  %v2573_v28 = vrot.slane %v2458_v45, 2  ;;  %v9147_v53 = vrot.slane %v9146_v49, 1  ;;  %v9155_v61 = vld [vmem:[#allocation65_spill] sm:$0xff] }
 0x237   : > { %v9149_v25 = vrot.slane %v9148_v60, 1  ;;  %v1471_v21 = vrot.slane %v9150_v16, 2  ;;  %v2414_v10 = vadd.f32 %v2331_v14, %v2173_v50  ;;  %v2415_v11 = vadd.f32 %v2333_v13, %v2174_v24 }
 0x238   : > { %v1560_v9 = vadd.f32 %v9152_v17, %v9151_v27  ;;  %v2572_v47 = vsel %vm1430_vm6, %v2570_v42, %v2571_v51  ;;  %v2574_v55 = vsel %vm1430_vm6, %v2571_v51, %v2573_v28  ;;  %v9154_v8 = vrot.slane %v9153_v59, 2 }
 0x239   : > { %v1231_v32 = vsel %vm1188_vm5, %v9149_v25, %v9147_v53  ;;  %v1592_v7 = vmul.f32 %v5198_v6, %v9123_v36  ;;  %v2655_v41 = vadd.f32 %v2572_v47, %v2414_v10  ;;  %v2656_v44 = vadd.f32 %v2574_v55, %v2415_v11  ;;  %v9158_v53 = vld [vmem:[#allocation70_spill] sm:$0xff] }
 0x23a   : > { %v1317_v34 = vadd.f32 %v1231_v32, %v1075_v57  ;;  %v1473_v48 = vsel %vm1430_vm6, %v1471_v21, %v9154_v8  ;;  %v1593_v31 = vmul.f32 %v5198_v6, %v9155_v61  ;;  %v1665_v26 = vmul.f32 %v5001_v56, %v9123_v36  ;;  %v9156_v57 = vld [vmem:[#allocation69_spill] sm:$0xff] }
 0x23b   : > { %v1666_v23 = vmul.f32 %v5001_v56, %v9155_v61  ;;  %v1906_v14 = vmul.f32 %v5219_v4, %v9123_v36  ;;  %v1907_v38 = vmul.f32 %v5219_v4, %v9155_v61  ;;  %v2691_v43 = vmul.f32 %v6705_v18, %v2655_v41 }
 0x23c   : > { %v1559_v1 = vadd.f32 %v1473_v48, %v1317_v34  ;;  %v2692_v13 = vmul.f32 %v6705_v18, %v2656_v44  ;;  %v1625_v2 = vadd.f32 %v1593_v31, %v1560_v9  ;;  %v1777_v45 = vrot.slane %v1665_v26, 1  ;;  %v9163_v31 = vld [vmem:[#allocation91_spill] sm:$0xff] }
 0x23d   : > { %v1778_v6 = vrot.slane %v1666_v23, 1  ;;  %v2018_v50 = vrot.slane %v1906_v14, 2  ;;  %v2019_v24 = vrot.slane %v1907_v38, 2  ;;  %v2727_v42 = vadd.f32 %v6721_v39, %v2691_v43 }
 0x23e   : > { %v1624_v37 = vadd.f32 %v1592_v7, %v1559_v1  ;;  %v2728_v56 = vadd.f32 %v6721_v39, %v2692_v13  ;;  %v2139_v36 = vmul.f32 %v5237_v40, %v9105_v29  ;;  %v2140_v4 = vmul.f32 %v5237_v40, %v9133_v5  ;;  %v9162_v7 = vld [vmem:[#allocation73_spill] sm:$0xff] }
 0x23f   : > { %v1779_v33 = vsel %vm1188_vm5, %v1777_v45, %v1778_v6  ;;  %v9157_v51 = vrot.slane %v9156_v57, 1  ;;  %v2020_v49 = vsel %vm1430_vm6, %v2018_v50, %v2019_v24  ;;  %v9159_v60 = vrot.slane %v9158_v53, 2 }
 0x240   : > { %vm2759_vm0 = vcmp.ge.f32.partialorder %v2727_v42, 0.0  ;;  %vm2760_vm3 = vcmp.ge.f32.partialorder %v2728_v56, 0.0  ;;  %v2795_v32 = vmul.f32 %v6732_v54, %v2727_v42  ;;  %v2796_v16 = vmul.f32 %v6732_v54, %v2728_v56 }
 0x241   : > { %v1781_v28 = vsel %vm1188_vm5, %v1778_v6, %v9157_v51  ;;  %v2022_v25 = vsel %vm1430_vm6, %v2019_v24, %v9159_v60  ;;  %v1865_v21 = vadd.f32 %v1779_v33, %v1624_v37  ;;  %v2212_v10 = vmul.f32 %v5225_v3, %v9105_v29  ;;  %v9167_v60 = vld [vmem:[#allocation49_spill] sm:$0xff] }
 0x242   : > { %v1866_v40 = vadd.f32 %v1781_v28, %v1625_v2  ;;  %v2213_v11 = vmul.f32 %v5225_v3, %v9133_v5  ;;  %v7093_v34 = vsel %vm2759_vm0, %v2727_v42, %v2795_v32  ;;  %v7095_v27 = vsel %vm2760_vm3, %v2728_v56, %v2796_v16  ;;  %v9168_v32 = vld [vmem:[#allocation28_spill] sm:$0xff] }
 0x243   : > { %9160 = vst [vmem:[#allocation22_spill] sm:$0xff] %v7093_v34  ;;  %v2453_v17 = vmul.f32 %v5257_v22, %v9105_v29  ;;  %v2454_v9 = vmul.f32 %v5257_v22, %v9133_v5  ;;  %v2850_v47 = vpack.c.bf16 %v7095_v27, %v7093_v34  ;;  %v2106_v55 = vadd.f32 %v2020_v49, %v1865_v21 }
 0x244   : > { %9161 = vst [vmem:[#allocation36_spill] sm:$0xff] %v7095_v27  ;;  %v2107_v59 = vadd.f32 %v2022_v25, %v1866_v40  ;;  %v2324_v8 = vrot.slane %v2212_v10, 1  ;;  %v2325_v48 = vrot.slane %v2213_v11, 1  ;;  %v2455_v3 = vmul.f32 %v5257_v22, %v9162_v7  ;;  %v9169_v40 = vld [vmem:[#allocation9_spill] sm:$0xff]  ;;  %v9173_v7 = vld [vmem:[#allocation44_spill] sm:$0xff] }
 0x245   : > { %v2565_v41 = vrot.slane %v2453_v17, 2  ;;  %v2566_v44 = vrot.slane %v2454_v9, 2  ;;  %2876 = vmatpush.bf16.msra.mxu2 %v2850_v47  ;;  %v2171_v1 = vadd.f32 %v2139_v36, %v2106_v55  ;;  %v9164_v26 = vrot.slane %v9163_v31, 1  ;;  %v9170_v11 = vld [vmem:[#allocation33_spill] sm:$0xff]  ;;  %v9171_v47 = vld [vmem:[#allocation48_spill] sm:$0xff]  ;;  %v9176_v31 = vld [vmem:[#allocation50_spill] sm:$0xff] }
 0x246   : > { %v2172_v61 = vadd.f32 %v2140_v4, %v2107_v59  ;;  %v2326_v29 = vsel %vm1188_vm5, %v2324_v8, %v2325_v48  ;;  %v2568_v14 = vrot.slane %v2455_v3, 2  ;;  %v8795_v38 = vmov 1065369472   ;;  %v9172_v59 = vld [vmem:[#allocation52_spill] sm:$0xff] }
 0x247   : > { %v2328_v5 = vsel %vm1188_vm5, %v2325_v48, %v9164_v26  ;;  %v2567_v23 = vsel %vm1430_vm6, %v2565_v41, %v2566_v44  ;;  %2865 = vmatmul.bf16.vlgmr.msra.gmra.mxu1 %v8795_v38  ;;  %v2412_v43 = vadd.f32 %v2326_v29, %v2171_v1  ;;  %v9174_v41 = vld [vmem:[#allocation19_spill] sm:$0xff]  ;;  %vm4023_vm4 = vcmask 1041408  }
 0x248   : > { %v2413_v13 = vadd.f32 %v2328_v5, %v2172_v61  ;;  %v2569_v22 = vsel %vm1430_vm6, %v2566_v44, %v2568_v14  ;;  %vm8812_vm6 = vcmask 130048   ;;  %v9175_v61 = vld [vmem:[#allocation53_spill] sm:$0xff]  ;;  %vm8813_vm14 = vcmask 31744  }
 0x249   : > { %v2653_v37 = vadd.f32 %v2567_v23, %v2412_v43  ;;  %v9177_v23 = vld [vmem:[#allocation97_spill] sm:$0xff]  ;;  %v9178_v43 = vld [vmem:[#allocation51_spill] sm:$0xff] }
 0x24a   : > { %v2654_v2 = vadd.f32 %v2569_v22, %v2413_v13 }
 0x24b   : > { %v2689_v45 = vmul.f32 %v6705_v18, %v2653_v37  ;;  %v9179_v37 = vld [vmem:[#allocation89_spill] sm:$0xff] }
 0x24c   : > { %v2690_v6 = vmul.f32 %v6705_v18, %v2654_v2 }
 0x24d   : > { %v2725_v50 = vadd.f32 %v6721_v39, %v2689_v45  ;;  %v9180_v45 = vld [vmem:[#allocation92_spill] sm:$0xff] }
 0x24e   : > { %v2726_v24 = vadd.f32 %v6721_v39, %v2690_v6  ;;  %v4617_v39 = vld [vmem:[%s8629_s9] sm:$0xff] }
 0x24f   : > { %vm2757_vm5 = vcmp.ge.f32.partialorder %v2725_v50, 0.0  ;;  %v2793_v42 = vmul.f32 %v6732_v54, %v2725_v50  ;;  %2997 = vmatpush.bf16.msra.mxu3 %v4617_v39 }
 0x250   : > { %vm2758_vm2 = vcmp.ge.f32.partialorder %v2726_v24, 0.0  ;;  %v2794_v56 = vmul.f32 %v6732_v54, %v2726_v24 }
 0x251   : > { %v7118_v36 = vsel %vm2757_vm5, %v2725_v50, %v2793_v42 }
 0x252   : > { %9165 = vst [vmem:[#allocation40_spill] sm:$0xff] %v7118_v36  ;;  %v7120_v4 = vsel %vm2758_vm2, %v2726_v24, %v2794_v56  ;;  %v9181_v24 = vld [vmem:[#allocation79_spill] sm:$0xff] }
 0x253   : > { %9166 = vst [vmem:[#allocation5_spill] sm:$0xff] %v7120_v4  ;;  %v2849_v33 = vpack.c.bf16 %v7120_v4, %v7118_v36  ;;  %v9182_v56 = vld [vmem:[#allocation83_spill] sm:$0xff] }
 0x255   : > { %2877 = vmatpush.bf16.msra.mxu2 %v2849_v33 }
 0x258   : > { %2878 = vmatmul.bf16.vlgmr.msra.gmra.mxu2 %v8795_v38 }
 0x2c4   : > { %v2866_v18 = vpop.f32.mrf.mxu1 }
 0x2cc   : > { %v2868_v57 = vpop.f32.mrf.mxu1 }
 0x2db   : > { %v2879_v51 = vpop.f32.mrf.mxu2 }
 0x2dc   : > { %v2880_v28 = vadd.f32 %v2879_v51, %v2866_v18 }
 0x2de   : > { %v2883_v54 = vmul.f32 0.00390625, %v2880_v28 }
 0x2e0   : > { %v7128_v49 = vperm.slane %v2883_v54, 0 }
 0x2e2   : > { %v2885_v25 = vmul.f32 %v7128_v49, %v9167_v60  ;;  %v2886_v16 = vmul.f32 %v7128_v49, %v9168_v32  ;;  %v2887_v10 = vmul.f32 %v7128_v49, %v9169_v40  ;;  %v2888_v17 = vmul.f32 %v7128_v49, %v9170_v11 }
 0x2e3   : > { %v2881_v53 = vpop.f32.mrf.mxu2  ;;  %v2889_v55 = vmul.f32 %v7128_v49, %v9171_v47  ;;  %v2890_v8 = vmul.f32 %v7128_v49, %v9172_v59  ;;  %v2891_v3 = vmul.f32 %v7128_v49, %v9173_v7  ;;  %v2892_v44 = vmul.f32 %v7128_v49, %v9174_v41 }
 0x2e4   : > { %v2917_v21 = vpack.c.bf16 %v2886_v16, %v2885_v25  ;;  %v2918_v9 = vpack.c.bf16 %v2888_v17, %v2887_v10  ;;  %v2893_v29 = vmul.f32 %v7128_v49, %v9175_v61  ;;  %v2894_v26 = vmul.f32 %v7128_v49, %v9176_v31 }
 0x2e5   : > { %v2919_v48 = vpack.c.bf16 %v2890_v8, %v2889_v55  ;;  %v2920_v1 = vpack.c.bf16 %v2892_v44, %v2891_v3  ;;  %v2895_v14 = vmul.f32 %v7128_v49, %v9177_v23  ;;  %v2896_v13 = vmul.f32 %v7128_v49, %v9178_v43 }
 0x2e6   : > { %4529 = vmatmul.msk.bf16.vlgmr.msra.gmra.mxu3 %vm8812_vm6, %v2917_v21  ;;  %v2921_v5 = vpack.c.bf16 %v2894_v26, %v2893_v29  ;;  %v2897_v2 = vmul.f32 %v7128_v49, %v9179_v37  ;;  %v2898_v6 = vmul.f32 %v7128_v49, %v9180_v45  ;;  %v2899_v42 = vmul.f32 %v7128_v49, %v9181_v24 }
 0x2e7   : > { %v2922_v22 = vpack.c.bf16 %v2896_v13, %v2895_v14  ;;  %v2900_v33 = vmul.f32 %v7128_v49, %v9182_v56  ;;  %v2901_v39 = vmul.f32 %v7128_v49, %v7118_v36  ;;  %v2902_v57 = vmul.f32 %v7128_v49, %v7120_v4 }
 0x2e8   : > { %v2923_v50 = vpack.c.bf16 %v2898_v6, %v2897_v2  ;;  %v2903_v54 = vmul.f32 %v7128_v49, %v7093_v34  ;;  %v2904_v53 = vmul.f32 %v7128_v49, %v7095_v27  ;;  %v2905_v10 = vmul.f32 %v7128_v49, %v7028_v63 }
 0x2e9   : > { %v2924_v18 = vpack.c.bf16 %v2900_v33, %v2899_v42  ;;  %v2925_v51 = vpack.c.bf16 %v2902_v57, %v2901_v39  ;;  %v2906_v17 = vmul.f32 %v7128_v49, %v7030_v35  ;;  %v2908_v3 = vmul.f32 %v7128_v49, %v6965_v12 }
 0x2ea   : > { %v2926_v16 = vpack.c.bf16 %v2904_v53, %v2903_v54  ;;  %v2909_v26 = vmul.f32 %v7128_v49, %v6898_v52  ;;  %v2911_v2 = vmul.f32 %v7128_v49, %v6833_v20  ;;  %v2912_v6 = vmul.f32 %v7128_v49, %v6835_v62 }
 0x2eb   : > { %v2927_v55 = vpack.c.bf16 %v2906_v17, %v2905_v10  ;;  %v2914_v39 = vmul.f32 %v7128_v49, %v6762_v19  ;;  %v2915_v53 = vmul.f32 %v7128_v49, %v6738_v30 }
 0x2ec   : > { %v2930_v42 = vpack.c.bf16 %v2912_v6, %v2911_v2 }
 0x2f6   : > { %4530 = vmatmul.msk.bf16.gmra.mxu3 %vm8812_vm6, %v2918_v9 }
 0x306   : > { %4531 = vmatmul.msk.bf16.gmra.mxu3 %vm8812_vm6, %v2919_v48  ;;  %v2907_v48 = vmul.f32 %v7128_v49, %v6963_v0 }
 0x316   : > { %4532 = vmatmul.msk.bf16.gmra.mxu3 %vm8812_vm6, %v2920_v1  ;;  %v2928_v1 = vpack.c.bf16 %v2908_v3, %v2907_v48 }
 0x326   : > { %4533 = vmatmul.msk.bf16.gmra.mxu3 %vm8812_vm6, %v2921_v5  ;;  %v2910_v5 = vmul.f32 %v7128_v49, %v6900_v46 }
 0x328   : > { %v2929_v13 = vpack.c.bf16 %v2910_v5, %v2909_v26 }
 0x336   : > { %4534 = vmatmul.msk.bf16.gmra.mxu3 %vm8812_vm6, %v2922_v22 }
 0x346   : > { %4535 = vmatmul.msk.bf16.gmra.mxu3 %vm8812_vm6, %v2923_v50 }
 0x356   : > { %4536 = vmatmul.msk.bf16.gmra.mxu3 %vm8812_vm6, %v2924_v18  ;;  %v2913_v18 = vmul.f32 %v7128_v49, %v6760_v58 }
 0x366   : > { %4537 = vmatmul.msk.bf16.gmra.mxu3 %vm8812_vm6, %v2925_v51  ;;  %v2931_v51 = vpack.c.bf16 %v2914_v39, %v2913_v18 }
 0x369   : > { %v7175_v28 = vpop.f32.mrf.mxu3 }
 0x371   : > { %v7181_v25 = vpop.f32.mrf.mxu3 }
 0x372   : > { %v3079_v39 = vpack.c.bf16 %v7181_v25, %v7175_v28 }
 0x376   : > { %4538 = vmatmul.msk.bf16.gmra.mxu3 %vm8812_vm6, %v2926_v16  ;;  %v2916_v16 = vmul.f32 %v7128_v49, %v6740_v15 }
 0x378   : > { %v2932_v17 = vpack.c.bf16 %v2916_v16, %v2915_v53 }
 0x379   : > { %v7184_v21 = vpop.f32.mrf.mxu3 }
 0x381   : > { %v7190_v9 = vpop.f32.mrf.mxu3 }
 0x382   : > { %v3080_v18 = vpack.c.bf16 %v7190_v9, %v7184_v21 }
 0x386   : > { %4539 = vmatmul.msk.bf16.gmra.mxu3 %vm8812_vm6, %v2927_v55 }
 0x389   : > { %v7193_v8 = vpop.f32.mrf.mxu3 }
 0x391   : > { %v7199_v44 = vpop.f32.mrf.mxu3 }
 0x392   : > { %v3081_v6 = vpack.c.bf16 %v7199_v44, %v7193_v8 }
 0x396   : > { %4540 = vmatmul.msk.bf16.gmra.mxu3 %vm8812_vm6, %v2928_v1 }
 0x399   : > { %v7202_v29 = vpop.f32.mrf.mxu3 }
 0x3a1   : > { %v7208_v14 = vpop.f32.mrf.mxu3 }
 0x3a2   : > { %v3082_v2 = vpack.c.bf16 %v7208_v14, %v7202_v29 }
 0x3a6   : > { %4541 = vmatmul.msk.bf16.gmra.mxu3 %vm8812_vm6, %v2929_v13 }
 0x3a9   : > { %v7211_v22 = vpop.f32.mrf.mxu3 }
 0x3b1   : > { %v7217_v50 = vpop.f32.mrf.mxu3 }
 0x3b2   : > { %v3083_v5 = vpack.c.bf16 %v7217_v50, %v7211_v22 }
 0x3b6   : > { %4542 = vmatmul.msk.bf16.gmra.mxu3 %vm8812_vm6, %v2930_v42 }
 0x3b9   : > { %v7220_v33 = vpop.f32.mrf.mxu3 }
 0x3c1   : > { %v7226_v57 = vpop.f32.mrf.mxu3 }
 0x3c2   : > { %v3084_v49 = vpack.c.bf16 %v7226_v57, %v7220_v33 }
 0x3c6   : > { %4543 = vmatmul.msk.bf16.gmra.mxu3 %vm8812_vm6, %v2931_v51 }
 0x3c9   : > { %v7229_v54 = vpop.f32.mrf.mxu3 }
 0x3d1   : > { %v7235_v10 = vpop.f32.mrf.mxu3 }
 0x3d2   : > { %v3085_v1 = vpack.c.bf16 %v7235_v10, %v7229_v54 }
 0x3d6   : > { %4544 = vmatmul.msk.bf16.gmra.mxu3 %vm8812_vm6, %v2932_v17 }
 0x3d9   : > { %v7238_v55 = vpop.f32.mrf.mxu3 }
 0x3e1   : > { %v7240_v48 = vpop.f32.mrf.mxu3 }
 0x3e2   : > { %v3086_v3 = vpack.c.bf16 %v7240_v48, %v7238_v55 }
 0x3e4   : > { %3095 = vmatpush.bf16.msrb.mxu1 %v3086_v3 }
 0x3e8   : > { %3096 = vmatpush.bf16.msrb.mxu1 %v3085_v1 }
 0x3e9   : > { %v7246_v26 = vpop.f32.mrf.mxu3 }
 0x3ec   : > { %3097 = vmatpush.bf16.msrb.mxu1 %v3084_v49 }
 0x3f0   : > { %3098 = vmatpush.bf16.msrb.mxu1 %v3083_v5 }
 0x3f1   : > { %v7252_v13 = vpop.f32.mrf.mxu3 }
 0x3f4   : > { %3099 = vmatpush.bf16.msrb.mxu1 %v3082_v2 }
 0x3f8   : > { %3100 = vmatpush.bf16.msrb.mxu1 %v3081_v6 }
 0x3f9   : > { %v7258_v42 = vpop.f32.mrf.mxu3 }
 0x3fc   : > { %3101 = vmatpush.bf16.msrb.mxu1 %v3080_v18 }
 0x400   : > { %3102 = vmatpush.bf16.msrb.mxu1 %v3079_v39 }
 0x401   : > { %v7264_v51 = vpop.f32.mrf.mxu3 }
 0x403   : > { %3103 = vmatmul.bf16.vlgmr.msrb.gmra.mxu1 %v8795_v38  ;;  %v3973_v38 = vld [vmem:[%s8630_s10] sm:$0x3] }
 0x404   : > { %v7280_v52 = vsel %vm4023_vm4, %v3973_v38, 0  ;;  %v9183_v38 = vmov 1065369472  }
 0x405   : > { %4034 = vmatpush.bf16.msrb.mxu0 %v7280_v52 }
 0x409   : > { %v7267_v53 = vpop.f32.mrf.mxu3 }
 0x411   : > { %v7269_v16 = vpop.f32.mrf.mxu3 }
 0x412   : > { %v3089_v12 = vpack.c.bf16 %v7269_v16, %v7267_v53 }
 0x419   : > { %v7271_v17 = vpop.f32.mrf.mxu3 }
 0x421   : > { %v7273_v3 = vpop.f32.mrf.mxu3 }
 0x422   : > { %v3090_v0 = vpack.c.bf16 %v7273_v3, %v7271_v17 }
 0x429   : > { %v3059_v1 = vpop.f32.mrf.mxu3 }
 0x431   : > { %v7275_v49 = vpop.f32.mrf.mxu3 }
 0x432   : > { %v3091_v58 = vpack.c.bf16 %v7275_v49, %v3059_v1 }
 0x439   : > { %v3064_v5 = vpop.f32.mrf.mxu3 }
 0x441   : > { %v3066_v2 = vpop.f32.mrf.mxu3 }
 0x442   : > { %v3092_v19 = vpack.c.bf16 %v3066_v2, %v3064_v5 }
 0x449   : > { %v3069_v6 = vpop.f32.mrf.mxu3 }
 0x451   : > { %v3071_v18 = vpop.f32.mrf.mxu3 }
 0x452   : > { %v3093_v46 = vpack.c.bf16 %v3071_v18, %v3069_v6 }
 0x459   : > { %v3074_v39 = vpop.f32.mrf.mxu3 }
 0x461   : > { %v3076_v15 = vpop.f32.mrf.mxu3 }
 0x462   : > { %v3094_v30 = vpack.c.bf16 %v3076_v15, %v3074_v39 }
 0x464   : > { %3108 = vmatpush.bf16.msrb.mxu2 %v3094_v30  ;;  %v3088_v30 = vpack.c.bf16 %v7264_v51, %v7258_v42 }
 0x468   : > { %3109 = vmatpush.bf16.msrb.mxu2 %v3093_v46  ;;  %v3087_v46 = vpack.c.bf16 %v7252_v13, %v7246_v26 }
 0x46c   : > { %3110 = vmatpush.bf16.msrb.mxu2 %v3092_v19 }
 0x470   : > { %3111 = vmatpush.bf16.msrb.mxu2 %v3091_v58 }
 0x474   : > { %3112 = vmatpush.bf16.msrb.mxu2 %v3090_v0 }
 0x478   : > { %3113 = vmatpush.bf16.msrb.mxu2 %v3089_v12 }
 0x47c   : > { %3114 = vmatpush.bf16.msrb.mxu2 %v3088_v30 }
 0x480   : > { %3115 = vmatpush.bf16.msrb.mxu2 %v3087_v46  ;;  %v3104_v19 = vpop.f32.mrf.mxu1 }
 0x483   : > { %3116 = vmatmul.bf16.vlgmr.msrb.gmra.mxu2 %v9183_v38 }
 0x488   : > { %v3106_v58 = vpop.f32.mrf.mxu1 }
 0x506   : > { %v3117_v62 = vpop.f32.mrf.mxu2 }
 0x507   : > { %v3118_v20 = vadd.f32 %v3117_v62, %v3104_v19 }
 0x509   : > { %v3121_v63 = vmul.f32 0.00390625, %v3118_v20 }
 0x50b   : > { %v7293_v35 = vperm.slane %v3121_v63, 0 }
 0x50d   : > { %v7297_v12 = vsub.f32 %v7238_v55, %v7293_v35  ;;  %v7301_v30 = vsub.f32 %v7240_v48, %v7293_v35  ;;  %v7304_v46 = vsub.f32 %v3074_v39, %v7293_v35  ;;  %v7307_v34 = vsub.f32 %v3076_v15, %v7293_v35 }
 0x50e   : > { %v3119_v0 = vpop.f32.mrf.mxu2  ;;  %v7311_v20 = vsub.f32 %v7229_v54, %v7293_v35  ;;  %v7315_v62 = vsub.f32 %v7235_v10, %v7293_v35  ;;  %v7322_v48 = vsub.f32 %v3069_v6, %v7293_v35  ;;  %v7325_v15 = vsub.f32 %v3071_v18, %v7293_v35 }
 0x50f   : > { %v3169_v63 = vmul.f32 %v7297_v12, %v7297_v12  ;;  %v3170_v55 = vmul.f32 %v7301_v30, %v7301_v30  ;;  %v7329_v54 = vsub.f32 %v7220_v33, %v7293_v35  ;;  %v7333_v10 = vsub.f32 %v7226_v57, %v7293_v35 }
 0x510   : > { %v3185_v39 = vmul.f32 %v7304_v46, %v7304_v46  ;;  %v3186_v19 = vmul.f32 %v7307_v34, %v7307_v34  ;;  %v7340_v6 = vsub.f32 %v3064_v5, %v7293_v35  ;;  %v3167_v18 = vmul.f32 %v7311_v20, %v7311_v20 }
 0x511   : > { %v3168_v33 = vmul.f32 %v7315_v62, %v7315_v62  ;;  %v3194_v58 = vpack.c.bf16 %v3170_v55, %v3169_v63  ;;  %v7347_v0 = vsub.f32 %v3066_v2, %v7293_v35  ;;  %v3183_v57 = vmul.f32 %v7322_v48, %v7322_v48 }
 0x512   : > { %v3184_v27 = vmul.f32 %v7325_v15, %v7325_v15  ;;  %v3202_v36 = vpack.c.bf16 %v3186_v19, %v3185_v39  ;;  %v7355_v5 = vsub.f32 %v7211_v22, %v7293_v35  ;;  %v7359_v4 = vsub.f32 %v7217_v50, %v7293_v35 }
 0x513   : > { %3203 = vmatpush.bf16.msra.mxu1 %v3194_v58  ;;  %v7362_v2 = vsub.f32 %v3059_v1, %v7293_v35  ;;  %v3165_v63 = vmul.f32 %v7329_v54, %v7329_v54  ;;  %v3166_v55 = vmul.f32 %v7333_v10, %v7333_v10  ;;  %v3193_v39 = vpack.c.bf16 %v3168_v33, %v3167_v18 }
 0x514   : > { %3216 = vmatpush.bf16.msra.mxu2 %v3202_v36  ;;  %v7370_v19 = vsub.f32 %v7275_v49, %v7293_v35  ;;  %v3181_v22 = vmul.f32 %v7340_v6, %v7340_v6  ;;  %v3182_v36 = vmul.f32 %v7347_v0, %v7347_v0  ;;  %v3201_v50 = vpack.c.bf16 %v3184_v27, %v3183_v57 }
 0x515   : > { %v7378_v1 = vsub.f32 %v7202_v29, %v7293_v35  ;;  %v7382_v58 = vsub.f32 %v7208_v14, %v7293_v35  ;;  %v7386_v49 = vsub.f32 %v7271_v17, %v7293_v35  ;;  %v3163_v18 = vmul.f32 %v7355_v5, %v7355_v5 }
 0x516   : > { %v3164_v27 = vmul.f32 %v7359_v4, %v7359_v4  ;;  %v3192_v33 = vpack.c.bf16 %v3166_v55, %v3165_v63  ;;  %v7394_v29 = vsub.f32 %v7273_v3, %v7293_v35  ;;  %v3179_v14 = vmul.f32 %v7362_v2, %v7362_v2 }
 0x517   : > { %3204 = vmatpush.bf16.msra.mxu1 %v3193_v39  ;;  %v3180_v57 = vmul.f32 %v7370_v19, %v7370_v19  ;;  %v3200_v39 = vpack.c.bf16 %v3182_v36, %v3181_v22  ;;  %v7402_v17 = vsub.f32 %v7193_v8, %v7293_v35  ;;  %v7410_v3 = vsub.f32 %v7267_v53, %v7293_v35 }
 0x518   : > { %3217 = vmatpush.bf16.msra.mxu2 %v3201_v50  ;;  %v7406_v50 = vsub.f32 %v7199_v44, %v7293_v35  ;;  %v3161_v63 = vmul.f32 %v7378_v1, %v7378_v1  ;;  %v3162_v55 = vmul.f32 %v7382_v58, %v7382_v58  ;;  %v3191_v22 = vpack.c.bf16 %v3164_v27, %v3163_v18 }
 0x519   : > { %v7418_v8 = vsub.f32 %v7269_v16, %v7293_v35  ;;  %v3177_v44 = vmul.f32 %v7386_v49, %v7386_v49  ;;  %v3178_v36 = vmul.f32 %v7394_v29, %v7394_v29  ;;  %v7426_v53 = vsub.f32 %v7184_v21, %v7293_v35 }
 0x51a   : > { %v7434_v16 = vsub.f32 %v7258_v42, %v7293_v35  ;;  %v3159_v18 = vmul.f32 %v7402_v17, %v7402_v17  ;;  %v3160_v27 = vmul.f32 %v7406_v50, %v7406_v50  ;;  %v7442_v21 = vsub.f32 %v7264_v51, %v7293_v35 }
 0x51b   : > { %3205 = vmatpush.bf16.msra.mxu1 %v3192_v33  ;;  %v3199_v33 = vpack.c.bf16 %v3180_v57, %v3179_v14  ;;  %v3190_v14 = vpack.c.bf16 %v3162_v55, %v3161_v63  ;;  %v3176_v57 = vmul.f32 %v7418_v8, %v7418_v8  ;;  %v3123_v42 = vsub.f32 %v7175_v28, %v7293_v35 }
 0x51c   : > { %3218 = vmatpush.bf16.msra.mxu2 %v3200_v39  ;;  %v7430_v39 = vsub.f32 %v7190_v9, %v7293_v35  ;;  %v3175_v9 = vmul.f32 %v7410_v3, %v7410_v3  ;;  %v3139_v63 = vsub.f32 %v7246_v26, %v7293_v35  ;;  %v3157_v51 = vmul.f32 %v7426_v53, %v7426_v53 }
 0x51d   : > { %v3189_v24 = vpack.c.bf16 %v3160_v27, %v3159_v18  ;;  %v3173_v28 = vmul.f32 %v7434_v16, %v7434_v16  ;;  %v3155_v26 = vmul.f32 %v3123_v42, %v3123_v42 }
 0x51e   : > { %v3158_v55 = vmul.f32 %v7430_v39, %v7430_v39  ;;  %v3171_v56 = vmul.f32 %v3139_v63, %v3139_v63 }
 0x51f   : > { %3206 = vmatpush.bf16.msra.mxu1 %v3191_v22  ;;  %v3198_v22 = vpack.c.bf16 %v3178_v36, %v3177_v44  ;;  %v3140_v44 = vsub.f32 %v7252_v13, %v7293_v35  ;;  %v3197_v36 = vpack.c.bf16 %v3176_v57, %v3175_v9 }
 0x520   : > { %3219 = vmatpush.bf16.msra.mxu2 %v3199_v33  ;;  %v3124_v33 = vsub.f32 %v7181_v25, %v7293_v35  ;;  %v3174_v25 = vmul.f32 %v7442_v21, %v7442_v21 }
 0x521   : > { %v3172_v37 = vmul.f32 %v3140_v44, %v3140_v44 }
 0x522   : > { %v3196_v45 = vpack.c.bf16 %v3174_v25, %v3173_v28 }
 0x523   : > { %3207 = vmatpush.bf16.msra.mxu1 %v3190_v14  ;;  %v3156_v14 = vmul.f32 %v3124_v33, %v3124_v33  ;;  %v3195_v27 = vpack.c.bf16 %v3172_v37, %v3171_v56 }
 0x524   : > { %3220 = vmatpush.bf16.msra.mxu2 %v3198_v22  ;;  %v3188_v22 = vpack.c.bf16 %v3158_v55, %v3157_v51 }
 0x525   : > { %v3187_v18 = vpack.c.bf16 %v3156_v14, %v3155_v26 }
 0x527   : > { %3208 = vmatpush.bf16.msra.mxu1 %v3189_v24 }
 0x528   : > { %3221 = vmatpush.bf16.msra.mxu2 %v3197_v36 }
 0x52b   : > { %3209 = vmatpush.bf16.msra.mxu1 %v3188_v22 }
 0x52c   : > { %3222 = vmatpush.bf16.msra.mxu2 %v3196_v45 }
 0x52f   : > { %3210 = vmatpush.bf16.msra.mxu1 %v3187_v18 }
 0x530   : > { %3223 = vmatpush.bf16.msra.mxu2 %v3195_v27 }
 0x532   : > { %3211 = vmatmul.bf16.vlgmr.msra.gmra.mxu1 %v9183_v38 }
 0x533   : > { %4619 = vmatpush.bf16.msrb.mxu1 %v7280_v52  ;;  %3224 = vmatmul.bf16.vlgmr.msra.gmra.mxu2 %v9183_v38 }
 0x5af   : > { %v3212_v35 = vpop.f32.mrf.mxu1 }
 0x5b6   : > { %v3225_v24 = vpop.f32.mrf.mxu2 }
 0x5b7   : > { %v3226_v13 = vadd.f32 %v3225_v24, %v3212_v35  ;;  %v3214_v9 = vpop.f32.mrf.mxu1 }
 0x5b9   : > { %v3229_v57 = vmul.f32 0.003921569, %v3226_v13 }
 0x5bb   : > { %4641 = vrsqrt.f32 %v3229_v57  ;;  %vm3237_vm7 = vcmp.eq.f32.partialorder %v3229_v57, inf  ;;  %v3240_v52 = vand.u32 2147483648, %v3229_v57  ;;  %vm3239_vm8 = vcmp.eq.f32.partialorder %v3229_v57, 0.0 }
 0x5be   : > { %v3227_v51 = vpop.f32.mrf.mxu2 }
 0x5bf   : > { %v7482_v51 = vld [vmem:[%s8631_s11] ss:$0 sm:$0xff] }
 0x5c1   : > { %v4642_v55 = vpop.eup %4641 }
 0x5c2   : > { %v3231_v28 = vmul.f32 %v4642_v55, %v3229_v57 }
 0x5c4   : > { %v3232_v45 = vmul.f32 %v4642_v55, %v3231_v28 }
 0x5c6   : > { %v3233_v25 = vmul.f32 0.5, %v3232_v45 }
 0x5c8   : > { %v3234_v37 = vsub.f32 1.5, %v3233_v25 }
 0x5ca   : > { %v3235_v56 = vmul.f32 %v4642_v55, %v3234_v37 }
 0x5cc   : > { %v3236_v36 = vmul.f32 %v3235_v56, %v3229_v57 }
 0x5ce   : > { %v3238_v26 = vsel %vm3237_vm7, %v3229_v57, %v3236_v36 }
 0x5cf   : > { %v3241_v14 = vsel %vm3239_vm8, %v3240_v52, %v3238_v26  ;;  %v7536_v52 = vld [vmem:[%s8632_s12] ss:$0 sm:$0xff] }
 0x5d0   : > { %v3242_v38 = vadd.f32 1e-05, %v3241_v14 }
 0x5d2   : > { %4643 = vrcp.f32 %v3242_v38 }
 0x5d8   : > { %v4644_v22 = vpop.eup %4643 }
 0x5d9   : > { %v7467_v18 = vperm.slane %v4644_v22, 0 }
 0x5db   : > { %v3245_v27 = vmul.f32 %v7467_v18, %v3123_v42  ;;  %v3246_v35 = vmul.f32 %v7467_v18, %v3124_v33  ;;  %v3247_v24 = vmul.f32 %v7467_v18, %v7426_v53  ;;  %v3248_v13 = vmul.f32 %v7467_v18, %v7430_v39 }
 0x5dc   : > { %v3249_v9 = vmul.f32 %v7467_v18, %v7402_v17  ;;  %v3250_v57 = vmul.f32 %v7467_v18, %v7406_v50  ;;  %v3251_v42 = vmul.f32 %v7467_v18, %v7378_v1  ;;  %v3259_v53 = vmul.f32 %v7467_v18, %v7297_v12 }
 0x5dd   : > { %v3260_v39 = vmul.f32 %v7467_v18, %v7301_v30  ;;  %v3261_v33 = vmul.f32 %v7467_v18, %v3139_v63  ;;  %v3262_v17 = vmul.f32 %v7467_v18, %v3140_v44  ;;  %v3263_v50 = vmul.f32 %v7467_v18, %v7434_v16 }
 0x5de   : > { %v3264_v55 = vmul.f32 %v7467_v18, %v7442_v21  ;;  %v3265_v28 = vmul.f32 %v7467_v18, %v7410_v3  ;;  %v3266_v1 = vmul.f32 %v7467_v18, %v7418_v8  ;;  %v3267_v12 = vmul.f32 %v7467_v18, %v7386_v49 }
 0x5df   : > { %v3268_v30 = vmul.f32 %v7467_v18, %v7394_v29  ;;  %v3269_v63 = vmul.f32 %v7467_v18, %v7362_v2  ;;  %v3270_v16 = vmul.f32 %v7467_v18, %v7370_v19  ;;  %v3271_v21 = vmul.f32 %v7467_v18, %v7340_v6 }
 0x5e0   : > { %v3272_v3 = vmul.f32 %v7467_v18, %v7347_v0  ;;  %v3273_v8 = vmul.f32 %v7467_v18, %v7322_v48  ;;  %v3274_v49 = vmul.f32 %v7467_v18, %v7325_v15  ;;  %v3275_v29 = vmul.f32 %v7467_v18, %v7304_v46 }
 0x5e1   : > { %v3276_v2 = vmul.f32 %v7467_v18, %v7307_v34  ;;  %v3281_v19 = vmul.f32 %v7482_v51, %v3245_v27  ;;  %v3282_v44 = vmul.f32 %v7482_v51, %v3246_v35  ;;  %v3283_v6 = vmul.f32 %v7482_v51, %v3247_v24 }
 0x5e2   : > { %v3295_v0 = vmul.f32 %v7482_v51, %v3259_v53  ;;  %v3296_v45 = vmul.f32 %v7482_v51, %v3260_v39  ;;  %v3297_v48 = vmul.f32 %v7482_v51, %v3261_v33  ;;  %v3298_v15 = vmul.f32 %v7482_v51, %v3262_v17 }
 0x5e3   : > { %v3299_v25 = vmul.f32 %v7482_v51, %v3263_v50  ;;  %v3300_v46 = vmul.f32 %v7482_v51, %v3264_v55  ;;  %v3301_v34 = vmul.f32 %v7482_v51, %v3265_v28  ;;  %v3302_v37 = vmul.f32 %v7482_v51, %v3266_v1 }
 0x5e4   : > { %v3303_v56 = vmul.f32 %v7482_v51, %v3267_v12  ;;  %v3304_v36 = vmul.f32 %v7482_v51, %v3268_v30  ;;  %v3305_v26 = vmul.f32 %v7482_v51, %v3269_v63  ;;  %v3306_v14 = vmul.f32 %v7482_v51, %v3270_v16 }
 0x5e5   : > { %v3307_v38 = vmul.f32 %v7482_v51, %v3271_v21  ;;  %v3308_v22 = vmul.f32 %v7482_v51, %v3272_v3  ;;  %v3309_v27 = vmul.f32 %v7482_v51, %v3273_v8  ;;  %v3310_v35 = vmul.f32 %v7482_v51, %v3274_v49 }
 0x5e6   : > { %v3311_v24 = vmul.f32 %v7482_v51, %v3275_v29  ;;  %v3312_v53 = vmul.f32 %v7482_v51, %v3276_v2  ;;  %v3252_v39 = vmul.f32 %v7467_v18, %v7382_v58  ;;  %v3253_v33 = vmul.f32 %v7467_v18, %v7355_v5 }
 0x5e7   : > { %v3254_v17 = vmul.f32 %v7467_v18, %v7359_v4  ;;  %v3255_v50 = vmul.f32 %v7467_v18, %v7329_v54  ;;  %v3284_v55 = vmul.f32 %v7482_v51, %v3248_v13  ;;  %v3285_v28 = vmul.f32 %v7482_v51, %v3249_v9 }
 0x5e8   : > { %v3286_v1 = vmul.f32 %v7482_v51, %v3250_v57  ;;  %v3287_v12 = vmul.f32 %v7482_v51, %v3251_v42  ;;  %v3317_v30 = vadd.f32 %v7536_v52, %v3281_v19  ;;  %v3318_v58 = vadd.f32 %v7536_v52, %v3282_v44 }
 0x5e9   : > { %v3319_v5 = vadd.f32 %v7536_v52, %v3283_v6  ;;  %v7562_v63 = vadd.f32 %v7536_v52, %v3295_v0  ;;  %v7565_v4 = vadd.f32 %v7536_v52, %v3296_v45  ;;  %v7568_v54 = vadd.f32 %v7536_v52, %v3297_v48 }
 0x5ea   : > { %v7571_v13 = vadd.f32 %v7536_v52, %v3298_v15  ;;  %v7574_v9 = vadd.f32 %v7536_v52, %v3299_v25  ;;  %v7577_v57 = vadd.f32 %v7536_v52, %v3300_v46  ;;  %v7580_v42 = vadd.f32 %v7536_v52, %v3301_v34 }
 0x5eb   : > { %v7583_v16 = vadd.f32 %v7536_v52, %v3302_v37  ;;  %v7586_v21 = vadd.f32 %v7536_v52, %v3303_v56  ;;  %v7589_v3 = vadd.f32 %v7536_v52, %v3304_v36  ;;  %v7592_v8 = vadd.f32 %v7536_v52, %v3305_v26 }
 0x5ec   : > { %v7595_v49 = vadd.f32 %v7536_v52, %v3306_v14  ;;  %v7598_v29 = vadd.f32 %v7536_v52, %v3307_v38  ;;  %v7601_v2 = vadd.f32 %v7536_v52, %v3308_v22  ;;  %v7604_v19 = vadd.f32 %v7536_v52, %v3309_v27 }
 0x5ed   : > { %v7607_v44 = vadd.f32 %v7536_v52, %v3310_v35  ;;  %v7610_v6 = vadd.f32 %v7536_v52, %v3311_v24  ;;  %v7613_v0 = vadd.f32 %v7536_v52, %v3312_v53  ;;  %v3256_v45 = vmul.f32 %v7467_v18, %v7333_v10 }
 0x5ee   : > { %v3288_v48 = vmul.f32 %v7482_v51, %v3252_v39  ;;  %v3320_v15 = vadd.f32 %v7536_v52, %v3284_v55  ;;  %v3257_v25 = vmul.f32 %v7467_v18, %v7311_v20  ;;  %v3289_v46 = vmul.f32 %v7482_v51, %v3253_v33 }
 0x5ef   : > { %v3321_v34 = vadd.f32 %v7536_v52, %v3285_v28  ;;  %v4545_v37 = vmul.f32 -1.442695, %v3317_v30  ;;  %v3258_v56 = vmul.f32 %v7467_v18, %v7315_v62  ;;  %v3290_v36 = vmul.f32 %v7482_v51, %v3254_v17 }
 0x5f0   : > { %v3322_v26 = vadd.f32 %v7536_v52, %v3286_v1  ;;  %v4546_v10 = vmul.f32 -1.442695, %v3318_v58  ;;  %v3291_v14 = vmul.f32 %v7482_v51, %v3255_v50  ;;  %v3323_v38 = vadd.f32 %v7536_v52, %v3287_v12 }
 0x5f1   : > { %v4547_v22 = vmul.f32 -1.442695, %v3319_v5  ;;  %v3292_v20 = vmul.f32 %v7482_v51, %v3256_v45  ;;  %v3324_v27 = vadd.f32 %v7536_v52, %v3288_v48  ;;  %v4548_v35 = vmul.f32 -1.442695, %v3320_v15 }
 0x5f2   : > { %v3293_v24 = vmul.f32 %v7482_v51, %v3257_v25  ;;  %v3325_v53 = vadd.f32 %v7536_v52, %v3289_v46  ;;  %4645 = vpow2.f32 %v4545_v37  ;;  %v4549_v62 = vmul.f32 -1.442695, %v3321_v34 }
 0x5f3   : > { %v3294_v18 = vmul.f32 %v7482_v51, %v3258_v56  ;;  %v3326_v39 = vadd.f32 %v7536_v52, %v3290_v36  ;;  %4647 = vpow2.f32 %v4546_v10  ;;  %v4550_v33 = vmul.f32 -1.442695, %v3322_v26 }
 0x5f4   : > { %v3327_v17 = vadd.f32 %v7536_v52, %v3291_v14  ;;  %4649 = vpow2.f32 %v4547_v22  ;;  %v4551_v50 = vmul.f32 -1.442695, %v3323_v38  ;;  %v3328_v55 = vadd.f32 %v7536_v52, %v3292_v20 }
 0x5f5   : > { %4651 = vpow2.f32 %v4548_v35  ;;  %v4552_v28 = vmul.f32 -1.442695, %v3324_v27  ;;  %v3329_v1 = vadd.f32 %v7536_v52, %v3293_v24  ;;  %v4553_v12 = vmul.f32 -1.442695, %v3325_v53 }
 0x5f6   : > { %4653 = vpow2.f32 %v4549_v62  ;;  %v3330_v30 = vadd.f32 %v7536_v52, %v3294_v18  ;;  %v4554_v51 = vmul.f32 -1.442695, %v3326_v39  ;;  %v4555_v5 = vmul.f32 -1.442695, %v3327_v17 }
 0x5f7   : > { %4655 = vpow2.f32 %v4550_v33  ;;  %v4556_v48 = vmul.f32 -1.442695, %v3328_v55  ;;  %v4557_v25 = vmul.f32 -1.442695, %v3329_v1  ;;  %v4559_v56 = vmul.f32 -1.442695, %v7562_v63 }
 0x5f8   : > { %v4646_v58 = vpop.eup %4645  ;;  %4657 = vpow2.f32 %v4551_v50  ;;  %v4558_v34 = vmul.f32 -1.442695, %v3330_v30  ;;  %v4560_v52 = vmul.f32 -1.442695, %v7565_v4  ;;  %v4561_v10 = vmul.f32 -1.442695, %v7568_v54 }
 0x5f9   : > { %v4648_v45 = vpop.eup %4647  ;;  %4659 = vpow2.f32 %v4552_v28  ;;  %v4562_v38 = vmul.f32 -1.442695, %v7571_v13  ;;  %v4563_v20 = vmul.f32 -1.442695, %v7574_v9  ;;  %v4564_v63 = vmul.f32 -1.442695, %v7577_v57 }
 0x5fa   : > { %v4650_v15 = vpop.eup %4649  ;;  %4661 = vpow2.f32 %v4553_v12  ;;  %v4565_v4 = vmul.f32 -1.442695, %v7580_v42  ;;  %v4566_v54 = vmul.f32 -1.442695, %v7583_v16  ;;  %v4567_v13 = vmul.f32 -1.442695, %v7586_v21 }
 0x5fb   : > { %v4652_v46 = vpop.eup %4651  ;;  %4663 = vpow2.f32 %v4554_v51  ;;  %v4568_v9 = vmul.f32 -1.442695, %v7589_v3  ;;  %v4569_v57 = vmul.f32 -1.442695, %v7592_v8  ;;  %v4570_v42 = vmul.f32 -1.442695, %v7595_v49 }
 0x5fc   : > { %v4654_v37 = vpop.eup %4653  ;;  %4665 = vpow2.f32 %v4555_v5  ;;  %v4571_v16 = vmul.f32 -1.442695, %v7598_v29  ;;  %v4572_v21 = vmul.f32 -1.442695, %v7601_v2  ;;  %v4573_v3 = vmul.f32 -1.442695, %v7604_v19 }
 0x5fd   : > { %v4656_v36 = vpop.eup %4655  ;;  %4667 = vpow2.f32 %v4556_v48  ;;  %v7654_v28 = vadd.f32 1.0, %v4646_v58  ;;  %v7656_v1 = vadd.f32 1.0, %v4648_v45  ;;  %v4574_v29 = vmul.f32 -1.442695, %v7607_v44 }
 0x5fe   : > { %v4658_v26 = vpop.eup %4657  ;;  %4669 = vpow2.f32 %v4557_v25  ;;  %v7659_v12 = vadd.f32 1.0, %v4650_v15  ;;  %v4575_v2 = vmul.f32 -1.442695, %v7610_v6  ;;  %v4576_v19 = vmul.f32 -1.442695, %v7613_v0 }
 0x5ff   : > { %v4660_v14 = vpop.eup %4659  ;;  %4671 = vpow2.f32 %v4558_v34  ;;  %v7663_v51 = vadd.f32 1.0, %v4652_v46  ;;  %v7665_v5 = vadd.f32 1.0, %v4654_v37  ;;  %v7667_v48 = vadd.f32 1.0, %v4656_v36 }
 0x600   : > { %v4662_v22 = vpop.eup %4661  ;;  %4673 = vpow2.f32 %v4559_v56  ;;  %v7669_v45 = vadd.f32 1.0, %v4658_v26  ;;  %v7672_v15 = vadd.f32 1.0, %v4660_v14  ;;  %vm3482_vm9 = vweird.f32 %v7654_v28 }
 0x601   : > { %v4664_v27 = vpop.eup %4663  ;;  %4675 = vpow2.f32 %v4560_v52  ;;  %v7674_v25 = vadd.f32 1.0, %v4662_v22  ;;  %vm3497_vm11 = vweird.f32 %v7656_v1 }
 0x602   : > { %v4666_v35 = vpop.eup %4665  ;;  %4677 = vpow2.f32 %v4561_v10  ;;  %v7676_v34 = vadd.f32 1.0, %v4664_v27  ;;  %vm3572_vm0 = vweird.f32 %v7669_v45  ;;  %vm3587_vm2 = vweird.f32 %v7672_v15 }
 0x603   : > { %v4668_v24 = vpop.eup %4667  ;;  %4679 = vpow2.f32 %v4562_v38  ;;  %v7681_v0 = vadd.f32 1.0, %v4666_v35  ;;  %v3488_v35 = vand.u32 2147483648, %v7654_v28 }
 0x604   : > { %v4670_v53 = vpop.eup %4669  ;;  %4681 = vpow2.f32 %v4563_v20  ;;  %v7683_v46 = vadd.f32 1.0, %v4668_v24 }
 0x605   : > { %v4672_v62 = vpop.eup %4671  ;;  %4683 = vpow2.f32 %v4564_v63  ;;  %v7685_v37 = vadd.f32 1.0, %v4670_v53  ;;  %v3486_v63 = vand.u32 2147483647, %v7654_v28  ;;  %v3501_v53 = vand.u32 2147483647, %v7656_v1 }
 0x606   : > { %v4674_v18 = vpop.eup %4673  ;;  %4685 = vpow2.f32 %v4565_v4  ;;  %v7690_v36 = vadd.f32 1.0, %v4672_v62 }
 0x607   : > { %v4676_v39 = vpop.eup %4675  ;;  %4687 = vpow2.f32 %v4566_v54  ;;  %v7692_v52 = vadd.f32 1.0, %v4674_v18  ;;  %vm7731_vm10 = vcmp.eq.f32.partialorder %v3486_v63, 8.507059e+37  ;;  %vm7739_vm12 = vcmp.eq.f32.partialorder %v3501_v53, 8.507059e+37 }
 0x608   : > { %v4678_v33 = vpop.eup %4677  ;;  %4689 = vpow2.f32 %v4567_v13  ;;  %v7694_v26 = vadd.f32 1.0, %v4676_v39  ;;  %v3576_v53 = vand.u32 2147483647, %v7669_v45 }
 0x609   : > { %v4680_v17 = vpop.eup %4679  ;;  %4691 = vpow2.f32 %v4568_v9  ;;  %v7698_v14 = vadd.f32 1.0, %v4678_v33  ;;  %v3503_v33 = vand.u32 2147483648, %v7656_v1 }
 0x60a   : > { %v4682_v50 = vpop.eup %4681  ;;  %4693 = vpow2.f32 %v4569_v57  ;;  %v7700_v38 = vadd.f32 1.0, %v4680_v17  ;;  %vm3577_vm8 = vcmp.eq.f32.partialorder %v3576_v53, 8.507059e+37 }
 0x60b   : > { %v4684_v55 = vpop.eup %4683  ;;  %4695 = vpow2.f32 %v4570_v42  ;;  %v7702_v22 = vadd.f32 1.0, %v4682_v50  ;;  %v3489_v50 = vor.u32 1.1754944e-38, %v3488_v35 }
 0x60c   : > { %v4686_v8 = vpop.eup %4685  ;;  %4697 = vpow2.f32 %v4571_v16  ;;  %v7706_v27 = vadd.f32 1.0, %v4684_v55 }
 0x60d   : > { %v4688_v49 = vpop.eup %4687  ;;  %4699 = vpow2.f32 %v4572_v21  ;;  %v7710_v24 = vadd.f32 1.0, %v4686_v8 }
 0x60e   : > { %v4690_v30 = vpop.eup %4689  ;;  %4701 = vpow2.f32 %v4573_v3  ;;  %v7712_v54 = vadd.f32 1.0, %v4688_v49 }
 0x60f   : > { %v4692_v58 = vpop.eup %4691  ;;  %4703 = vrcp.f32 %v7654_v28  ;;  %v7716_v62 = vadd.f32 1.0, %v4690_v30 }
 0x610   : > { %v4694_v44 = vpop.eup %4693  ;;  %4705 = vrcp.f32 %v7656_v1  ;;  %v7718_v9 = vadd.f32 1.0, %v4692_v58  ;;  %v3504_v58 = vor.u32 1.1754944e-38, %v3503_v33 }
 0x611   : > { %v7679_v6 = vpop.eup %4695  ;;  %4707 = vrcp.f32 %v7659_v12  ;;  %v7724_v39 = vadd.f32 1.0, %v4694_v44 }
 0x612   : > { %v7688_v56 = vpop.eup %4697  ;;  %4709 = vpow2.f32 %v4574_v29 }
 0x613   : > { %v7696_v10 = vpop.eup %4699  ;;  %4711 = vpow2.f32 %v4575_v2 }
 0x614   : > { %v7704_v20 = vpop.eup %4701  ;;  %4713 = vpow2.f32 %v4576_v19 }
 0x615   : > { %v4704_v4 = vpop.eup %4703  ;;  %4715 = vrcp.f32 %v7669_v45 }
 0x616   : > { %v4706_v13 = vpop.eup %4705  ;;  %v3478_v18 = vmul.f32 %v4704_v4, %v7654_v28  ;;  %4717 = vrcp.f32 %v7672_v15  ;;  %vm3483_vm13 = vweird.f32 %v4704_v4 }
 0x617   : > { %v7722_v57 = vpop.eup %4707  ;;  %v3493_v42 = vmul.f32 %v4706_v13, %v7656_v1  ;;  %4719 = vrcp.f32 %v7663_v51  ;;  %vm3498_vm15 = vweird.f32 %v4706_v13  ;;  %vm3484_vm3 = vmor %vm3482_vm9, %vm3483_vm13  ;;  %vm3512_vm13 = vweird.f32 %v7659_v12 }
 0x618   : > { %v7729_v16 = vpop.eup %4709  ;;  %v3479_v17 = vsub.f32 1.0, %v3478_v18  ;;  %v3508_v49 = vmul.f32 %v7722_v57, %v7659_v12  ;;  %4721 = vrcp.f32 %v7665_v5  ;;  %vm3499_vm5 = vmor %vm3497_vm11, %vm3498_vm15 }
 0x619   : > { %v7736_v3 = vpop.eup %4711  ;;  %v3494_v55 = vsub.f32 1.0, %v3493_v42  ;;  %4723 = vrcp.f32 %v7667_v48  ;;  %v3578_v42 = vand.u32 2147483648, %v7669_v45 }
 0x61a   : > { %v7745_v29 = vpop.eup %4713  ;;  %v3480_v30 = vmul.f32 %v4704_v4, %v3479_v17  ;;  %4725 = vrcp.f32 %v7674_v25 }
 0x61b   : > { %v4716_v2 = vpop.eup %4715  ;;  %v3495_v19 = vmul.f32 %v4706_v13, %v3494_v55  ;;  %v3509_v55 = vsub.f32 1.0, %v3508_v49  ;;  %4727 = vrcp.f32 %v7676_v34 }
 0x61c   : > { %v4718_v44 = vpop.eup %4717  ;;  %v3568_v63 = vmul.f32 %v4716_v2, %v7669_v45  ;;  %v3481_v35 = vadd.f32 %v4704_v4, %v3480_v30  ;;  %v3591_v30 = vand.u32 2147483647, %v7672_v15  ;;  %vm3573_vm4 = vweird.f32 %v4716_v2 }
 0x61d   : > { %v3496_v18 = vadd.f32 %v4706_v13, %v3495_v19  ;;  %v3583_v17 = vmul.f32 %v4718_v44, %v7672_v15  ;;  %v7761_v43 = vpop.eup %4719  ;;  %vm3588_vm7 = vweird.f32 %v4718_v44  ;;  %v3510_v7 = vmul.f32 %v7722_v57, %v3509_v55  ;;  %vm3574_vm9 = vmor %vm3572_vm0, %vm3573_vm4 }
 0x61e   : > { %v3569_v33 = vsub.f32 1.0, %v3568_v63  ;;  %v3485_v23 = vsel %vm3484_vm3, %v4704_v4, %v3481_v35  ;;  %v7766_v49 = vpop.eup %4721  ;;  %v3593_v63 = vand.u32 2147483648, %v7672_v15  ;;  %4729 = vrcp.f32 %v7681_v0  ;;  %vm3589_vm11 = vmor %vm3587_vm2, %vm3588_vm7 }
 0x61f   : > { %v3490_v28 = vsel %vm7731_vm10, %v3489_v50, %v3485_v23  ;;  %v3500_v19 = vsel %vm3499_vm5, %v4706_v13, %v3496_v18  ;;  %v3584_v61 = vsub.f32 1.0, %v3583_v17  ;;  %v7772_v41 = vpop.eup %4723  ;;  %v3579_v13 = vor.u32 1.1754944e-38, %v3578_v42 }
 0x620   : > { %v3505_v4 = vsel %vm7739_vm12, %v3504_v58, %v3500_v19  ;;  %v3570_v1 = vmul.f32 %v4716_v2, %v3569_v33  ;;  %vm3592_vm10 = vcmp.eq.f32.partialorder %v3591_v30, 8.507059e+37  ;;  %4731 = vrcp.f32 %v7683_v46  ;;  %v7786_v58 = vpop.eup %4725 }
 0x621   : > { %v3957_v35 = vpack.c.bf16 %v3505_v4, %v3490_v28  ;;  %v3585_v31 = vmul.f32 %v4718_v44, %v3584_v61  ;;  %v3523_v61 = vmul.f32 %v7761_v43, %v7663_v51  ;;  %v3594_v8 = vor.u32 1.1754944e-38, %v3593_v63  ;;  %v7795_v33 = vpop.eup %4727 }
 0x622   : > { %v3571_v23 = vadd.f32 %v4716_v2, %v3570_v1  ;;  %vm3513_vm12 = vweird.f32 %v7722_v57  ;;  %4733 = vrcp.f32 %v7685_v37  ;;  %v3516_v15 = vand.u32 2147483647, %v7659_v12  ;;  %v4618_v1 = vld [vmem:[%s8633_s13] sm:$0xff] }
 0x623   : > { %4577 = vmatmul.msk.bf16.vlgmr.msrb.gmra.mxu0 %vm8813_vm14, %v3957_v35  ;;  %v3586_v21 = vadd.f32 %v4718_v44, %v3585_v31  ;;  %v3511_v31 = vadd.f32 %v7722_v57, %v3510_v7  ;;  %v3524_v18 = vsub.f32 1.0, %v3523_v61  ;;  %vm3528_vm15 = vweird.f32 %v7761_v43  ;;  %vm7800_vm0 = vmor %vm3512_vm13, %vm3513_vm12  ;;  %4620 = vmatpush.bf16.msrb.mxu3 %v4618_v1 }
 0x624   : > { %v3575_v50 = vsel %vm3574_vm9, %v4716_v2, %v3571_v23  ;;  %v3518_v2 = vand.u32 2147483648, %v7659_v12  ;;  %4735 = vrcp.f32 %v7690_v36  ;;  %v3533_v30 = vand.u32 2147483648, %v7663_v51  ;;  %v7808_v28 = vpop.eup %4729  ;;  %4227 = vmatpush.bf16.msrb.mxu2 %v4618_v1 }
 0x625   : > { %v3580_v53 = vsel %vm3577_vm8, %v3579_v13, %v3575_v50  ;;  %v3590_v45 = vsel %vm3589_vm11, %v4718_v44, %v3586_v21  ;;  %v3525_v55 = vmul.f32 %v7761_v43, %v3524_v18  ;;  %v3531_v44 = vand.u32 2147483647, %v7663_v51 }
 0x626   : > { %v3595_v42 = vsel %vm3592_vm10, %v3594_v8, %v3590_v45  ;;  %v3598_v12 = vmul.f32 %v7786_v58, %v7674_v25  ;;  %4737 = vrcp.f32 %v7692_v52  ;;  %v3515_v19 = vsel %vm7800_vm0, %v7722_v57, %v3511_v31  ;;  %v7820_v63 = vpop.eup %4731 }
 0x627   : > { %v3960_v17 = vpack.c.bf16 %v3595_v42, %v3580_v53  ;;  %v3526_v4 = vadd.f32 %v7761_v43, %v3525_v55  ;;  %vm3527_vm3 = vweird.f32 %v7663_v51  ;;  %v7823_v35 = vadd.f32 1.0, %v7679_v6 }
 0x628   : > { %4739 = vrcp.f32 %v7694_v26  ;;  %v3519_v23 = vor.u32 1.1754944e-38, %v3518_v2  ;;  %vm7828_vm5 = vmor %vm3527_vm3, %vm3528_vm15  ;;  %v3599_v13 = vsub.f32 1.0, %v3598_v12  ;;  %vm3517_vm2 = vcmp.eq.f32.partialorder %v3516_v15, 8.507059e+37  ;;  %v7838_v21 = vpop.eup %4733 }
 0x629   : > { %4580 = vmatmul.msk.bf16.vlgmr.msrb.gmra.mxu1 %vm8813_vm14, %v3960_v17  ;;  %4741 = vrcp.f32 %v7698_v14  ;;  %v3530_v51 = vsel %vm7828_vm5, %v7761_v43, %v3526_v4  ;;  %v3613_v6 = vmul.f32 %v7795_v33, %v7676_v34  ;;  %vm3532_vm4 = vcmp.eq.f32.partialorder %v3531_v44, 8.507059e+37 }
 0x62a   : > { %v3520_v61 = vsel %vm3517_vm2, %v3519_v23, %v3515_v19  ;;  %v3534_v50 = vor.u32 1.1754944e-38, %v3533_v30  ;;  %v3600_v8 = vmul.f32 %v7786_v58, %v3599_v13  ;;  %vm3602_vm7 = vweird.f32 %v7674_v25  ;;  %v7844_v43 = vpop.eup %4735 }
 0x62b   : > { %vm3603_vm8 = vweird.f32 %v7786_v58  ;;  %v3606_v53 = vand.u32 2147483647, %v7674_v25  ;;  %v3614_v45 = vsub.f32 1.0, %v3613_v6  ;;  %v3608_v42 = vand.u32 2147483648, %v7674_v25 }
 0x62c   : > { %v3535_v31 = vsel %vm3532_vm4, %v3534_v50, %v3530_v51  ;;  %v3601_v18 = vadd.f32 %v7786_v58, %v3600_v8  ;;  %vm3618_vm9 = vweird.f32 %v7795_v33  ;;  %v7849_v2 = vpop.eup %4737  ;;  %v3621_v15 = vand.u32 2147483647, %v7676_v34  ;;  %vm7869_vm10 = vmor %vm3602_vm7, %vm3603_vm8 }
 0x62d   : > { %v3615_v17 = vmul.f32 %v7795_v33, %v3614_v45  ;;  %v3623_v55 = vand.u32 2147483648, %v7676_v34  ;;  %v3538_v7 = vmul.f32 %v7766_v49, %v7665_v5  ;;  %v7859_v30 = vadd.f32 1.0, %v7688_v56 }
 0x62e   : > { %v7856_v44 = vpop.eup %4739  ;;  %v7862_v12 = vadd.f32 1.0, %v7696_v10  ;;  %4743 = vrcp.f32 %v7700_v38  ;;  %vm3617_vm11 = vweird.f32 %v7676_v34  ;;  %v3958_v1 = vpack.c.bf16 %v3535_v31, %v3520_v61 }
 0x62f   : > { %v7874_v4 = vpop.eup %4741  ;;  %v3605_v56 = vsel %vm7869_vm10, %v7786_v58, %v3601_v18  ;;  %v3616_v10 = vadd.f32 %v7795_v33, %v3615_v17  ;;  %v3539_v23 = vsub.f32 1.0, %v3538_v7  ;;  %4745 = vrcp.f32 %v7702_v22  ;;  %vm3619_vm12 = vmor %vm3617_vm11, %vm3618_vm9 }
 0x630   : > { %v3609_v57 = vor.u32 1.1754944e-38, %v3608_v42  ;;  %v3624_v25 = vor.u32 1.1754944e-38, %v3623_v55  ;;  %v3553_v34 = vmul.f32 %v7772_v41, %v7667_v48  ;;  %vm3607_vm13 = vcmp.eq.f32.partialorder %v3606_v53, 8.507059e+37 }
 0x631   : > { %v3620_v13 = vsel %vm3619_vm12, %v7795_v33, %v3616_v10  ;;  %vm3622_vm15 = vcmp.eq.f32.partialorder %v3621_v15, 8.507059e+37  ;;  %v3540_v58 = vmul.f32 %v7766_v49, %v3539_v23  ;;  %4747 = vrcp.f32 %v7706_v27 }
 0x632   : > { %v3610_v51 = vsel %vm3607_vm13, %v3609_v57, %v3605_v56  ;;  %v3625_v6 = vsel %vm3622_vm15, %v3624_v25, %v3620_v13  ;;  %v3554_v61 = vsub.f32 1.0, %v3553_v34  ;;  %vm3543_vm0 = vweird.f32 %v7766_v49 }
 0x633   : > { %4578 = vmatmul.msk.bf16.gmra.mxu0 %vm8813_vm14, %v3958_v1  ;;  %v3546_v50 = vand.u32 2147483647, %v7665_v5  ;;  %v3548_v8 = vand.u32 2147483648, %v7665_v5  ;;  %v3628_v45 = vmul.f32 %v7808_v28, %v7681_v0  ;;  %v3541_v33 = vadd.f32 %v7766_v49, %v3540_v58 }
 0x634   : > { %v7894_v53 = vpop.eup %4743  ;;  %v3555_v31 = vmul.f32 %v7772_v41, %v3554_v61  ;;  %v3561_v18 = vand.u32 2147483647, %v7667_v48  ;;  %v3563_v42 = vand.u32 2147483648, %v7667_v48  ;;  %4749 = vrcp.f32 %v7710_v24 }
 0x635   : > { %v3961_v17 = vpack.c.bf16 %v3625_v6, %v3610_v51  ;;  %vm3558_vm3 = vweird.f32 %v7772_v41  ;;  %v3629_v15 = vsub.f32 1.0, %v3628_v45  ;;  %v7902_v55 = vpop.eup %4745  ;;  %4751 = vrcp.f32 %v7712_v54 }
 0x636   : > { %vm3542_vm5 = vweird.f32 %v7665_v5  ;;  %v3556_v7 = vadd.f32 %v7772_v41, %v3555_v31  ;;  %v3643_v19 = vmul.f32 %v7820_v63, %v7683_v46  ;;  %vm7916_vm4 = vcmp.eq.f32.partialorder %v3546_v50, 8.507059e+37 }
 0x637   : > { %vm7912_vm2 = vmor %vm3542_vm5, %vm3543_vm0  ;;  %v3549_v10 = vor.u32 1.1754944e-38, %v3548_v8  ;;  %vm3557_vm7 = vweird.f32 %v7667_v48  ;;  %v3630_v5 = vmul.f32 %v7808_v28, %v3629_v15  ;;  %v7922_v23 = vpop.eup %4747  ;;  %vm7933_vm9 = vcmp.eq.f32.partialorder %v3561_v18, 8.507059e+37 }
 0x638   : > { %v3545_v57 = vsel %vm7912_vm2, %v7766_v49, %v3541_v33  ;;  %vm7929_vm8 = vmor %vm3557_vm7, %vm3558_vm3  ;;  %v3564_v13 = vor.u32 1.1754944e-38, %v3563_v42  ;;  %v3644_v48 = vsub.f32 1.0, %v3643_v19  ;;  %vm3632_vm10 = vweird.f32 %v7681_v0 }
 0x639   : > { %4581 = vmatmul.msk.bf16.gmra.mxu1 %vm8813_vm14, %v3961_v17  ;;  %v3560_v58 = vsel %vm7929_vm8, %v7772_v41, %v3556_v7  ;;  %vm3633_vm11 = vweird.f32 %v7808_v28  ;;  %v3636_v49 = vand.u32 2147483647, %v7681_v0  ;;  %v3631_v51 = vadd.f32 %v7808_v28, %v3630_v5 }
 0x63a   : > { %v3645_v6 = vmul.f32 %v7820_v63, %v3644_v48  ;;  %vm3648_vm12 = vweird.f32 %v7820_v63  ;;  %v3658_v61 = vmul.f32 %v7838_v21, %v7685_v37  ;;  %v7948_v50 = vpop.eup %4749  ;;  %v3550_v41 = vsel %vm7916_vm4, %v3549_v10, %v3545_v57  ;;  %vm7959_vm15 = vmor %vm3632_vm10, %vm3633_vm11 }
 0x63b   : > { %v3638_v8 = vand.u32 2147483648, %v7681_v0  ;;  %vm3647_vm13 = vweird.f32 %v7683_v46  ;;  %v3653_v45 = vand.u32 2147483648, %v7683_v46  ;;  %v7955_v33 = vpop.eup %4751  ;;  %v3565_v31 = vsel %vm7933_vm9, %v3564_v13, %v3560_v58 }
 0x63c   : > { %v3646_v42 = vadd.f32 %v7820_v63, %v3645_v6  ;;  %v3651_v17 = vand.u32 2147483647, %v7683_v46  ;;  %v3673_v0 = vmul.f32 %v7844_v43, %v7690_v36  ;;  %v7968_v15 = vadd.f32 1.0, %v7704_v20  ;;  %vm7979_vm0 = vmor %vm3647_vm13, %vm3648_vm12 }
 0x63d   : > { %v7971_v7 = vadd.f32 1.0, %v7729_v16  ;;  %v7974_v19 = vadd.f32 1.0, %v7736_v3  ;;  %4753 = vrcp.f32 %v7716_v62  ;;  %v3635_v46 = vsel %vm7959_vm15, %v7808_v28, %v3631_v51 }
 0x63e   : > { %4755 = vrcp.f32 %v7718_v9  ;;  %v3650_v20 = vsel %vm7979_vm0, %v7820_v63, %v3646_v42  ;;  %v3659_v16 = vsub.f32 1.0, %v3658_v61  ;;  %v3959_v3 = vpack.c.bf16 %v3565_v31, %v3550_v41 }
 0x63f   : > { %v3639_v56 = vor.u32 1.1754944e-38, %v3638_v8  ;;  %v3654_v10 = vor.u32 1.1754944e-38, %v3653_v45  ;;  %v3688_v5 = vmul.f32 %v7849_v2, %v7692_v52  ;;  %4757 = vrcp.f32 %v7724_v39 }
 0x640   : > { %vm3637_vm3 = vcmp.eq.f32.partialorder %v3636_v49, 8.507059e+37  ;;  %vm3652_vm5 = vcmp.eq.f32.partialorder %v3651_v17, 8.507059e+37  ;;  %v3674_v57 = vsub.f32 1.0, %v3673_v0  ;;  %4759 = vrcp.f32 %v7823_v35 }
 0x641   : > { %v3640_v28 = vsel %vm3637_vm3, %v3639_v56, %v3635_v46  ;;  %v3655_v25 = vsel %vm3652_vm5, %v3654_v10, %v3650_v20  ;;  %v3689_v34 = vsub.f32 1.0, %v3688_v5  ;;  %v3660_v63 = vmul.f32 %v7838_v21, %v3659_v16 }
 0x642   : > { %vm3663_vm2 = vweird.f32 %v7838_v21  ;;  %v3666_v13 = vand.u32 2147483647, %v7685_v37  ;;  %v3668_v48 = vand.u32 2147483648, %v7685_v37  ;;  %vm3662_vm4 = vweird.f32 %v7685_v37 }
 0x643   : > { %4579 = vmatmul.msk.bf16.gmra.mxu0 %vm8813_vm14, %v3959_v3  ;;  %v7999_v58 = vpop.eup %4753  ;;  %vm3678_vm7 = vweird.f32 %v7844_v43  ;;  %v3690_v49 = vmul.f32 %v7849_v2, %v3689_v34  ;;  %vm3693_vm8 = vweird.f32 %v7849_v2  ;;  %v3703_v51 = vmul.f32 %v7856_v44, %v7694_v26 }
 0x644   : > { %v8007_v6 = vpop.eup %4755  ;;  %v3962_v61 = vpack.c.bf16 %v3655_v25, %v3640_v28  ;;  %v3675_v41 = vmul.f32 %v7844_v43, %v3674_v57  ;;  %vm3677_vm9 = vweird.f32 %v7690_v36  ;;  %v3696_v8 = vand.u32 2147483647, %v7692_v52 }
 0x645   : > { %v3698_v45 = vand.u32 2147483648, %v7692_v52  ;;  %v3691_v31 = vadd.f32 %v7849_v2, %v3690_v49  ;;  %vm3692_vm10 = vweird.f32 %v7692_v52  ;;  %v3704_v18 = vsub.f32 1.0, %v3703_v51  ;;  %v8016_v17 = vpop.eup %4757 }
 0x646   : > { %v3711_v42 = vand.u32 2147483647, %v7694_v26  ;;  %v3661_v0 = vadd.f32 %v7838_v21, %v3660_v63  ;;  %v3681_v1 = vand.u32 2147483647, %v7690_v36  ;;  %v3683_v46 = vand.u32 2147483648, %v7690_v36  ;;  %vm8023_vm11 = vmor %vm3692_vm10, %vm3693_vm8  ;;  %v8028_v52 = vpop.eup %4759 }
 0x647   : > { %v3713_v16 = vand.u32 2147483648, %v7694_v26  ;;  %v3695_v3 = vsel %vm8023_vm11, %v7849_v2, %v3691_v31  ;;  %v3705_v56 = vmul.f32 %v7856_v44, %v3704_v18  ;;  %vm3708_vm12 = vweird.f32 %v7856_v44  ;;  %vm8054_vm8 = vmor %vm3662_vm4, %vm3663_vm2 }
 0x648   : > { %v3718_v10 = vmul.f32 %v7874_v4, %v7698_v14  ;;  %v3676_v5 = vadd.f32 %v7844_v43, %v3675_v41  ;;  %vm3697_vm13 = vcmp.eq.f32.partialorder %v3696_v8, 8.507059e+37  ;;  %v3699_v57 = vor.u32 1.1754944e-38, %v3698_v45 }
 0x649   : > { %4582 = vmatmul.msk.bf16.gmra.mxu1 %vm8813_vm14, %v3962_v61  ;;  %vm3707_vm15 = vweird.f32 %v7694_v26  ;;  %v3706_v28 = vadd.f32 %v7856_v44, %v3705_v56  ;;  %vm3712_vm0 = vcmp.eq.f32.partialorder %v3711_v42, 8.507059e+37  ;;  %v3733_v2 = vmul.f32 %v7894_v53, %v7700_v38 }
 0x64a   : > { %v3719_v25 = vsub.f32 1.0, %v3718_v10  ;;  %v8043_v34 = vsel %vm3697_vm13, %v3699_v57, %v3695_v3  ;;  %vm3709_vm3 = vmor %vm3707_vm15, %vm3708_vm12  ;;  %v3714_v63 = vor.u32 1.1754944e-38, %v3713_v16  ;;  %vm3723_vm5 = vweird.f32 %v7874_v4 }
 0x64b   : > { %v3728_v49 = vand.u32 2147483648, %v7698_v14  ;;  %v3710_v51 = vsel %vm3709_vm3, %v7856_v44, %v3706_v28  ;;  %v3726_v26 = vand.u32 2147483647, %v7698_v14  ;;  %v3734_v41 = vsub.f32 1.0, %v3733_v2  ;;  %vm8067_vm12 = vmor %vm3677_vm9, %vm3678_vm7 }
 0x64c   : > { %v3720_v61 = vmul.f32 %v7874_v4, %v3719_v25  ;;  %v8058_v45 = vsel %vm3712_vm0, %v3714_v63, %v3710_v51  ;;  %vm3722_vm10 = vweird.f32 %v7698_v14  ;;  %vm3738_vm11 = vweird.f32 %v7894_v53 }
 0x64d   : > { %v3743_v44 = vand.u32 2147483648, %v7700_v38  ;;  %v3964_v18 = vpack.c.bf16 %v8058_v45, %v8043_v34  ;;  %v3735_v20 = vmul.f32 %v7894_v53, %v3734_v41  ;;  %v3741_v14 = vand.u32 2147483647, %v7700_v38  ;;  %vm3724_vm2 = vmor %vm3722_vm10, %vm3723_vm5 }
 0x64e   : > { %v3721_v42 = vadd.f32 %v7874_v4, %v3720_v61  ;;  %4761 = vrcp.f32 %v7859_v30  ;;  %v3665_v16 = vsel %vm8054_vm8, %v7838_v21, %v3661_v0  ;;  %v3680_v36 = vsel %vm8067_vm12, %v7844_v43, %v3676_v5 }
 0x64f   : > { %v3729_v3 = vor.u32 1.1754944e-38, %v3728_v49  ;;  %vm3727_vm4 = vcmp.eq.f32.partialorder %v3726_v26, 8.507059e+37  ;;  %v3736_v10 = vadd.f32 %v7894_v53, %v3735_v20  ;;  %vm3737_vm7 = vweird.f32 %v7700_v38 }
 0x650   : > { %v3725_v56 = vsel %vm3724_vm2, %v7874_v4, %v3721_v42  ;;  %v3669_v57 = vor.u32 1.1754944e-38, %v3668_v48  ;;  %v3684_v28 = vor.u32 1.1754944e-38, %v3683_v46  ;;  %vm3739_vm9 = vmor %vm3737_vm7, %vm3738_vm11  ;;  %v3744_v43 = vor.u32 1.1754944e-38, %v3743_v44 }
 0x651   : > { %v8090_v21 = vsel %vm3727_vm4, %v3729_v3, %v3725_v56  ;;  %vm3667_vm13 = vcmp.eq.f32.partialorder %v3666_v13, 8.507059e+37  ;;  %vm3682_vm15 = vcmp.eq.f32.partialorder %v3681_v1, 8.507059e+37  ;;  %v3740_v4 = vsel %vm3739_vm9, %v7894_v53, %v3736_v10 }
 0x652   : > { %vm3742_vm0 = vcmp.eq.f32.partialorder %v3741_v14, 8.507059e+37  ;;  %4763 = vrcp.f32 %v7862_v12  ;;  %v3670_v38 = vsel %vm3667_vm13, %v3669_v57, %v3665_v16  ;;  %v3685_v0 = vsel %vm3682_vm15, %v3684_v28, %v3680_v36 }
 0x653   : > { %v8098_v5 = vsel %vm3742_vm0, %v3744_v43, %v3740_v4  ;;  %4765 = vrcp.f32 %v7968_v15  ;;  %v3756_v46 = vand.u32 2147483647, %v7702_v22  ;;  %v3758_v37 = vand.u32 2147483648, %v7702_v22 }
 0x654   : > { %v3965_v48 = vpack.c.bf16 %v8098_v5, %v8090_v21  ;;  %v8105_v13 = vpop.eup %4761  ;;  %4767 = vrcp.f32 %v7971_v7  ;;  %v3771_v53 = vand.u32 2147483647, %v7706_v27  ;;  %v3773_v1 = vand.u32 2147483648, %v7706_v27 }
 0x655   : > { %v8111_v25 = vadd.f32 1.0, %v7745_v29  ;;  %4769 = vrcp.f32 %v7974_v19  ;;  %v3963_v2 = vpack.c.bf16 %v3685_v0, %v3670_v38  ;;  %v3788_v63 = vand.u32 2147483648, %v7710_v24 }
 0x656   : > { %vm3752_vm3 = vweird.f32 %v7702_v22  ;;  %vm3767_vm5 = vweird.f32 %v7706_v27  ;;  %v3786_v49 = vand.u32 2147483647, %v7710_v24  ;;  %v3801_v51 = vand.u32 2147483647, %v7712_v54 }
 0x657   : > { %v3748_v61 = vmul.f32 %v7902_v55, %v7702_v22  ;;  %vm8122_vm8 = vcmp.eq.f32.partialorder %v3756_v46, 8.507059e+37  ;;  %v3759_v26 = vor.u32 1.1754944e-38, %v3758_v37  ;;  %v3763_v41 = vmul.f32 %v7922_v23, %v7706_v27 }
 0x658   : > { %vm8128_vm10 = vcmp.eq.f32.partialorder %v3771_v53, 8.507059e+37  ;;  %vm3782_vm11 = vweird.f32 %v7710_v24  ;;  %v8133_v44 = vpop.eup %4763  ;;  %vm3753_vm12 = vweird.f32 %v7902_v55  ;;  %v3774_v31 = vor.u32 1.1754944e-38, %v3773_v1 }
 0x659   : > { %4583 = vmatmul.msk.bf16.gmra.mxu1 %vm8813_vm14, %v3963_v2  ;;  %vm3797_vm2 = vweird.f32 %v7712_v54  ;;  %v3803_v42 = vand.u32 2147483648, %v7712_v54  ;;  %v8138_v20 = vpop.eup %4765  ;;  %v3749_v14 = vsub.f32 1.0, %v3748_v61  ;;  %v3764_v16 = vsub.f32 1.0, %v3763_v41  ;;  %vm3754_vm1 = vmor %vm3752_vm3, %vm3753_vm12 }
 0x65a   : > { %vm3768_vm4 = vweird.f32 %v7922_v23  ;;  %v3789_v36 = vor.u32 1.1754944e-38, %v3788_v63  ;;  %v8141_v3 = vpop.eup %4767  ;;  %v3778_v56 = vmul.f32 %v7948_v50, %v7710_v24  ;;  %vm8145_vm7 = vcmp.eq.f32.partialorder %v3786_v49, 8.507059e+37 }
 0x65b   : > { %v3793_v57 = vmul.f32 %v7955_v33, %v7712_v54  ;;  %vm8151_vm9 = vcmp.eq.f32.partialorder %v3801_v51, 8.507059e+37  ;;  %vm3812_vm13 = vweird.f32 %v7716_v62  ;;  %v3816_v43 = vand.u32 2147483647, %v7716_v62  ;;  %v8157_v4 = vpop.eup %4769  ;;  %vm3769_vm6 = vmor %vm3767_vm5, %vm3768_vm4 }
 0x65c   : > { %v3750_v38 = vmul.f32 %v7902_v55, %v3749_v14  ;;  %v3765_v0 = vmul.f32 %v7922_v23, %v3764_v16  ;;  %vm3783_vm15 = vweird.f32 %v7948_v50  ;;  %v3808_v46 = vmul.f32 %v7999_v58, %v7716_v62 }
 0x65d   : > { %v3779_v37 = vsub.f32 1.0, %v3778_v56  ;;  %v3794_v53 = vsub.f32 1.0, %v3793_v57  ;;  %vm3798_vm0 = vweird.f32 %v7955_v33  ;;  %v3804_v1 = vor.u32 1.1754944e-38, %v3803_v42 }
 0x65e   : > { %v3751_v2 = vadd.f32 %v7902_v55, %v3750_v38  ;;  %v3766_v63 = vadd.f32 %v7922_v23, %v3765_v0  ;;  %v3809_v49 = vsub.f32 1.0, %v3808_v46  ;;  %v3818_v51 = vand.u32 2147483648, %v7716_v62 }
 0x65f   : > { %v3780_v61 = vmul.f32 %v7948_v50, %v3779_v37  ;;  %v3795_v41 = vmul.f32 %v7955_v33, %v3794_v53  ;;  %vm3813_vm14 = vweird.f32 %v7999_v58  ;;  %v3823_v22 = vmul.f32 %v8007_v6, %v7718_v9 }
 0x660   : > { %v3755_v42 = vsel %vm3754_vm1, %v7902_v55, %v3751_v2  ;;  %v3770_v14 = vsel %vm3769_vm6, %v7922_v23, %v3766_v63  ;;  %v3810_v16 = vmul.f32 %v7999_v58, %v3809_v49  ;;  %v3819_v56 = vor.u32 1.1754944e-38, %v3818_v51  ;;  %vm3784_vm1 = vmor %vm3782_vm11, %vm3783_vm15 }
 0x661   : > { %v8186_v27 = vsel %vm8122_vm8, %v3759_v26, %v3755_v42  ;;  %v8190_v57 = vsel %vm8128_vm10, %v3774_v31, %v3770_v14  ;;  %v3781_v38 = vadd.f32 %v7948_v50, %v3780_v61  ;;  %v3796_v55 = vadd.f32 %v7955_v33, %v3795_v41  ;;  %vm3799_vm6 = vmor %vm3797_vm2, %vm3798_vm0 }
 0x662   : > { %v3966_v23 = vpack.c.bf16 %v8190_v57, %v8186_v27  ;;  %v3811_v29 = vadd.f32 %v7999_v58, %v3810_v16  ;;  %v3824_v26 = vsub.f32 1.0, %v3823_v22  ;;  %vm3828_vm3 = vweird.f32 %v8007_v6  ;;  %vm3814_vm5 = vmor %vm3812_vm13, %vm3813_vm14 }
 0x663   : > { %v3785_v8 = vsel %vm3784_vm1, %v7948_v50, %v3781_v38  ;;  %v3800_v24 = vsel %vm3799_vm6, %v7955_v33, %v3796_v55  ;;  %v3831_v31 = vand.u32 2147483647, %v7718_v9  ;;  %v3833_v0 = vand.u32 2147483648, %v7718_v9 }
 0x664   : > { %v8216_v54 = vsel %vm8145_vm7, %v3789_v36, %v3785_v8  ;;  %v8220_v46 = vsel %vm8151_vm9, %v3804_v1, %v3800_v24  ;;  %v3815_v50 = vsel %vm3814_vm5, %v7999_v58, %v3811_v29  ;;  %v3825_v33 = vmul.f32 %v8007_v6, %v3824_v26 }
 0x665   : > { %4771 = vrcp.f32 %v8111_v25  ;;  %v3967_v62 = vpack.c.bf16 %v8220_v46, %v8216_v54  ;;  %vm3817_vm14 = vcmp.eq.f32.partialorder %v3816_v43, 8.507059e+37  ;;  %vm3827_vm8 = vweird.f32 %v7718_v9 }
 0x666   : > { %v8227_v37 = vsel %vm3817_vm14, %v3819_v56, %v3815_v50  ;;  %v3826_v10 = vadd.f32 %v8007_v6, %v3825_v33  ;;  %v3838_v36 = vmul.f32 %v8016_v17, %v7724_v39  ;;  %vm3829_vm10 = vmor %vm3827_vm8, %vm3828_vm3  ;;  %vm3832_vm11 = vcmp.eq.f32.partialorder %v3831_v31, 8.507059e+37 }
 0x667   : > { %v3834_v58 = vor.u32 1.1754944e-38, %v3833_v0  ;;  %v3846_v28 = vand.u32 2147483647, %v7724_v39  ;;  %v3853_v53 = vmul.f32 %v8028_v52, %v7823_v35  ;;  %vm9220_vm12 = vcmask 31744  }
 0x668   : > { %v3830_v9 = vsel %vm3829_vm10, %v8007_v6, %v3826_v10  ;;  %v3839_v43 = vsub.f32 1.0, %v3838_v36  ;;  %v3848_v1 = vand.u32 2147483648, %v7724_v39  ;;  %v3861_v2 = vand.u32 2147483647, %v7823_v35 }
 0x669   : > { %4584 = vmatmul.msk.bf16.gmra.mxu1 %vm9220_vm12, %v3964_v18  ;;  %v8245_v63 = vsel %vm3832_vm11, %v3834_v58, %v3830_v9  ;;  %vm3842_vm2 = vweird.f32 %v7724_v39  ;;  %vm3843_vm4 = vweird.f32 %v8016_v17  ;;  %v3854_v49 = vsub.f32 1.0, %v3853_v53 }
 0x66a   : > { %v3968_v51 = vpack.c.bf16 %v8245_v63, %v8227_v37  ;;  %v3840_v34 = vmul.f32 %v8016_v17, %v3839_v43  ;;  %vm3857_vm7 = vweird.f32 %v7823_v35  ;;  %v3863_v6 = vand.u32 2147483648, %v7823_v35  ;;  %vm3844_vm1 = vmor %vm3842_vm2, %vm3843_vm4 }
 0x66b   : > { %v8254_v45 = vpop.eup %4771  ;;  %vm8256_vm9 = vcmp.eq.f32.partialorder %v3846_v28, 8.507059e+37  ;;  %v3855_v61 = vmul.f32 %v8028_v52, %v3854_v49  ;;  %vm3858_vm13 = vweird.f32 %v8028_v52  ;;  %v3868_v41 = vmul.f32 %v8105_v13, %v7859_v30 }
 0x66c   : > { %v3841_v22 = vadd.f32 %v8016_v17, %v3840_v34  ;;  %v3849_v42 = vor.u32 1.1754944e-38, %v3848_v1  ;;  %vm8265_vm15 = vcmp.eq.f32.partialorder %v3861_v2, 8.507059e+37  ;;  %vm3872_vm0 = vweird.f32 %v7859_v30  ;;  %vm3859_vm3 = vmor %vm3857_vm7, %vm3858_vm13 }
 0x66d   : > { %v3856_v16 = vadd.f32 %v8028_v52, %v3855_v61  ;;  %v3869_v56 = vsub.f32 1.0, %v3868_v41  ;;  %vm3873_vm6 = vweird.f32 %v8105_v13  ;;  %v3883_v38 = vmul.f32 %v8133_v44, %v7862_v12 }
 0x66e   : > { %v3845_v55 = vsel %vm3844_vm1, %v8016_v17, %v3841_v22  ;;  %v3864_v29 = vor.u32 1.1754944e-38, %v3863_v6  ;;  %v3876_v26 = vand.u32 2147483647, %v7859_v30  ;;  %v3878_v8 = vand.u32 2147483648, %v7859_v30  ;;  %vm3874_vm14 = vmor %vm3872_vm0, %vm3873_vm6 }
 0x66f   : > { %v8285_v39 = vsel %vm8256_vm9, %v3849_v42, %v3845_v55  ;;  %v3860_v24 = vsel %vm3859_vm3, %v8028_v52, %v3856_v16  ;;  %v3870_v31 = vmul.f32 %v8105_v13, %v3869_v56  ;;  %v3884_v0 = vsub.f32 1.0, %v3883_v38 }
 0x670   : > { %v8291_v17 = vsel %vm8265_vm15, %v3864_v29, %v3860_v24  ;;  %vm3888_vm5 = vweird.f32 %v8133_v44  ;;  %v3893_v35 = vand.u32 2147483648, %v7862_v12  ;;  %v3898_v50 = vmul.f32 %v8138_v20, %v7968_v15 }
 0x671   : > { %v3969_v33 = vpack.c.bf16 %v8291_v17, %v8285_v39  ;;  %v3871_v10 = vadd.f32 %v8105_v13, %v3870_v31  ;;  %v3885_v52 = vmul.f32 %v8133_v44, %v3884_v0  ;;  %v3891_v36 = vand.u32 2147483647, %v7862_v12 }
 0x672   : > { %v3879_v58 = vor.u32 1.1754944e-38, %v3878_v8  ;;  %vm3887_vm8 = vweird.f32 %v7862_v12  ;;  %v3899_v28 = vsub.f32 1.0, %v3898_v50  ;;  %vm3877_vm10 = vcmp.eq.f32.partialorder %v3876_v26, 8.507059e+37 }
 0x673   : > { %v3875_v53 = vsel %vm3874_vm14, %v8105_v13, %v3871_v10  ;;  %v3886_v9 = vadd.f32 %v8133_v44, %v3885_v52  ;;  %v3894_v43 = vor.u32 1.1754944e-38, %v3893_v35  ;;  %vm3889_vm11 = vmor %vm3887_vm8, %vm3888_vm5  ;;  %vm3903_vm12 = vweird.f32 %v8138_v20 }
 0x674   : > { %v8309_v1 = vsel %vm3877_vm10, %v3879_v58, %v3875_v53  ;;  %v3900_v2 = vmul.f32 %v8138_v20, %v3899_v28  ;;  %v3913_v30 = vmul.f32 %v8141_v3, %v7971_v7  ;;  %vm3892_vm2 = vcmp.eq.f32.partialorder %v3891_v36, 8.507059e+37 }
 0x675   : > { %v3890_v12 = vsel %vm3889_vm11, %v8133_v44, %v3886_v9  ;;  %vm3902_vm4 = vweird.f32 %v7968_v15  ;;  %v3908_v13 = vand.u32 2147483648, %v7968_v15  ;;  %v3906_v6 = vand.u32 2147483647, %v7968_v15 }
 0x676   : > { %v8320_v49 = vsel %vm3892_vm2, %v3894_v43, %v3890_v12  ;;  %v3901_v34 = vadd.f32 %v8138_v20, %v3900_v2  ;;  %v3914_v18 = vsub.f32 1.0, %v3913_v30  ;;  %vm8326_vm7 = vmor %vm3902_vm4, %vm3903_vm12  ;;  %v3923_v44 = vand.u32 2147483648, %v7971_v7 }
 0x677   : > { %v3970_v61 = vpack.c.bf16 %v8320_v49, %v8309_v1  ;;  %v3928_v22 = vmul.f32 %v8157_v4, %v7974_v19  ;;  %vm9227_vm9 = vcmask 31744   ;;  %vm3918_vm13 = vweird.f32 %v8141_v3  ;;  %v9240_v49 = vld [vmem:[#allocation50_spill] sm:$0xff] }
 0x678   : > { %v3905_v15 = vsel %vm8326_vm7, %v8138_v20, %v3901_v34  ;;  %v3915_v42 = vmul.f32 %v8141_v3, %v3914_v18  ;;  %v3921_v14 = vand.u32 2147483647, %v7971_v7  ;;  %v3909_v16 = vor.u32 1.1754944e-38, %v3908_v13  ;;  %vm9228_vm4 = vmmov %vm9227_vm9  ;;  %v9237_v13 = vld [vmem:[#allocation44_spill] sm:$0xff] }
 0x679   : > { %4585 = vmatmul.msk.bf16.gmra.mxu1 %vm9227_vm9, %v3965_v48  ;;  %vm3917_vm15 = vweird.f32 %v7971_v7  ;;  %v3929_v56 = vsub.f32 1.0, %v3928_v22  ;;  %vm3907_vm0 = vcmp.eq.f32.partialorder %v3906_v6, 8.507059e+37  ;;  %vm3933_vm1 = vweird.f32 %v8157_v4  ;;  %vm9229_vm7 = vmmov %vm9228_vm4 }
 0x67a   : > { %v3916_v38 = vadd.f32 %v8141_v3, %v3915_v42  ;;  %v3943_v21 = vmul.f32 %v8254_v45, %v8111_v25  ;;  %v8348_v5 = vsel %vm3907_vm0, %v3909_v16, %v3905_v15  ;;  %vm3919_vm6 = vmor %vm3917_vm15, %vm3918_vm13  ;;  %v3924_v48 = vor.u32 1.1754944e-38, %v3923_v44  ;;  %v9244_v15 = vld [vmem:[#allocation51_spill] sm:$0xff] }
 0x67b   : > { %v3930_v20 = vmul.f32 %v8157_v4, %v3929_v56  ;;  %v3938_v55 = vand.u32 2147483648, %v7974_v19  ;;  %vm3922_vm3 = vcmp.eq.f32.partialorder %v3921_v14, 8.507059e+37  ;;  %v3936_v7 = vand.u32 2147483647, %v7974_v19  ;;  %vm9230_vm9 = vmmov %vm9228_vm4  ;;  %v9245_v14 = vld [vmem:[#allocation97_spill] sm:$0xff] }
 0x67c   : > { %v3920_v29 = vsel %vm3919_vm6, %v8141_v3, %v3916_v38  ;;  %v3944_v26 = vsub.f32 1.0, %v3943_v21  ;;  %vm3932_vm5 = vweird.f32 %v7974_v19  ;;  %v3953_v31 = vand.u32 2147483648, %v8111_v25  ;;  %vm9232_vm15 = vmmov %vm9228_vm4 }
 0x67d   : > { %v3925_v8 = vsel %vm3922_vm3, %v3924_v48, %v3920_v29  ;;  %v3931_v24 = vadd.f32 %v8157_v4, %v3930_v20  ;;  %vm3934_vm14 = vmor %vm3932_vm5, %vm3933_vm1  ;;  %vm3948_vm8 = vweird.f32 %v8254_v45  ;;  %v3951_v3 = vand.u32 2147483647, %v8111_v25  ;;  %v9248_v20 = vld [vmem:[#allocation89_spill] sm:$0xff] }
 0x67e   : > { %v3971_v0 = vpack.c.bf16 %v3925_v8, %v8348_v5  ;;  %v3945_v35 = vmul.f32 %v8254_v45, %v3944_v26  ;;  %v3939_v10 = vor.u32 1.1754944e-38, %v3938_v55  ;;  %vm3937_vm10 = vcmp.eq.f32.partialorder %v3936_v7, 8.507059e+37  ;;  %vm9234_vm1 = vmmov %vm9228_vm4  ;;  %v9247_v5 = vld [vmem:[#allocation92_spill] sm:$0xff]  ;;  %v9250_v8 = vld [vmem:[#allocation83_spill] sm:$0xff] }
 0x67f   : > { %v3935_v50 = vsel %vm3934_vm14, %v8157_v4, %v3931_v24  ;;  %vm3947_vm11 = vweird.f32 %v8111_v25  ;;  %v3954_v36 = vor.u32 1.1754944e-38, %v3953_v31  ;;  %vm3952_vm2 = vcmp.eq.f32.partialorder %v3951_v3, 8.507059e+37  ;;  %vm9238_vm3 = vmmov %vm9234_vm1  ;;  %v9251_v31 = vld [vmem:[#allocation79_spill] sm:$0xff] }
 0x680   : > { %v3946_v52 = vadd.f32 %v8254_v45, %v3945_v35  ;;  %v3940_v19 = vsel %vm3937_vm10, %v3939_v10, %v3935_v50  ;;  %vm3949_vm12 = vmor %vm3947_vm11, %vm3948_vm8  ;;  %vm9231_vm13 = vcmask 130048   ;;  %v9253_v10 = vld [vmem:[#allocation5_spill] sm:$0xff] }
 0x681   : > { %vm9233_vm0 = vmmov %vm9231_vm13 }
 0x682   : > { %v3950_v58 = vsel %vm3949_vm12, %v8254_v45, %v3946_v52  ;;  %vm9235_vm6 = vmmov %vm9233_vm0 }
 0x683   : > { %v3955_v28 = vsel %vm3952_vm2, %v3954_v36, %v3950_v58  ;;  %vm9239_vm5 = vmmov %vm9233_vm0 }
 0x684   : > { %v3972_v53 = vpack.c.bf16 %v3955_v28, %v3940_v19  ;;  %vm9242_vm14 = vmmov %vm9234_vm1  ;;  %v9254_v19 = vld [vmem:[#allocation40_spill] sm:$0xff]  ;;  %v8419_v28 = vld [vmem:[%s8634_s14] ss:$0 sm:$0xff] }
 0x685   : > { %vm9243_vm8 = vmmov %vm9233_vm0 }
 0x686   : > { %vm9246_vm10 = vmmov %vm9233_vm0 }
 0x687   : > { %vm9249_vm11 = vmmov %vm9233_vm0 }
 0x688   : > { %vm9252_vm12 = vmmov %vm9233_vm0 }
 0x689   : > { %4586 = vmatmul.msk.bf16.gmra.mxu1 %vm9228_vm4, %v3966_v23  ;;  %vm9255_vm2 = vmmov %vm9233_vm0  ;;  %vm9257_vm4 = vcmask 64512  }
 0x699   : > { %4587 = vmatmul.msk.bf16.gmra.mxu1 %vm9229_vm7, %v3967_v62  ;;  %vm9259_vm7 = vmmov %vm9233_vm0 }
 0x6a0   : > { %v4036_v4 = vpop.f32.mrf.mxu0 }
 0x6a1   : > { %v4116_v43 = vmul.f32 %v4036_v4, %v9167_v60  ;;  %v8424_v4 = vld [vmem:[%s8635_s15] ss:$0 sm:$0xff] }
 0x6a6   : > { %v4051_v25 = vpop.f32.mrf.mxu1 }
 0x6a7   : > { %v4122_v34 = vmul.f32 %v4051_v25, %v9237_v13  ;;  %v9261_v13 = vld [vmem:[#allocation31_spill] sm:$0xff] }
 0x6a8   : > { %v4038_v9 = vpop.f32.mrf.mxu0 }
 0x6a9   : > { %4588 = vmatmul.msk.bf16.gmra.mxu1 %vm9230_vm9, %v3968_v51  ;;  %v4117_v45 = vmul.f32 %v4038_v9, %v9168_v32  ;;  %vm9260_vm9 = vmmov %vm9257_vm4 }
 0x6ab   : > { %v4148_v27 = vpack.c.bf16 %v4117_v45, %v4116_v43  ;;  %v4782_v45 = vld [vmem:[%s4928_s29] sm:$0xff] }
 0x6ad   : > { %4597 = vmatmul.msk.bf16.vlgmr.msrb.gmra.mxu2 %vm9231_vm13, %v4148_v27  ;;  %vm9262_vm13 = vmmov %vm9257_vm4 }
 0x6ae   : > { %v4053_v57 = vpop.f32.mrf.mxu1 }
 0x6b0   : > { %v4041_v23 = vpop.f32.mrf.mxu0 }
 0x6b1   : > { %v4118_v62 = vmul.f32 %v4041_v23, %v9169_v40  ;;  %v9256_v23 = vld [vmem:[#allocation36_spill] sm:$0xff] }
 0x6b6   : > { %v4056_v54 = vpop.f32.mrf.mxu1 }
 0x6b8   : > { %v4043_v46 = vpop.f32.mrf.mxu0 }
 0x6b9   : > { %4589 = vmatmul.msk.bf16.gmra.mxu1 %vm9232_vm15, %v3969_v33  ;;  %v4119_v60 = vmul.f32 %v4043_v46, %v9170_v11  ;;  %v9236_v33 = vld [vmem:[#allocation19_spill] sm:$0xff]  ;;  %vm9264_vm15 = vmmov %vm9233_vm0 }
 0x6ba   : > { %v4123_v12 = vmul.f32 %v4053_v57, %v9236_v33 }
 0x6bb   : > { %v4149_v37 = vpack.c.bf16 %v4119_v60, %v4118_v62  ;;  %v9258_v62 = vld [vmem:[#allocation22_spill] sm:$0xff] }
 0x6bc   : > { %v4151_v6 = vpack.c.bf16 %v4123_v12, %v4122_v34 }
 0x6bd   : > { %4598 = vmatmul.msk.bf16.gmra.mxu2 %vm9233_vm0, %v4149_v37  ;;  %vm9267_vm0 = vmmov %vm9257_vm4 }
 0x6be   : > { %v4058_v32 = vpop.f32.mrf.mxu1 }
 0x6bf   : > { %v4125_v18 = vmul.f32 %v4058_v32, %v9240_v49 }
 0x6c0   : > { %v4046_v63 = vpop.f32.mrf.mxu0 }
 0x6c1   : > { %v4120_v30 = vmul.f32 %v4046_v63, %v9171_v47 }
 0x6c6   : > { %v4061_v51 = vpop.f32.mrf.mxu1 }
 0x6c7   : > { %v4126_v16 = vmul.f32 %v4061_v51, %v9245_v14  ;;  %v4783_v51 = vld [vmem:[%s4928_s29 + $0x8] sm:$0xff] }
 0x6c8   : > { %v4048_v2 = vpop.f32.mrf.mxu0 }
 0x6c9   : > { %4590 = vmatmul.msk.bf16.gmra.mxu1 %vm9234_vm1, %v3970_v61  ;;  %v4121_v40 = vmul.f32 %v4048_v2, %v9172_v59  ;;  %v9241_v61 = vld [vmem:[#allocation53_spill] sm:$0xff]  ;;  %vm9268_vm1 = vmmov %vm9255_vm2 }
 0x6ca   : > { %v4124_v59 = vmul.f32 %v4056_v54, %v9241_v61 }
 0x6cb   : > { %v4150_v39 = vpack.c.bf16 %v4121_v40, %v4120_v30 }
 0x6cc   : > { %v4152_v41 = vpack.c.bf16 %v4125_v18, %v4124_v59  ;;  %v4785_v59 = vld [vmem:[%s4928_s29 + $0x18] sm:$0xff] }
 0x6cd   : > { %4599 = vmatmul.msk.bf16.gmra.mxu2 %vm9235_vm6, %v4150_v39  ;;  %vm9270_vm6 = vmmov %vm9267_vm0 }
 0x6ce   : > { %v4063_v11 = vpop.f32.mrf.mxu1 }
 0x6cf   : > { %v4127_v42 = vmul.f32 %v4063_v11, %v9244_v15 }
 0x6d1   : > { %v4153_v56 = vpack.c.bf16 %v4127_v42, %v4126_v16  ;;  %v9266_v42 = vld [vmem:[#allocation3_spill] sm:$0xff] }
 0x6d6   : > { %v4066_v17 = vpop.f32.mrf.mxu1 }
 0x6d7   : > { %v4128_v55 = vmul.f32 %v4066_v17, %v9248_v20  ;;  %v4784_v17 = vld [vmem:[%s4928_s29 + $0x10] sm:$0xff] }
 0x6d9   : > { %4591 = vmatmul.msk.bf16.gmra.mxu1 %vm9238_vm3, %v3971_v0  ;;  %vm9272_vm3 = vmmov %vm9268_vm1 }
 0x6dd   : > { %4600 = vmatmul.msk.bf16.gmra.mxu2 %vm9239_vm5, %v4151_v6  ;;  %vm9275_vm5 = vmmov %vm9267_vm0 }
 0x6de   : > { %v4068_v47 = vpop.f32.mrf.mxu1 }
 0x6df   : > { %v4129_v48 = vmul.f32 %v4068_v47, %v9247_v5  ;;  %v9263_v47 = vld [vmem:[#allocation21_spill] sm:$0xff]  ;;  %v4786_v5 = vld [vmem:[%s4928_s29 + $0x20] sm:$0xff] }
 0x6e1   : > { %v4154_v29 = vpack.c.bf16 %v4129_v48, %v4128_v55  ;;  %v9269_v55 = vld [vmem:[#allocation29_spill] sm:$0xff] }
 0x6e6   : > { %v4071_v1 = vpop.f32.mrf.mxu1 }
 0x6e7   : > { %v4130_v0 = vmul.f32 %v4071_v1, %v9251_v31 }
 0x6e9   : > { %4592 = vmatmul.msk.bf16.gmra.mxu1 %vm9242_vm14, %v3972_v53  ;;  %vm9276_vm14 = vmmov %vm9268_vm1 }
 0x6ed   : > { %4601 = vmatmul.msk.bf16.gmra.mxu2 %vm9243_vm8, %v4152_v41  ;;  %vm9278_vm8 = vmmov %vm9267_vm0 }
 0x6ee   : > { %v4073_v44 = vpop.f32.mrf.mxu1 }
 0x6ef   : > { %v4131_v24 = vmul.f32 %v4073_v44, %v9250_v8 }
 0x6f1   : > { %v4155_v35 = vpack.c.bf16 %v4131_v24, %v4130_v0 }
 0x6f6   : > { %v4076_v22 = vpop.f32.mrf.mxu1 }
 0x6f7   : > { %v4132_v36 = vmul.f32 %v4076_v22, %v9254_v19  ;;  %v9265_v22 = vld [vmem:[#allocation17_spill] sm:$0xff] }
 0x6fd   : > { %4602 = vmatmul.msk.bf16.gmra.mxu2 %vm9246_vm10, %v4153_v56  ;;  %vm9280_vm10 = vmmov %vm9268_vm1 }
 0x6fe   : > { %v4078_v38 = vpop.f32.mrf.mxu1 }
 0x6ff   : > { %v4133_v52 = vmul.f32 %v4078_v38, %v9253_v10 }
 0x701   : > { %v4156_v58 = vpack.c.bf16 %v4133_v52, %v4132_v36  ;;  %v9273_v52 = vld [vmem:[#allocation47_spill] sm:$0xff]  ;;  %v9274_v36 = vld [vmem:[#allocation14_spill] sm:$0xff] }
 0x706   : > { %v4081_v21 = vpop.f32.mrf.mxu1 }
 0x707   : > { %v4134_v60 = vmul.f32 %v4081_v21, %v9258_v62  ;;  %v9279_v62 = vld [vmem:[#allocation26_spill] sm:$0xff] }
 0x70d   : > { %4603 = vmatmul.msk.bf16.gmra.mxu2 %vm9249_vm11, %v4154_v29  ;;  %vm9283_vm11 = vmmov %vm9267_vm0 }
 0x70e   : > { %v4083_v7 = vpop.f32.mrf.mxu1 }
 0x70f   : > { %v4135_v54 = vmul.f32 %v4083_v7, %v9256_v23  ;;  %v9277_v23 = vld [vmem:[#allocation32_spill] sm:$0xff] }
 0x711   : > { %v4157_v32 = vpack.c.bf16 %v4135_v54, %v4134_v60 }
 0x716   : > { %v4086_v26 = vpop.f32.mrf.mxu1 }
 0x717   : > { %v4136_v1 = vmul.f32 %v4086_v26, %v9263_v47  ;;  %v9271_v26 = vld [vmem:[#allocation30_spill] sm:$0xff] }
 0x71d   : > { %4604 = vmatmul.msk.bf16.gmra.mxu2 %vm9252_vm12, %v4155_v35  ;;  %v4787_v35 = vld [vmem:[%s4928_s29 + $0x28] sm:$0xff]  ;;  %vm9284_vm12 = vmmov %vm9268_vm1 }
 0x71e   : > { %v4088_v3 = vpop.f32.mrf.mxu1 }
 0x71f   : > { %v4137_v34 = vmul.f32 %v4088_v3, %v9261_v13 }
 0x721   : > { %v4158_v18 = vpack.c.bf16 %v4137_v34, %v4136_v1  ;;  %v4790_v34 = vld [vmem:[%s4928_s29 + $0x40] sm:$0xff] }
 0x726   : > { %v4091_v50 = vpop.f32.mrf.mxu1 }
 0x727   : > { %v4138_v8 = vmul.f32 %v4091_v50, %v9271_v26 }
 0x72d   : > { %4605 = vmatmul.msk.bf16.gmra.mxu2 %vm9255_vm2, %v4156_v58  ;;  %vm9285_vm2 = vmmov %vm9267_vm0 }
 0x72e   : > { %v4093_v53 = vpop.f32.mrf.mxu1 }
 0x72f   : > { %v4139_v29 = vmul.f32 %v4093_v53, %v9269_v55 }
 0x730   : > { %v4229_v25 = vpop.f32.mrf.mxu2 }
 0x731   : > { %v4313_v9 = vmul.f32 %v8419_v28, %v4229_v25  ;;  %v4159_v31 = vpack.c.bf16 %v4139_v29, %v4138_v8  ;;  %v4795_v8 = vld [vmem:[%s4928_s29 + $0x68] sm:$0xff] }
 0x733   : > { %v4349_v43 = vadd.f32 %v8424_v4, %v4313_v9 }
 0x735   : > { %v4381_v27 = vadd.f32 %v4782_v45, %v4349_v43  ;;  %v4788_v43 = vld [vmem:[%s4928_s29 + $0x30] sm:$0xff] }
 0x736   : > { %v8436_v57 = vpop.f32.mrf.mxu1 }
 0x737   : > { %4413 = vst.msk [vmem:[%s8433_s26] sm:$0xff] %vm9257_vm4, %v4381_v27  ;;  %v4140_v60 = vmul.f32 %v8436_v57, %v9279_v62  ;;  %vm9286_vm4 = vmmov %vm9267_vm0 }
 0x738   : > { %v4231_v46 = vpop.f32.mrf.mxu2 }
 0x739   : > { %v4314_v37 = vmul.f32 %v8419_v28, %v4231_v46 }
 0x73b   : > { %v4350_v63 = vadd.f32 %v8424_v4, %v4314_v37 }
 0x73d   : > { %v4382_v2 = vadd.f32 %v4783_v51, %v4350_v63  ;;  %4606 = vmatmul.msk.bf16.gmra.mxu2 %vm9259_vm7, %v4157_v32  ;;  %v4789_v51 = vld [vmem:[%s4928_s29 + $0x38] sm:$0xff]  ;;  %vm9287_vm7 = vmmov %vm9267_vm0 }
 0x73e   : > { %v4098_v30 = vpop.f32.mrf.mxu1 }
 0x73f   : > { %4414 = vst.msk [vmem:[%s8433_s26 + $0x8] sm:$0xff] %vm9260_vm9, %v4382_v2  ;;  %v4141_v54 = vmul.f32 %v4098_v30, %v9277_v23  ;;  %v9281_v30 = vld [vmem:[#allocation34_spill] sm:$0xff]  ;;  %vm9288_vm9 = vmmov %vm9267_vm0 }
 0x740   : > { %v4234_v40 = vpop.f32.mrf.mxu2 }
 0x741   : > { %v4315_v39 = vmul.f32 %v8419_v28, %v4234_v40  ;;  %v4160_v32 = vpack.c.bf16 %v4141_v54, %v4140_v60 }
 0x743   : > { %v4351_v11 = vadd.f32 %v8424_v4, %v4315_v39 }
 0x745   : > { %v4383_v33 = vadd.f32 %v4784_v17, %v4351_v11  ;;  %v9282_v11 = vld [vmem:[#allocation37_spill] sm:$0xff] }
 0x746   : > { %v4101_v12 = vpop.f32.mrf.mxu1 }
 0x747   : > { %4415 = vst.msk [vmem:[%s8433_s26 + $0x10] sm:$0xff] %vm9262_vm13, %v4383_v33  ;;  %v4142_v15 = vmul.f32 %v4101_v12, %v9265_v22  ;;  %v4792_v22 = vld [vmem:[%s4928_s29 + $0x50] sm:$0xff]  ;;  %vm9289_vm13 = vmmov %vm9267_vm0 }
 0x748   : > { %v4236_v6 = vpop.f32.mrf.mxu2 }
 0x749   : > { %v4316_v49 = vmul.f32 %v8419_v28, %v4236_v6 }
 0x74b   : > { %v4352_v61 = vadd.f32 %v8424_v4, %v4316_v49 }
 0x74d   : > { %v4384_v41 = vadd.f32 %v4785_v59, %v4352_v61  ;;  %4607 = vmatmul.msk.bf16.gmra.mxu2 %vm9264_vm15, %v4158_v18  ;;  %v4791_v18 = vld [vmem:[%s4928_s29 + $0x48] sm:$0xff]  ;;  %vm9290_vm15 = vmmov %vm9267_vm0 }
 0x74e   : > { %v4103_v44 = vpop.f32.mrf.mxu1 }
 0x74f   : > { %v4143_v14 = vmul.f32 %v4103_v44, %v9266_v42  ;;  %4416 = vst.msk [vmem:[%s8433_s26 + $0x18] sm:$0xff] %vm9267_vm0, %v4384_v41 }
 0x750   : > { %v4239_v16 = vpop.f32.mrf.mxu2 }
 0x751   : > { %v4161_v56 = vpack.c.bf16 %v4143_v14, %v4142_v15  ;;  %v4317_v38 = vmul.f32 %v8419_v28, %v4239_v16 }
 0x753   : > { %4610 = vmatmul.msk.bf16.vlgmr.msrb.gmra.mxu3 %vm9268_vm1, %v4161_v56  ;;  %v4353_v21 = vadd.f32 %v8424_v4, %v4317_v38  ;;  %v4793_v56 = vld [vmem:[%s4928_s29 + $0x58] sm:$0xff]  ;;  %vm9291_vm1 = vmmov %vm9267_vm0 }
 0x755   : > { %v4385_v48 = vadd.f32 %v4786_v5, %v4353_v21 }
 0x756   : > { %v4106_v20 = vpop.f32.mrf.mxu1 }
 0x757   : > { %4417 = vst.msk [vmem:[%s8433_s26 + $0x20] sm:$0xff] %vm9270_vm6, %v4385_v48  ;;  %v4144_v19 = vmul.f32 %v4106_v20, %v9273_v52  ;;  %v4794_v20 = vld [vmem:[%s4928_s29 + $0x60] sm:$0xff]  ;;  %vm9292_vm6 = vmmov %vm9267_vm0 }
 0x758   : > { %v4241_v7 = vpop.f32.mrf.mxu2 }
 0x759   : > { %v4318_v24 = vmul.f32 %v8419_v28, %v4241_v7 }
 0x75b   : > { %v4354_v0 = vadd.f32 %v8424_v4, %v4318_v24 }
 0x75d   : > { %v4386_v3 = vadd.f32 %v4787_v35, %v4354_v0  ;;  %4608 = vmatmul.msk.bf16.gmra.mxu2 %vm9272_vm3, %v4159_v31  ;;  %vm9293_vm3 = vmmov %vm9267_vm0 }
 0x75e   : > { %v4108_v10 = vpop.f32.mrf.mxu1 }
 0x75f   : > { %v4145_v58 = vmul.f32 %v4108_v10, %v9274_v36  ;;  %4418 = vst.msk [vmem:[%s8433_s26 + $0x28] sm:$0xff] %vm9275_vm5, %v4386_v3  ;;  %v4796_v3 = vld [vmem:[%s4928_s29 + $0x70] sm:$0xff]  ;;  %vm9294_vm5 = vmmov %vm9267_vm0 }
 0x760   : > { %v4244_v50 = vpop.f32.mrf.mxu2 }
 0x761   : > { %v4162_v53 = vpack.c.bf16 %v4145_v58, %v4144_v19  ;;  %v4319_v25 = vmul.f32 %v8419_v28, %v4244_v50  ;;  %v4797_v58 = vld [vmem:[%s4928_s29 + $0x78] sm:$0xff] }
 0x763   : > { %4611 = vmatmul.msk.bf16.gmra.mxu3 %vm9276_vm14, %v4162_v53  ;;  %v4355_v9 = vadd.f32 %v8424_v4, %v4319_v25  ;;  %vm9295_vm14 = vmmov %vm9267_vm0 }
 0x765   : > { %v4387_v45 = vadd.f32 %v4788_v43, %v4355_v9  ;;  %v4798_v43 = vld [vmem:[%s4928_s29 + $0x80] sm:$0xff] }
 0x766   : > { %v4111_v27 = vpop.f32.mrf.mxu1 }
 0x767   : > { %4419 = vst.msk [vmem:[%s8433_s26 + $0x30] sm:$0xff] %vm9278_vm8, %v4387_v45  ;;  %v4146_v39 = vmul.f32 %v4111_v27, %v9281_v30  ;;  %vm9296_vm8 = vmmov %vm9267_vm0 }
 0x768   : > { %v4246_v46 = vpop.f32.mrf.mxu2 }
 0x769   : > { %v4320_v37 = vmul.f32 %v8419_v28, %v4246_v46  ;;  %v4799_v46 = vld [vmem:[%s4928_s29 + $0x88] sm:$0xff] }
 0x76b   : > { %v4356_v63 = vadd.f32 %v8424_v4, %v4320_v37 }
 0x76d   : > { %v4388_v2 = vadd.f32 %v4789_v51, %v4356_v63  ;;  %4609 = vmatmul.msk.bf16.gmra.mxu2 %vm9280_vm10, %v4160_v32  ;;  %v4800_v63 = vld [vmem:[%s4928_s29 + $0x90] sm:$0xff]  ;;  %vm9297_vm10 = vmmov %vm9267_vm0 }
 0x76e   : > { %v4113_v40 = vpop.f32.mrf.mxu1 }
 0x76f   : > { %v4147_v17 = vmul.f32 %v4113_v40, %v9282_v11  ;;  %4420 = vst.msk [vmem:[%s8433_s26 + $0x38] sm:$0xff] %vm9283_vm11, %v4388_v2  ;;  %vm9298_vm11 = vmmov %vm9267_vm0 }
 0x770   : > { %v4249_v57 = vpop.f32.mrf.mxu2 }
 0x771   : > { %v4163_v33 = vpack.c.bf16 %v4147_v17, %v4146_v39  ;;  %v4321_v12 = vmul.f32 %v8419_v28, %v4249_v57  ;;  %v4801_v39 = vld [vmem:[%s4928_s29 + $0x98] sm:$0xff] }
 0x773   : > { %4612 = vmatmul.msk.bf16.gmra.mxu3 %vm9284_vm12, %v4163_v33  ;;  %v4357_v13 = vadd.f32 %v8424_v4, %v4321_v12  ;;  %v4802_v12 = vld [vmem:[%s4928_s29 + $0xa0] sm:$0xff]  ;;  %vm9299_vm12 = vmmov %vm9267_vm0 }
 0x775   : > { %v4389_v6 = vadd.f32 %v4790_v34, %v4357_v13 }
 0x777   : > { %4421 = vst.msk [vmem:[%s8433_s26 + $0x40] sm:$0xff] %vm9285_vm2, %v4389_v6  ;;  %vm9300_vm2 = vmmov %vm9267_vm0 }
 0x778   : > { %v4251_v47 = vpop.f32.mrf.mxu2 }
 0x779   : > { %v4322_v1 = vmul.f32 %v8419_v28, %v4251_v47 }
 0x77b   : > { %v4358_v49 = vadd.f32 %v8424_v4, %v4322_v1 }
 0x77d   : > { %v4390_v61 = vadd.f32 %v4791_v18, %v4358_v49  ;;  %v4803_v18 = vld [vmem:[%s4928_s29 + $0xd0] sm:$0xff] }
 0x77f   : > { %4422 = vst.msk [vmem:[%s8433_s26 + $0x48] sm:$0xff] %vm9286_vm4, %v4390_v61  ;;  %vm9301_vm4 = vmmov %vm9267_vm0 }
 0x780   : > { %v4254_v59 = vpop.f32.mrf.mxu2 }
 0x781   : > { %v4323_v41 = vmul.f32 %v8419_v28, %v4254_v59 }
 0x783   : > { %v4359_v44 = vadd.f32 %v8424_v4, %v4323_v41  ;;  %v4804_v41 = vld [vmem:[%s4928_s29 + $0xa8] sm:$0xff] }
 0x785   : > { %v4391_v15 = vadd.f32 %v4792_v22, %v4359_v44 }
 0x787   : > { %4423 = vst.msk [vmem:[%s8433_s26 + $0x50] sm:$0xff] %vm9287_vm7, %v4391_v15  ;;  %vm9302_vm7 = vmmov %vm9267_vm0 }
 0x788   : > { %v4256_v42 = vpop.f32.mrf.mxu2 }
 0x789   : > { %v4324_v14 = vmul.f32 %v8419_v28, %v4256_v42 }
 0x78b   : > { %v4360_v16 = vadd.f32 %v8424_v4, %v4324_v14 }
 0x78d   : > { %v4392_v38 = vadd.f32 %v4793_v56, %v4360_v16  ;;  %v4805_v56 = vld [vmem:[%s4928_s29 + $0xd8] sm:$0xff] }
 0x78f   : > { %4424 = vst.msk [vmem:[%s8433_s26 + $0x58] sm:$0xff] %vm9288_vm9, %v4392_v38  ;;  %vm9303_vm9 = vmmov %vm9267_vm0 }
 0x790   : > { %v4259_v21 = vpop.f32.mrf.mxu2 }
 0x791   : > { %v4325_v5 = vmul.f32 %v8419_v28, %v4259_v21 }
 0x793   : > { %v4361_v48 = vadd.f32 %v8424_v4, %v4325_v5  ;;  %v4806_v5 = vld [vmem:[%s4928_s29 + $0xb0] sm:$0xff] }
 0x795   : > { %v4393_v55 = vadd.f32 %v4794_v20, %v4361_v48 }
 0x797   : > { %4425 = vst.msk [vmem:[%s8433_s26 + $0x60] sm:$0xff] %vm9289_vm13, %v4393_v55  ;;  %vm9304_vm13 = vmmov %vm9267_vm0 }
 0x798   : > { %v4261_v29 = vpop.f32.mrf.mxu2 }
 0x799   : > { %v4326_v7 = vmul.f32 %v8419_v28, %v4261_v29 }
 0x79b   : > { %v4362_v26 = vadd.f32 %v8424_v4, %v4326_v7 }
 0x79d   : > { %v4394_v24 = vadd.f32 %v4795_v8, %v4362_v26  ;;  %v4807_v8 = vld [vmem:[%s4928_s29 + $0xe0] sm:$0xff] }
 0x79f   : > { %4426 = vst.msk [vmem:[%s8433_s26 + $0x68] sm:$0xff] %vm9290_vm15, %v4394_v24  ;;  %vm9305_vm15 = vmmov %vm9267_vm0 }
 0x7a0   : > { %v4264_v31 = vpop.f32.mrf.mxu2 }
 0x7a1   : > { %v4327_v0 = vmul.f32 %v8419_v28, %v4264_v31 }
 0x7a3   : > { %v4363_v35 = vadd.f32 %v8424_v4, %v4327_v0  ;;  %v4808_v0 = vld [vmem:[%s4928_s29 + $0xb8] sm:$0xff] }
 0x7a5   : > { %v4395_v10 = vadd.f32 %v4796_v3, %v4363_v35 }
 0x7a7   : > { %4427 = vst.msk [vmem:[%s8433_s26 + $0x70] sm:$0xff] %vm9267_vm0, %v4395_v10 }
 0x7a8   : > { %v4266_v52 = vpop.f32.mrf.mxu2 }
 0x7a9   : > { %v4328_v19 = vmul.f32 %v8419_v28, %v4266_v52 }
 0x7ab   : > { %v4364_v36 = vadd.f32 %v8424_v4, %v4328_v19 }
 0x7ad   : > { %v4396_v50 = vadd.f32 %v4797_v58, %v4364_v36  ;;  %v4809_v58 = vld [vmem:[%s4928_s29 + $0xe8] sm:$0xff] }
 0x7af   : > { %4428 = vst.msk [vmem:[%s8433_s26 + $0x78] sm:$0xff] %vm9291_vm1, %v4396_v50  ;;  %vm9306_vm1 = vmmov %vm9267_vm0 }
 0x7b0   : > { %v4269_v53 = vpop.f32.mrf.mxu2 }
 0x7b1   : > { %v4329_v25 = vmul.f32 %v8419_v28, %v4269_v53 }
 0x7b3   : > { %v4365_v9 = vadd.f32 %v8424_v4, %v4329_v25  ;;  %v4810_v25 = vld [vmem:[%s4928_s29 + $0xc0] sm:$0xff] }
 0x7b5   : > { %v4397_v45 = vadd.f32 %v4798_v43, %v4365_v9 }
 0x7b7   : > { %4429 = vst.msk [vmem:[%s8433_s26 + $0x80] sm:$0xff] %vm9292_vm6, %v4397_v45 }
 0x7b8   : > { %v4271_v27 = vpop.f32.mrf.mxu2 }
 0x7b9   : > { %v4330_v23 = vmul.f32 %v8419_v28, %v4271_v27 }
 0x7bb   : > { %v4366_v54 = vadd.f32 %v8424_v4, %v4330_v23 }
 0x7bd   : > { %v4398_v62 = vadd.f32 %v4799_v46, %v4366_v54  ;;  %v4811_v46 = vld [vmem:[%s4928_s29 + $0xf0] sm:$0xff] }
 0x7bf   : > { %4430 = vst.msk [vmem:[%s8433_s26 + $0x88] sm:$0xff] %vm9293_vm3, %v4398_v62 }
 0x7c0   : > { %v4274_v60 = vpop.f32.mrf.mxu2 }
 0x7c1   : > { %v4331_v37 = vmul.f32 %v8419_v28, %v4274_v60 }
 0x7c3   : > { %v4367_v32 = vadd.f32 %v8424_v4, %v4331_v37  ;;  %v4812_v37 = vld [vmem:[%s4928_s29 + $0xc8] sm:$0xff] }
 0x7c5   : > { %v4399_v51 = vadd.f32 %v4800_v63, %v4367_v32 }
 0x7c7   : > { %4431 = vst.msk [vmem:[%s8433_s26 + $0x90] sm:$0xff] %vm9294_vm5, %v4399_v51 }
 0x7c8   : > { %v4276_v2 = vpop.f32.mrf.mxu2 }
 0x7c9   : > { %v4332_v40 = vmul.f32 %v8419_v28, %v4276_v2 }
 0x7cb   : > { %v4368_v30 = vadd.f32 %v8424_v4, %v4332_v40  ;;  %v4813_v40 = vld [vmem:[%s4928_s29 + $0xf8] sm:$0xff] }
 0x7cd   : > { %v4400_v11 = vadd.f32 %v4801_v39, %v4368_v30 }
 0x7cf   : > { %4432 = vst.msk [vmem:[%s8433_s26 + $0x98] sm:$0xff] %vm9295_vm14, %v4400_v11 }
 0x7d0   : > { %v4279_v17 = vpop.f32.mrf.mxu2 }
 0x7d1   : > { %v4333_v57 = vmul.f32 %v8419_v28, %v4279_v17 }
 0x7d3   : > { %v4369_v33 = vadd.f32 %v8424_v4, %v4333_v57 }
 0x7d5   : > { %v4401_v13 = vadd.f32 %v4802_v12, %v4369_v33 }
 0x7d6   : > { %v4294_v34 = vpop.f32.mrf.mxu3 }
 0x7d7   : > { %4433 = vst.msk [vmem:[%s8433_s26 + $0xa0] sm:$0xff] %vm9296_vm8, %v4401_v13  ;;  %v4339_v6 = vmul.f32 %v8419_v28, %v4294_v34 }
 0x7d8   : > { %v4281_v47 = vpop.f32.mrf.mxu2 }
 0x7d9   : > { %v4375_v1 = vadd.f32 %v8424_v4, %v4339_v6  ;;  %v4334_v49 = vmul.f32 %v8419_v28, %v4281_v47 }
 0x7db   : > { %v4407_v61 = vadd.f32 %v4803_v18, %v4375_v1  ;;  %v4370_v59 = vadd.f32 %v8424_v4, %v4334_v49 }
 0x7dd   : > { %4439 = vst.msk [vmem:[%s8433_s26 + $0xd0] sm:$0xff] %vm9297_vm10, %v4407_v61  ;;  %v4402_v44 = vadd.f32 %v4804_v41, %v4370_v59 }
 0x7de   : > { %v4296_v22 = vpop.f32.mrf.mxu3 }
 0x7df   : > { %4434 = vst.msk [vmem:[%s8433_s26 + $0xa8] sm:$0xff] %vm9298_vm11, %v4402_v44  ;;  %v4340_v15 = vmul.f32 %v8419_v28, %v4296_v22 }
 0x7e0   : > { %v4284_v42 = vpop.f32.mrf.mxu2 }
 0x7e1   : > { %v4376_v14 = vadd.f32 %v8424_v4, %v4340_v15  ;;  %v4335_v16 = vmul.f32 %v8419_v28, %v4284_v42 }
 0x7e3   : > { %v4408_v38 = vadd.f32 %v4805_v56, %v4376_v14  ;;  %v4371_v21 = vadd.f32 %v8424_v4, %v4335_v16 }
 0x7e5   : > { %4440 = vst.msk [vmem:[%s8433_s26 + $0xd8] sm:$0xff] %vm9299_vm12, %v4408_v38  ;;  %v4403_v48 = vadd.f32 %v4806_v5, %v4371_v21 }
 0x7e6   : > { %v4299_v20 = vpop.f32.mrf.mxu3 }
 0x7e7   : > { %4435 = vst.msk [vmem:[%s8433_s26 + $0xb0] sm:$0xff] %vm9300_vm2, %v4403_v48  ;;  %v4341_v55 = vmul.f32 %v8419_v28, %v4299_v20 }
 0x7e8   : > { %v4286_v29 = vpop.f32.mrf.mxu2 }
 0x7e9   : > { %v4377_v7 = vadd.f32 %v8424_v4, %v4341_v55  ;;  %v4336_v26 = vmul.f32 %v8419_v28, %v4286_v29 }
 0x7eb   : > { %v4409_v24 = vadd.f32 %v4807_v8, %v4377_v7  ;;  %v4372_v31 = vadd.f32 %v8424_v4, %v4336_v26 }
 0x7ed   : > { %4441 = vst.msk [vmem:[%s8433_s26 + $0xe0] sm:$0xff] %vm9301_vm4, %v4409_v24  ;;  %v4404_v35 = vadd.f32 %v4808_v0, %v4372_v31 }
 0x7ee   : > { %v4301_v3 = vpop.f32.mrf.mxu3 }
 0x7ef   : > { %4436 = vst.msk [vmem:[%s8433_s26 + $0xb8] sm:$0xff] %vm9302_vm7, %v4404_v35  ;;  %v4342_v10 = vmul.f32 %v8419_v28, %v4301_v3 }
 0x7f0   : > { %v4289_v52 = vpop.f32.mrf.mxu2 }
 0x7f1   : > { %v4378_v19 = vadd.f32 %v8424_v4, %v4342_v10  ;;  %v4337_v36 = vmul.f32 %v8419_v28, %v4289_v52 }
 0x7f3   : > { %v4410_v50 = vadd.f32 %v4809_v58, %v4378_v19  ;;  %v4373_v53 = vadd.f32 %v8424_v4, %v4337_v36 }
 0x7f5   : > { %4442 = vst.msk [vmem:[%s8433_s26 + $0xe8] sm:$0xff] %vm9303_vm9, %v4410_v50  ;;  %v4405_v9 = vadd.f32 %v4810_v25, %v4373_v53 }
 0x7f6   : > { %v4304_v43 = vpop.f32.mrf.mxu3 }
 0x7f7   : > { %4437 = vst.msk [vmem:[%s8433_s26 + $0xc0] sm:$0xff] %vm9304_vm13, %v4405_v9  ;;  %v4343_v45 = vmul.f32 %v8419_v28, %v4304_v43 }
 0x7f8   : > { %v4291_v27 = vpop.f32.mrf.mxu2 }
 0x7f9   : > { %v4379_v23 = vadd.f32 %v8424_v4, %v4343_v45  ;;  %v4338_v54 = vmul.f32 %v8419_v28, %v4291_v27 }
 0x7fb   : > { %v4411_v62 = vadd.f32 %v4811_v46, %v4379_v23  ;;  %v4374_v60 = vadd.f32 %v8424_v4, %v4338_v54 }
 0x7fd   : > { %4443 = vst.msk [vmem:[%s8433_s26 + $0xf0] sm:$0xff] %vm9305_vm15, %v4411_v62  ;;  %v4406_v32 = vadd.f32 %v4812_v37, %v4374_v60 }
 0x7fe   : > { %v4306_v63 = vpop.f32.mrf.mxu3 }
 0x7ff   : > { %4438 = vst.msk [vmem:[%s8433_s26 + $0xc8] sm:$0xff] %vm9267_vm0, %v4406_v32  ;;  %v4344_v51 = vmul.f32 %v8419_v28, %v4306_v63 }
 0x801   : > { %v4380_v2 = vadd.f32 %v8424_v4, %v4344_v51 }
 0x803   : > { %v4412_v30 = vadd.f32 %v4813_v40, %v4380_v2 }
 0x805   : > { %4444 = vst.msk [vmem:[%s8433_s26 + $0xf8] sm:$0xff] %vm9306_vm1, %v4412_v30 }
 0x806 PF: > { %s26_s21 = sadd.s32 1, %s4820_s21  }
 0x807   : > { %p23_p4 = scmp.ge.s32.totalorder %s26_s21, 4  }
 0x809   :  { %25 = sbr.rel (!%p23_p4) target bundleno = 2 (0x2), region = 114 }

</bundles_post_ra>
